<compile_context>
chip_gen: v6e
topology: v6e:2x2x1
jax: 0.10.0
libtpu: 0.0.40
codegen_flags: <defaults>
</compile_context>

<pallas_src>
import functools
import math

import jax
import jax.numpy as jnp
from jax.experimental import pallas as pl


NEG_BLOCK = -1.0e9     # excludes off-(head,batch)-diagonal score blocks entirely
NEG_MASK = -10000.0    # matches the reference additive masks


# ----------------------------- in-kernel helpers ----------------------------

def _erf_approx(x):
    # Polynomial erf (Abramowitz & Stegun 7.1.26, |err|<=1.5e-7); used only if
    # lax.erf does not lower in Mosaic on this jax version.
    a1, a2, a3, a4, a5 = 0.254829592, -0.284496736, 1.421413741, -1.453152027, 1.061405429
    p = 0.3275911
    s = jnp.where(x >= 0.0, 1.0, -1.0)
    ax = jnp.abs(x)
    t = 1.0 / (1.0 + p * ax)
    poly = ((((a5 * t + a4) * t + a3) * t + a2) * t + a1) * t
    return s * (1.0 - poly * jnp.exp(-ax * ax))


def _gelu_exact(x, use_exact_erf):
    erf_fn = jax.lax.erf if use_exact_erf else _erf_approx
    return 0.5 * x * (1.0 + erf_fn(x * (1.0 / math.sqrt(2.0))))


# ------------------------ fully-fused decoder kernel ------------------------

def _decoder_kernel(x_ref, mem_ref, mask_self_ref, mask_cross_ref,
                    sa_wqkv_ref, sa_bqkv_ref, sa_wo_ref, sa_bo_ref,
                    ln1_g_ref, ln1_b_ref,
                    ca_wq_ref, ca_bq_ref, ca_wkv_ref, ca_bkv_ref,
                    ca_wo_ref, ca_bo_ref,
                    ln2_g_ref, ln2_b_ref,
                    ff_w1_ref, ff_b1_ref, ff_w2_ref, ff_b2_ref,
                    ln3_g_ref, ln3_b_ref,
                    out_ref, *, layers_num, heads_num, eps, use_exact_erf):
    f32 = jnp.float32
    bf16 = jnp.bfloat16

    x = x_ref[...].astype(f32)            # [M, H],  M = B*T (batch folded into rows)
    mem = mem_ref[...].astype(f32)        # [N, H],  N = B*S
    mask_self = mask_self_ref[...]        # [heads*M, heads*M]  additive
    mask_cross = mask_cross_ref[...]      # [heads*M, heads*N]  additive

    m_rows = x.shape[0]
    h = x.shape[-1]
    d = h // heads_num

    def split_heads(z, col_off):
        # [rows, >=col_off+H] -> [heads*rows, d]; row order = (head, batch, pos).
        return jnp.concatenate(
            [z[:, col_off + i * d: col_off + (i + 1) * d] for i in range(heads_num)],
            axis=0)

    def merge_heads(z, rows):
        # [heads*rows, d] -> [rows, heads*d]  (inverse of split_heads)
        return jnp.concatenate(
            [z[i * rows:(i + 1) * rows, :] for i in range(heads_num)], axis=1)

    def attend(q_r, k_r, v_r, mask):
        # Single MXU matmul over all (head, batch) pairs; block-diag mask keeps
        # attention within each (head, batch) block. Scale pre-folded into Wq.
        scores = jax.lax.dot_general(
            q_r.astype(bf16), k_r.astype(bf16), (((1,), (1,)), ((), ())),
            preferred_element_type=f32) + mask
        scores = scores - jnp.max(scores, axis=-1, keepdims=True)
        p = jnp.exp(scores)
        p = p * pl.reciprocal(jnp.sum(p, axis=-1, keepdims=True), approx=False)
        return jnp.dot(p.astype(bf16), v_r.astype(bf16), preferred_element_type=f32)

    def layernorm(y, g, b):
        # UER LayerNorm: unbiased variance (N-1), eps added to std; stats in f32.
        mean = jnp.mean(y, axis=-1, keepdims=True)
        dy = y - mean
        var = jnp.sum(dy * dy, axis=-1, keepdims=True) * (1.0 / (h - 1))
        inv = pl.reciprocal(jnp.sqrt(var) + eps, approx=False)   # per-row [rows, 1]
        return g * (dy * inv) + b

    hidden = x
    mem_bf = mem.astype(bf16)
    for l in range(layers_num):            # static unroll; all state stays on-chip
        # ---------------- self attention (fused QKV projection) --------------
        qkv = (jnp.dot(hidden.astype(bf16), sa_wqkv_ref[l],
                       preferred_element_type=f32) + sa_bqkv_ref[l])       # [M, 3H]
        ctx = merge_heads(
            attend(split_heads(qkv, 0), split_heads(qkv, h),
                   split_heads(qkv, 2 * h), mask_self),
            m_rows)                                                        # [M, H]
        attn_out = (jnp.dot(ctx.astype(bf16), sa_wo_ref[l],
                            preferred_element_type=f32) + sa_bo_ref[l])
        hidden1 = layernorm(attn_out + hidden, ln1_g_ref[l], ln1_b_ref[l])

        # ---------------- cross attention (fused KV projection) --------------
        qc = (jnp.dot(hidden1.astype(bf16), ca_wq_ref[l],
                      preferred_element_type=f32) + ca_bq_ref[l])          # [M, H]
        kv = (jnp.dot(mem_bf, ca_wkv_ref[l],
                      preferred_element_type=f32) + ca_bkv_ref[l])         # [N, 2H]
        ctx2 = merge_heads(
            attend(split_heads(qc, 0), split_heads(kv, 0), split_heads(kv, h),
                   mask_cross),
            m_rows)
        ctx_out = (jnp.dot(ctx2.astype(bf16), ca_wo_ref[l],
                           preferred_element_type=f32) + ca_bo_ref[l])
        hidden2 = layernorm(ctx_out + hidden1, ln2_g_ref[l], ln2_b_ref[l])

        # ---------------- feed forward (GELU kept in f32) ---------------------
        inter = (jnp.dot(hidden2.astype(bf16), ff_w1_ref[l],
                         preferred_element_type=f32) + ff_b1_ref[l])       # [M, F]
        inter = _gelu_exact(inter, use_exact_erf)
        ffout = (jnp.dot(inter.astype(bf16), ff_w2_ref[l],
                         preferred_element_type=f32) + ff_b2_ref[l])
        hidden = layernorm(ffout + hidden2, ln3_g_ref[l], ln3_b_ref[l])

    # TODO(synk): output last dim is H=32 (<128 lanes) so stores are masked; at
    # 2 KB total a lane-dense repack is not worth the in-kernel relayout.
    out_ref[...] = hidden.astype(out_ref.dtype)


# ------------------------------- host wrapper --------------------------------

def _build_masks(batch, tgt_len, src_len, heads_num, src_token_ids):
    """Block-diagonal (head, batch) additive masks matching the reference."""
    m = batch * tgt_len
    n = batch * src_len
    rows = heads_num * m
    cols = heads_num * n

    ridx = jnp.arange(rows)
    head_q = ridx // m
    bt = ridx % m
    batch_q = bt // tgt_len
    t_q = bt % tgt_len

    # Self-attention: valid only within the same (head, batch) block; causal
    # positions inside the block get 0, future positions get -10000 (reference).
    same_self = ((head_q[:, None] == head_q[None, :]) &
                 (batch_q[:, None] == batch_q[None, :]))
    causal = t_q[:, None] >= t_q[None, :]
    mask_self = jnp.where(same_self,
                          jnp.where(causal, 0.0, NEG_MASK),
                          NEG_BLOCK).astype(jnp.float32)

    cidx = jnp.arange(cols)
    head_k = cidx // n
    bs = cidx % n
    batch_k = bs // src_len
    tok_ok = jnp.tile((src_token_ids > 0).reshape(n), (heads_num,))   # [heads*B*S]

    same_cross = ((head_q[:, None] == head_k[None, :]) &
                  (batch_q[:, None] == batch_k[None, :]))
    mask_cross = jnp.where(same_cross,
                           jnp.where(tok_ok[None, :], 0.0, NEG_MASK),
                           NEG_BLOCK).astype(jnp.float32)
    return mask_self, mask_cross


def transformer_decoder(params, memory_bank, emb, src_token_ids, heads_num,
                        use_exact_erf):
    """Forward of TransformerDecoder (post-LN, no relative position embedding)."""
    b, s_src, h = memory_bank.shape
    _, t_tgt, _ = emb.shape
    layers_num = params["sa_wqkv"].shape[0]

    mask_self, mask_cross = _build_masks(b, t_tgt, s_src, heads_num, src_token_ids)

    x2 = emb.reshape(b * t_tgt, h)                 # batch folded into matmul M dim
    mem2 = memory_bank.reshape(b * s_src, h)

    weight_order = ("sa_wqkv", "sa_bqkv", "sa_wo", "sa_bo", "ln1_g", "ln1_b",
                    "ca_wq", "ca_bq", "ca_wkv", "ca_bkv", "ca_wo", "ca_bo",
                    "ln2_g", "ln2_b",
                    "ff_w1", "ff_b1", "ff_w2", "ff_b2", "ln3_g", "ln3_b")
    weights = tuple(params[k] for k in weight_order)

    kernel = functools.partial(_decoder_kernel, layers_num=layers_num,
                               heads_num=heads_num, eps=1e-6,
                               use_exact_erf=use_exact_erf)

    # Single pallas_call, no grid: every operand is resident in VMEM once and
    # both decoder layers run back-to-back on chip.
    out = pl.pallas_call(
        kernel,
        out_shape=jax.ShapeDtypeStruct((b * t_tgt, h), emb.dtype),
    )(x2, mem2, mask_self, mask_cross, *weights)

    # layernorm_positioning == 'post' -> no final layer norm.
    # TODO(synk): 'pre' positioning final LayerNorm and RelativePositionEmbedding
    # are disabled by this config and not implemented.
    return out.reshape(b, t_tgt, h)


# ------------------------------ param init ----------------------------------

def _linear_w(key, n_in, n_out):
    return 0.02 * jax.random.normal(key, (n_in, n_out), jnp.float32)


def init_params(key, layers_num, hidden, heads_num, feedforward):
    d = hidden // heads_num
    scale = 1.0 / math.sqrt(float(d))      # folded into Q projections (opt #6)
    per_layer = []
    for lk in jax.random.split(key, layers_num):
        k_self, k_ctx, k_ff1, k_ff2 = jax.random.split(lk, 4)
        ks_q, ks_k, ks_v, ks_o = jax.random.split(k_self, 4)
        kc_q, kc_k, kc_v, kc_o = jax.random.split(k_ctx, 4)
        sa_bq = jnp.zeros((1, hidden), jnp.float32) * scale
        per_layer.append({
            # self-attention: Q|K|V fused into one [H, 3H] weight (biases [1, 3H]).
            "sa_wqkv": jnp.concatenate(
                [_linear_w(ks_q, hidden, hidden) * scale,
                 _linear_w(ks_k, hidden, hidden),
                 _linear_w(ks_v, hidden, hidden)], axis=1),
            "sa_bqkv": jnp.concatenate(
                [sa_bq, jnp.zeros((1, 2 * hidden), jnp.float32)], axis=1),
            "sa_wo": _linear_w(ks_o, hidden, hidden),
            "sa_bo": jnp.zeros((1, hidden), jnp.float32),
            # cross-attention: Q separate (decoder hidden), K|V fused (memory).
            "ca_wq": _linear_w(kc_q, hidden, hidden) * scale,
            "ca_bq": jnp.zeros((1, hidden), jnp.float32) * scale,
            "ca_wkv": jnp.concatenate([_linear_w(kc_k, hidden, hidden),
                                       _linear_w(kc_v, hidden, hidden)], axis=1),
            "ca_bkv": jnp.zeros((1, 2 * hidden), jnp.float32),
            "ca_wo": _linear_w(kc_o, hidden, hidden),
            "ca_bo": jnp.zeros((1, hidden), jnp.float32),
            "ff_w1": _linear_w(k_ff1, hidden, feedforward),
            "ff_b1": jnp.zeros((1, feedforward), jnp.float32),
            "ff_w2": _linear_w(k_ff2, feedforward, hidden),
            "ff_b2": jnp.zeros((1, hidden), jnp.float32),
            "ln1_g": jnp.ones((1, hidden), jnp.float32),
            "ln1_b": jnp.zeros((1, hidden), jnp.float32),
            "ln2_g": jnp.ones((1, hidden), jnp.float32),
            "ln2_b": jnp.zeros((1, hidden), jnp.float32),
            "ln3_g": jnp.ones((1, hidden), jnp.float32),
            "ln3_b": jnp.zeros((1, hidden), jnp.float32),
        })

    # Stack each parameter along a leading layer axis; matmul weights stored in
    # bf16 (MXU operands), biases / LayerNorm params stay f32.
    bf16_keys = {"sa_wqkv", "sa_wo", "ca_wq", "ca_wkv", "ca_wo", "ff_w1", "ff_w2"}
    stacked = {}
    for k in per_layer[0]:
        w = jnp.stack([layer[k] for layer in per_layer], axis=0)
        stacked[k] = w.astype(jnp.bfloat16) if k in bf16_keys else w
    return stacked


# ------------------------------ erf capability -------------------------------

def _erf_supported():
    """Probe whether lax.erf lowers in Mosaic on this jax version."""
    def k(x_ref, o_ref):
        o_ref[...] = jax.lax.erf(x_ref[...])
    try:
        x = jnp.zeros((8, 128), jnp.float32)
        out = pl.pallas_call(
            k, out_shape=jax.ShapeDtypeStruct((8, 128), jnp.float32))(x)
        jax.block_until_ready(out)
        return True
    except Exception:
        return False


# --------------------------------- main --------------------------------------

if __name__ == "__main__":
    BATCH, SRC_SEQ, TGT_SEQ = 2, 8, 8
    HIDDEN, HEADS, FFN, LAYERS = 32, 2, 64, 2

    root = jax.random.PRNGKey(0)
    k_param, k_mem, k_emb = jax.random.split(root, 3)

    params = init_params(k_param, LAYERS, HIDDEN, HEADS, FFN)

    memory_bank = jax.random.normal(k_mem, (BATCH, SRC_SEQ, HIDDEN), jnp.float32)
    emb = jax.random.normal(k_emb, (BATCH, TGT_SEQ, HIDDEN), jnp.float32)
    # additional_info[0]: source token ids (0 = padding).
    src_token_ids = jnp.array(
        [[5, 9, 2, 7, 3, 0, 0, 0],
         [4, 1, 8, 6, 2, 9, 3, 0]], dtype=jnp.int32)

    use_exact_erf = _erf_supported()

    fwd = jax.jit(functools.partial(transformer_decoder, heads_num=HEADS,
                                    use_exact_erf=use_exact_erf))
    hidden = jax.block_until_ready(fwd(params, memory_bank, emb, src_token_ids))

    assert hidden.shape == (BATCH, TGT_SEQ, HIDDEN)
    assert bool(jnp.all(jnp.isfinite(hidden)))
    print("KERNEL_OK")
</pallas_src>

<mosaic_0001>
module attributes {stable_mosaic.version = 11 : i64} {
  func.func @k(%arg0: memref<8x128xf32, #tpu.memory_space<vmem>>, %arg1: memref<8x128xf32, #tpu.memory_space<vmem>>) attributes {dimension_semantics = [], scalar_prefetch = 0 : i64, scratch_operands = 0 : i64, tpu.core_type = #tpu.core_type<tc>} {
    %c0 = arith.constant 0 : index
    %c0_0 = arith.constant 0 : index
    %0 = vector.load %arg0[%c0, %c0_0] : memref<8x128xf32, #tpu.memory_space<vmem>>, vector<8x128xf32>
    %1 = math.erf %0 : vector<8x128xf32>
    %c0_1 = arith.constant 0 : index
    %c0_2 = arith.constant 0 : index
    %2 = vector.load %arg1[%c0_1, %c0_2] : memref<8x128xf32, #tpu.memory_space<vmem>>, vector<8x128xf32>
    tpu.vector_store %arg1[%c0_1, %c0_2], %1 {strides = array<i32>} : memref<8x128xf32, #tpu.memory_space<vmem>>, vector<8x128xf32>,
    return
  }
}

module attributes {stable_mosaic.version = 11 : i64} {
  func.func @_decoder_kernel(%arg0: memref<16x32xf32, #tpu.memory_space<vmem>>, %arg1: memref<16x32xf32, #tpu.memory_space<vmem>>, %arg2: memref<32x32xf32, #tpu.memory_space<vmem>>, %arg3: memref<32x32xf32, #tpu.memory_space<vmem>>, %arg4: memref<2x32x96xbf16, #tpu.memory_space<vmem>>, %arg5: memref<2x1x96xf32, #tpu.memory_space<vmem>>, %arg6: memref<2x32x32xbf16, #tpu.memory_space<vmem>>, %arg7: memref<2x1x32xf32, #tpu.memory_space<vmem>>, %arg8: memref<2x1x32xf32, #tpu.memory_space<vmem>>, %arg9: memref<2x1x32xf32, #tpu.memory_space<vmem>>, %arg10: memref<2x32x32xbf16, #tpu.memory_space<vmem>>, %arg11: memref<2x1x32xf32, #tpu.memory_space<vmem>>, %arg12: memref<2x32x64xbf16, #tpu.memory_space<vmem>>, %arg13: memref<2x1x64xf32, #tpu.memory_space<vmem>>, %arg14: memref<2x32x32xbf16, #tpu.memory_space<vmem>>, %arg15: memref<2x1x32xf32, #tpu.memory_space<vmem>>, %arg16: memref<2x1x32xf32, #tpu.memory_space<vmem>>, %arg17: memref<2x1x32xf32, #tpu.memory_space<vmem>>, %arg18: memref<2x32x64xbf16, #tpu.memory_space<vmem>>, %arg19: memref<2x1x64xf32, #tpu.memory_space<vmem>>, %arg20: memref<2x64x32xbf16, #tpu.memory_space<vmem>>, %arg21: memref<2x1x32xf32, #tpu.memory_space<vmem>>, %arg22: memref<2x1x32xf32, #tpu.memory_space<vmem>>, %arg23: memref<2x1x32xf32, #tpu.memory_space<vmem>>, %arg24: memref<16x32xf32, #tpu.memory_space<vmem>>) attributes {dimension_semantics = [], scalar_prefetch = 0 : i64, scratch_operands = 0 : i64, tpu.core_type = #tpu.core_type<tc>} {
    %c0 = arith.constant 0 : index
    %c0_0 = arith.constant 0 : index
    %0 = vector.load %arg0[%c0, %c0_0] : memref<16x32xf32, #tpu.memory_space<vmem>>, vector<16x32xf32>
    %c0_1 = arith.constant 0 : index
    %c0_2 = arith.constant 0 : index
    %1 = vector.load %arg1[%c0_1, %c0_2] : memref<16x32xf32, #tpu.memory_space<vmem>>, vector<16x32xf32>
    %c0_3 = arith.constant 0 : index
    %c0_4 = arith.constant 0 : index
    %2 = vector.load %arg2[%c0_3, %c0_4] : memref<32x32xf32, #tpu.memory_space<vmem>>, vector<32x32xf32>
    %c0_5 = arith.constant 0 : index
    %c0_6 = arith.constant 0 : index
    %3 = vector.load %arg3[%c0_5, %c0_6] : memref<32x32xf32, #tpu.memory_space<vmem>>, vector<32x32xf32>
    %4 = arith.truncf %1 : vector<16x32xf32> to vector<16x32xbf16>
    %5 = arith.truncf %0 : vector<16x32xf32> to vector<16x32xbf16>
    %c0_7 = arith.constant 0 : index
    %c0_8 = arith.constant 0 : index
    %c0_9 = arith.constant 0 : index
    %6 = vector.load %arg4[%c0_7, %c0_8, %c0_9] : memref<2x32x96xbf16, #tpu.memory_space<vmem>>, vector<1x32x96xbf16>
    %7 = vector.shape_cast %6 : vector<1x32x96xbf16> to vector<32x96xbf16>
    %cst = arith.constant dense<0.000000e+00> : vector<16x96xf32>
    %8 = tpu.matmul %5, %7, %cst {dimension_numbers = #tpu.dot_dimension_numbers<[1], [0], [0], [1], [0, 0, 1, 1], [], []>} : vector<16x32xbf16>, vector<32x96xbf16>, vector<16x96xf32> -> vector<16x96xf32>
    %c0_10 = arith.constant 0 : index
    %c0_11 = arith.constant 0 : index
    %c0_12 = arith.constant 0 : index
    %9 = vector.load %arg5[%c0_10, %c0_11, %c0_12] : memref<2x1x96xf32, #tpu.memory_space<vmem>>, vector<1x1x96xf32>
    %10 = vector.shape_cast %9 : vector<1x1x96xf32> to vector<1x96xf32>
    %11 = vector.broadcast %10 : vector<1x96xf32> to vector<16x96xf32>
    %12 = arith.addf %8, %11 : vector<16x96xf32>
    %13 = vector.extract_strided_slice %12 {offsets = [0, 0], sizes = [16, 16], strides = [1, 1]} : vector<16x96xf32> to vector<16x16xf32>
    %14 = vector.extract_strided_slice %12 {offsets = [0, 16], sizes = [16, 16], strides = [1, 1]} : vector<16x96xf32> to vector<16x16xf32>
    %15 = tpu.concatenate %13, %14 in 0 : vector<16x16xf32>, vector<16x16xf32> -> vector<32x16xf32>
    %16 = vector.extract_strided_slice %12 {offsets = [0, 32], sizes = [16, 16], strides = [1, 1]} : vector<16x96xf32> to vector<16x16xf32>
    %17 = vector.extract_strided_slice %12 {offsets = [0, 48], sizes = [16, 16], strides = [1, 1]} : vector<16x96xf32> to vector<16x16xf32>
    %18 = tpu.concatenate %16, %17 in 0 : vector<16x16xf32>, vector<16x16xf32> -> vector<32x16xf32>
    %19 = vector.extract_strided_slice %12 {offsets = [0, 64], sizes = [16, 16], strides = [1, 1]} : vector<16x96xf32> to vector<16x16xf32>
    %20 = vector.extract_strided_slice %12 {offsets = [0, 80], sizes = [16, 16], strides = [1, 1]} : vector<16x96xf32> to vector<16x16xf32>
    %21 = tpu.concatenate %19, %20 in 0 : vector<16x16xf32>, vector<16x16xf32> -> vector<32x16xf32>
    %22 = arith.truncf %15 : vector<32x16xf32> to vector<32x16xbf16>
    %23 = arith.truncf %18 : vector<32x16xf32> to vector<32x16xbf16>
    %cst_13 = arith.constant dense<0.000000e+00> : vector<32x32xf32>
    %24 = tpu.matmul %22, %23, %cst_13 {dimension_numbers = #tpu.dot_dimension_numbers<[1], [1], [0], [0], [0, 0, 1, 0], [], []>} : vector<32x16xbf16>, vector<32x16xbf16>, vector<32x32xf32> -> vector<32x32xf32>
    %25 = arith.addf %24, %2 : vector<32x32xf32>
    %cst_14 = arith.constant dense<0xFF800000> : vector<32xf32>
    %26 = vector.multi_reduction <maximumf>, %25, %cst_14 [1] : vector<32x32xf32> to vector<32xf32>
    %27 = vector.shape_cast %26 : vector<32xf32> to vector<32x1xf32>
    %28 = vector.broadcast %27 : vector<32x1xf32> to vector<32x32xf32>
    %29 = arith.subf %25, %28 : vector<32x32xf32>
    %30 = math.exp %29 : vector<32x32xf32>
    %cst_15 = arith.constant dense<0.000000e+00> : vector<32xf32>
    %31 = vector.multi_reduction <add>, %30, %cst_15 [1] : vector<32x32xf32> to vector<32xf32>
    %32 = vector.shape_cast %31 : vector<32xf32> to vector<32x1xf32>
    %33 = tpu.reciprocal %32 : vector<32x1xf32> -> vector<32x1xf32>
    %34 = vector.broadcast %33 : vector<32x1xf32> to vector<32x32xf32>
    %35 = arith.mulf %30, %34 : vector<32x32xf32>
    %36 = arith.truncf %35 : vector<32x32xf32> to vector<32x32xbf16>
    %37 = arith.truncf %21 : vector<32x16xf32> to vector<32x16xbf16>
    %cst_16 = arith.constant dense<0.000000e+00> : vector<32x16xf32>
    %38 = tpu.matmul %36, %37, %cst_16 {dimension_numbers = #tpu.dot_dimension_numbers<[1], [0], [0], [1], [0, 0, 1, 1], [], []>} : vector<32x32xbf16>, vector<32x16xbf16>, vector<32x16xf32> -> vector<32x16xf32>
    %39 = vector.extract_strided_slice %38 {offsets = [0, 0], sizes = [16, 16], strides = [1, 1]} : vector<32x16xf32> to vector<16x16xf32>
    %40 = vector.extract_strided_slice %38 {offsets = [16, 0], sizes = [16, 16], strides = [1, 1]} : vector<32x16xf32> to vector<16x16xf32>
    %41 = tpu.concatenate %39, %40 in 1 : vector<16x16xf32>, vector<16x16xf32> -> vector<16x32xf32>
    %42 = arith.truncf %41 : vector<16x32xf32> to vector<16x32xbf16>
    %c0_17 = arith.constant 0 : index
    %c0_18 = arith.constant 0 : index
    %c0_19 = arith.constant 0 : index
    %43 = vector.load %arg6[%c0_17, %c0_18, %c0_19] : memref<2x32x32xbf16, #tpu.memory_space<vmem>>, vector<1x32x32xbf16>
    %44 = vector.shape_cast %43 : vector<1x32x32xbf16> to vector<32x32xbf16>
    %cst_20 = arith.constant dense<0.000000e+00> : vector<16x32xf32>
    %45 = tpu.matmul %42, %44, %cst_20 {dimension_numbers = #tpu.dot_dimension_numbers<[1], [0], [0], [1], [0, 0, 1, 1], [], []>} : vector<16x32xbf16>, vector<32x32xbf16>, vector<16x32xf32> -> vector<16x32xf32>
    %c0_21 = arith.constant 0 : index
    %c0_22 = arith.constant 0 : index
    %c0_23 = arith.constant 0 : index
    %46 = vector.load %arg7[%c0_21, %c0_22, %c0_23] : memref<2x1x32xf32, #tpu.memory_space<vmem>>, vector<1x1x32xf32>
    %47 = vector.shape_cast %46 : vector<1x1x32xf32> to vector<1x32xf32>
    %48 = vector.broadcast %47 : vector<1x32xf32> to vector<16x32xf32>
    %49 = arith.addf %45, %48 : vector<16x32xf32>
    %50 = arith.addf %49, %0 : vector<16x32xf32>
    %c0_24 = arith.constant 0 : index
    %c0_25 = arith.constant 0 : index
    %c0_26 = arith.constant 0 : index
    %51 = vector.load %arg8[%c0_24, %c0_25, %c0_26] : memref<2x1x32xf32, #tpu.memory_space<vmem>>, vector<1x1x32xf32>
    %52 = vector.shape_cast %51 : vector<1x1x32xf32> to vector<1x32xf32>
    %c0_27 = arith.constant 0 : index
    %c0_28 = arith.constant 0 : index
    %c0_29 = arith.constant 0 : index
    %53 = vector.load %arg9[%c0_27, %c0_28, %c0_29] : memref<2x1x32xf32, #tpu.memory_space<vmem>>, vector<1x1x32xf32>
    %54 = vector.shape_cast %53 : vector<1x1x32xf32> to vector<1x32xf32>
    %cst_30 = arith.constant dense<0.000000e+00> : vector<16xf32>
    %55 = vector.multi_reduction <add>, %50, %cst_30 [1] : vector<16x32xf32> to vector<16xf32>
    %56 = vector.shape_cast %55 : vector<16xf32> to vector<16x1xf32>
    %cst_31 = arith.constant 3.200000e+01 : f32
    %57 = vector.broadcast %cst_31 : f32 to vector<16x1xf32>
    %58 = arith.divf %56, %57 : vector<16x1xf32>
    %59 = vector.broadcast %58 : vector<16x1xf32> to vector<16x32xf32>
    %60 = arith.subf %50, %59 : vector<16x32xf32>
    %61 = arith.mulf %60, %60 : vector<16x32xf32>
    %cst_32 = arith.constant dense<0.000000e+00> : vector<16xf32>
    %62 = vector.multi_reduction <add>, %61, %cst_32 [1] : vector<16x32xf32> to vector<16xf32>
    %63 = vector.shape_cast %62 : vector<16xf32> to vector<16x1xf32>
    %cst_33 = arith.constant 0.0322580636 : f32
    %64 = vector.broadcast %cst_33 : f32 to vector<16x1xf32>
    %65 = arith.mulf %63, %64 : vector<16x1xf32>
    %66 = math.sqrt %65 : vector<16x1xf32>
    %cst_34 = arith.constant 9.99999997E-7 : f32
    %67 = vector.broadcast %cst_34 : f32 to vector<16x1xf32>
    %68 = arith.addf %66, %67 : vector<16x1xf32>
    %69 = tpu.reciprocal %68 : vector<16x1xf32> -> vector<16x1xf32>
    %70 = vector.broadcast %69 : vector<16x1xf32> to vector<16x32xf32>
    %71 = arith.mulf %60, %70 : vector<16x32xf32>
    %72 = vector.broadcast %52 : vector<1x32xf32> to vector<16x32xf32>
    %73 = arith.mulf %72, %71 : vector<16x32xf32>
    %74 = vector.broadcast %54 : vector<1x32xf32> to vector<16x32xf32>
    %75 = arith.addf %73, %74 : vector<16x32xf32>
    %76 = arith.truncf %75 : vector<16x32xf32> to vector<16x32xbf16>
    %c0_35 = arith.constant 0 : index
    %c0_36 = arith.constant 0 : index
    %c0_37 = arith.constant 0 : index
    %77 = vector.load %arg10[%c0_35, %c0_36, %c0_37] : memref<2x32x32xbf16, #tpu.memory_space<vmem>>, vector<1x32x32xbf16>
    %78 = vector.shape_cast %77 : vector<1x32x32xbf16> to vector<32x32xbf16>
    %cst_38 = arith.constant dense<0.000000e+00> : vector<16x32xf32>
    %79 = tpu.matmul %76, %78, %cst_38 {dimension_numbers = #tpu.dot_dimension_numbers<[1], [0], [0], [1], [0, 0, 1, 1], [], []>} : vector<16x32xbf16>, vector<32x32xbf16>, vector<16x32xf32> -> vector<16x32xf32>
    %c0_39 = arith.constant 0 : index
    %c0_40 = arith.constant 0 : index
    %c0_41 = arith.constant 0 : index
    %80 = vector.load %arg11[%c0_39, %c0_40, %c0_41] : memref<2x1x32xf32, #tpu.memory_space<vmem>>, vector<1x1x32xf32>
    %81 = vector.shape_cast %80 : vector<1x1x32xf32> to vector<1x32xf32>
    %82 = vector.broadcast %81 : vector<1x32xf32> to vector<16x32xf32>
    %83 = arith.addf %79, %82 : vector<16x32xf32>
    %c0_42 = arith.constant 0 : index
    %c0_43 = arith.constant 0 : index
    %c0_44 = arith.constant 0 : index
    %84 = vector.load %arg12[%c0_42, %c0_43, %c0_44] : memref<2x32x64xbf16, #tpu.memory_space<vmem>>, vector<1x32x64xbf16>
    %85 = vector.shape_cast %84 : vector<1x32x64xbf16> to vector<32x64xbf16>
    %cst_45 = arith.constant dense<0.000000e+00> : vector<16x64xf32>
    %86 = tpu.matmul %4, %85, %cst_45 {dimension_numbers = #tpu.dot_dimension_numbers<[1], [0], [0], [1], [0, 0, 1, 1], [], []>} : vector<16x32xbf16>, vector<32x64xbf16>, vector<16x64xf32> -> vector<16x64xf32>
    %c0_46 = arith.constant 0 : index
    %c0_47 = arith.constant 0 : index
    %c0_48 = arith.constant 0 : index
    %87 = vector.load %arg13[%c0_46, %c0_47, %c0_48] : memref<2x1x64xf32, #tpu.memory_space<vmem>>, vector<1x1x64xf32>
    %88 = vector.shape_cast %87 : vector<1x1x64xf32> to vector<1x64xf32>
    %89 = vector.broadcast %88 : vector<1x64xf32> to vector<16x64xf32>
    %90 = arith.addf %86, %89 : vector<16x64xf32>
    %91 = vector.extract_strided_slice %83 {offsets = [0, 0], sizes = [16, 16], strides = [1, 1]} : vector<16x32xf32> to vector<16x16xf32>
    %92 = vector.extract_strided_slice %83 {offsets = [0, 16], sizes = [16, 16], strides = [1, 1]} : vector<16x32xf32> to vector<16x16xf32>
    %93 = tpu.concatenate %91, %92 in 0 : vector<16x16xf32>, vector<16x16xf32> -> vector<32x16xf32>
    %94 = vector.extract_strided_slice %90 {offsets = [0, 0], sizes = [16, 16], strides = [1, 1]} : vector<16x64xf32> to vector<16x16xf32>
    %95 = vector.extract_strided_slice %90 {offsets = [0, 16], sizes = [16, 16], strides = [1, 1]} : vector<16x64xf32> to vector<16x16xf32>
    %96 = tpu.concatenate %94, %95 in 0 : vector<16x16xf32>, vector<16x16xf32> -> vector<32x16xf32>
    %97 = vector.extract_strided_slice %90 {offsets = [0, 32], sizes = [16, 16], strides = [1, 1]} : vector<16x64xf32> to vector<16x16xf32>
    %98 = vector.extract_strided_slice %90 {offsets = [0, 48], sizes = [16, 16], strides = [1, 1]} : vector<16x64xf32> to vector<16x16xf32>
    %99 = tpu.concatenate %97, %98 in 0 : vector<16x16xf32>, vector<16x16xf32> -> vector<32x16xf32>
    %100 = arith.truncf %93 : vector<32x16xf32> to vector<32x16xbf16>
    %101 = arith.truncf %96 : vector<32x16xf32> to vector<32x16xbf16>
    %cst_49 = arith.constant dense<0.000000e+00> : vector<32x32xf32>
    %102 = tpu.matmul %100, %101, %cst_49 {dimension_numbers = #tpu.dot_dimension_numbers<[1], [1], [0], [0], [0, 0, 1, 0], [], []>} : vector<32x16xbf16>, vector<32x16xbf16>, vector<32x32xf32> -> vector<32x32xf32>
    %103 = arith.addf %102, %3 : vector<32x32xf32>
    %cst_50 = arith.constant dense<0xFF800000> : vector<32xf32>
    %104 = vector.multi_reduction <maximumf>, %103, %cst_50 [1] : vector<32x32xf32> to vector<32xf32>
    %105 = vector.shape_cast %104 : vector<32xf32> to vector<32x1xf32>
    %106 = vector.broadcast %105 : vector<32x1xf32> to vector<32x32xf32>
    %107 = arith.subf %103, %106 : vector<32x32xf32>
    %108 = math.exp %107 : vector<32x32xf32>
    %cst_51 = arith.constant dense<0.000000e+00> : vector<32xf32>
    %109 = vector.multi_reduction <add>, %108, %cst_51 [1] : vector<32x32xf32> to vector<32xf32>
    %110 = vector.shape_cast %109 : vector<32xf32> to vector<32x1xf32>
    %111 = tpu.reciprocal %110 : vector<32x1xf32> -> vector<32x1xf32>
    %112 = vector.broadcast %111 : vector<32x1xf32> to vector<32x32xf32>
    %113 = arith.mulf %108, %112 : vector<32x32xf32>
    %114 = arith.truncf %113 : vector<32x32xf32> to vector<32x32xbf16>
    %115 = arith.truncf %99 : vector<32x16xf32> to vector<32x16xbf16>
    %cst_52 = arith.constant dense<0.000000e+00> : vector<32x16xf32>
    %116 = tpu.matmul %114, %115, %cst_52 {dimension_numbers = #tpu.dot_dimension_numbers<[1], [0], [0], [1], [0, 0, 1, 1], [], []>} : vector<32x32xbf16>, vector<32x16xbf16>, vector<32x16xf32> -> vector<32x16xf32>
    %117 = vector.extract_strided_slice %116 {offsets = [0, 0], sizes = [16, 16], strides = [1, 1]} : vector<32x16xf32> to vector<16x16xf32>
    %118 = vector.extract_strided_slice %116 {offsets = [16, 0], sizes = [16, 16], strides = [1, 1]} : vector<32x16xf32> to vector<16x16xf32>
    %119 = tpu.concatenate %117, %118 in 1 : vector<16x16xf32>, vector<16x16xf32> -> vector<16x32xf32>
    %120 = arith.truncf %119 : vector<16x32xf32> to vector<16x32xbf16>
    %c0_53 = arith.constant 0 : index
    %c0_54 = arith.constant 0 : index
    %c0_55 = arith.constant 0 : index
    %121 = vector.load %arg14[%c0_53, %c0_54, %c0_55] : memref<2x32x32xbf16, #tpu.memory_space<vmem>>, vector<1x32x32xbf16>
    %122 = vector.shape_cast %121 : vector<1x32x32xbf16> to vector<32x32xbf16>
    %cst_56 = arith.constant dense<0.000000e+00> : vector<16x32xf32>
    %123 = tpu.matmul %120, %122, %cst_56 {dimension_numbers = #tpu.dot_dimension_numbers<[1], [0], [0], [1], [0, 0, 1, 1], [], []>} : vector<16x32xbf16>, vector<32x32xbf16>, vector<16x32xf32> -> vector<16x32xf32>
    %c0_57 = arith.constant 0 : index
    %c0_58 = arith.constant 0 : index
    %c0_59 = arith.constant 0 : index
    %124 = vector.load %arg15[%c0_57, %c0_58, %c0_59] : memref<2x1x32xf32, #tpu.memory_space<vmem>>, vector<1x1x32xf32>
    %125 = vector.shape_cast %124 : vector<1x1x32xf32> to vector<1x32xf32>
    %126 = vector.broadcast %125 : vector<1x32xf32> to vector<16x32xf32>
    %127 = arith.addf %123, %126 : vector<16x32xf32>
    %128 = arith.addf %127, %75 : vector<16x32xf32>
    %c0_60 = arith.constant 0 : index
    %c0_61 = arith.constant 0 : index
    %c0_62 = arith.constant 0 : index
    %129 = vector.load %arg16[%c0_60, %c0_61, %c0_62] : memref<2x1x32xf32, #tpu.memory_space<vmem>>, vector<1x1x32xf32>
    %130 = vector.shape_cast %129 : vector<1x1x32xf32> to vector<1x32xf32>
    %c0_63 = arith.constant 0 : index
    %c0_64 = arith.constant 0 : index
    %c0_65 = arith.constant 0 : index
    %131 = vector.load %arg17[%c0_63, %c0_64, %c0_65] : memref<2x1x32xf32, #tpu.memory_space<vmem>>, vector<1x1x32xf32>
    %132 = vector.shape_cast %131 : vector<1x1x32xf32> to vector<1x32xf32>
    %cst_66 = arith.constant dense<0.000000e+00> : vector<16xf32>
    %133 = vector.multi_reduction <add>, %128, %cst_66 [1] : vector<16x32xf32> to vector<16xf32>
    %134 = vector.shape_cast %133 : vector<16xf32> to vector<16x1xf32>
    %cst_67 = arith.constant 3.200000e+01 : f32
    %135 = vector.broadcast %cst_67 : f32 to vector<16x1xf32>
    %136 = arith.divf %134, %135 : vector<16x1xf32>
    %137 = vector.broadcast %136 : vector<16x1xf32> to vector<16x32xf32>
    %138 = arith.subf %128, %137 : vector<16x32xf32>
    %139 = arith.mulf %138, %138 : vector<16x32xf32>
    %cst_68 = arith.constant dense<0.000000e+00> : vector<16xf32>
    %140 = vector.multi_reduction <add>, %139, %cst_68 [1] : vector<16x32xf32> to vector<16xf32>
    %141 = vector.shape_cast %140 : vector<16xf32> to vector<16x1xf32>
    %cst_69 = arith.constant 0.0322580636 : f32
    %142 = vector.broadcast %cst_69 : f32 to vector<16x1xf32>
    %143 = arith.mulf %141, %142 : vector<16x1xf32>
    %144 = math.sqrt %143 : vector<16x1xf32>
    %cst_70 = arith.constant 9.99999997E-7 : f32
    %145 = vector.broadcast %cst_70 : f32 to vector<16x1xf32>
    %146 = arith.addf %144, %145 : vector<16x1xf32>
    %147 = tpu.reciprocal %146 : vector<16x1xf32> -> vector<16x1xf32>
    %148 = vector.broadcast %147 : vector<16x1xf32> to vector<16x32xf32>
    %149 = arith.mulf %138, %148 : vector<16x32xf32>
    %150 = vector.broadcast %130 : vector<1x32xf32> to vector<16x32xf32>
    %151 = arith.mulf %150, %149 : vector<16x32xf32>
    %152 = vector.broadcast %132 : vector<1x32xf32> to vector<16x32xf32>
    %153 = arith.addf %151, %152 : vector<16x32xf32>
    %154 = arith.truncf %153 : vector<16x32xf32> to vector<16x32xbf16>
    %c0_71 = arith.constant 0 : index
    %c0_72 = arith.constant 0 : index
    %c0_73 = arith.constant 0 : index
    %155 = vector.load %arg18[%c0_71, %c0_72, %c0_73] : memref<2x32x64xbf16, #tpu.memory_space<vmem>>, vector<1x32x64xbf16>
    %156 = vector.shape_cast %155 : vector<1x32x64xbf16> to vector<32x64xbf16>
    %cst_74 = arith.constant dense<0.000000e+00> : vector<16x64xf32>
    %157 = tpu.matmul %154, %156, %cst_74 {dimension_numbers = #tpu.dot_dimension_numbers<[1], [0], [0], [1], [0, 0, 1, 1], [], []>} : vector<16x32xbf16>, vector<32x64xbf16>, vector<16x64xf32> -> vector<16x64xf32>
    %c0_75 = arith.constant 0 : index
    %c0_76 = arith.constant 0 : index
    %c0_77 = arith.constant 0 : index
    %158 = vector.load %arg19[%c0_75, %c0_76, %c0_77] : memref<2x1x64xf32, #tpu.memory_space<vmem>>, vector<1x1x64xf32>
    %159 = vector.shape_cast %158 : vector<1x1x64xf32> to vector<1x64xf32>
    %160 = vector.broadcast %159 : vector<1x64xf32> to vector<16x64xf32>
    %161 = arith.addf %157, %160 : vector<16x64xf32>
    %cst_78 = arith.constant 5.000000e-01 : f32
    %162 = vector.broadcast %cst_78 : f32 to vector<16x64xf32>
    %163 = arith.mulf %162, %161 : vector<16x64xf32>
    %cst_79 = arith.constant 0.707106769 : f32
    %164 = vector.broadcast %cst_79 : f32 to vector<16x64xf32>
    %165 = arith.mulf %161, %164 : vector<16x64xf32>
    %cst_80 = arith.constant 0.000000e+00 : f32
    %166 = vector.broadcast %cst_80 : f32 to vector<16x64xf32>
    %167 = arith.cmpf oge, %165, %166 : vector<16x64xf32>
    %cst_81 = arith.constant 1.000000e+00 : f32
    %cst_82 = arith.constant -1.000000e+00 : f32
    %168 = vector.broadcast %cst_81 : f32 to vector<16x64xf32>
    %169 = vector.broadcast %cst_82 : f32 to vector<16x64xf32>
    %170 = arith.select %167, %168, %169 : vector<16x64xi1>, vector<16x64xf32>
    %171 = math.absf %165 : vector<16x64xf32>
    %cst_83 = arith.constant 0.327591091 : f32
    %172 = vector.broadcast %cst_83 : f32 to vector<16x64xf32>
    %173 = arith.mulf %172, %171 : vector<16x64xf32>
    %cst_84 = arith.constant 1.000000e+00 : f32
    %174 = vector.broadcast %cst_84 : f32 to vector<16x64xf32>
    %175 = arith.addf %174, %173 : vector<16x64xf32>
    %cst_85 = arith.constant 1.000000e+00 : f32
    %176 = vector.broadcast %cst_85 : f32 to vector<16x64xf32>
    %177 = arith.divf %176, %175 : vector<16x64xf32>
    %cst_86 = arith.constant 1.06140542 : f32
    %178 = vector.broadcast %cst_86 : f32 to vector<16x64xf32>
    %179 = arith.mulf %178, %177 : vector<16x64xf32>
    %cst_87 = arith.constant -1.45315206 : f32
    %180 = vector.broadcast %cst_87 : f32 to vector<16x64xf32>
    %181 = arith.addf %179, %180 : vector<16x64xf32>
    %182 = arith.mulf %181, %177 : vector<16x64xf32>
    %cst_88 = arith.constant 1.42141378 : f32
    %183 = vector.broadcast %cst_88 : f32 to vector<16x64xf32>
    %184 = arith.addf %182, %183 : vector<16x64xf32>
    %185 = arith.mulf %184, %177 : vector<16x64xf32>
    %cst_89 = arith.constant -0.284496725 : f32
    %186 = vector.broadcast %cst_89 : f32 to vector<16x64xf32>
    %187 = arith.addf %185, %186 : vector<16x64xf32>
    %188 = arith.mulf %187, %177 : vector<16x64xf32>
    %cst_90 = arith.constant 0.254829586 : f32
    %189 = vector.broadcast %cst_90 : f32 to vector<16x64xf32>
    %190 = arith.addf %188, %189 : vector<16x64xf32>
    %191 = arith.mulf %190, %177 : vector<16x64xf32>
    %cst_91 = arith.constant 0.000000e+00 : f32
    %192 = vector.broadcast %cst_91 : f32 to vector<16x64xf32>
    %193 = arith.subf %192, %171 : vector<16x64xf32>
    %194 = arith.mulf %193, %171 : vector<16x64xf32>
    %195 = math.exp %194 : vector<16x64xf32>
    %196 = arith.mulf %191, %195 : vector<16x64xf32>
    %cst_92 = arith.constant 1.000000e+00 : f32
    %197 = vector.broadcast %cst_92 : f32 to vector<16x64xf32>
    %198 = arith.subf %197, %196 : vector<16x64xf32>
    %199 = arith.mulf %170, %198 : vector<16x64xf32>
    %cst_93 = arith.constant 1.000000e+00 : f32
    %200 = vector.broadcast %cst_93 : f32 to vector<16x64xf32>
    %201 = arith.addf %200, %199 : vector<16x64xf32>
    %202 = arith.mulf %163, %201 : vector<16x64xf32>
    %203 = arith.truncf %202 : vector<16x64xf32> to vector<16x64xbf16>
    %c0_94 = arith.constant 0 : index
    %c0_95 = arith.constant 0 : index
    %c0_96 = arith.constant 0 : index
    %204 = vector.load %arg20[%c0_94, %c0_95, %c0_96] : memref<2x64x32xbf16, #tpu.memory_space<vmem>>, vector<1x64x32xbf16>
    %205 = vector.shape_cast %204 : vector<1x64x32xbf16> to vector<64x32xbf16>
    %cst_97 = arith.constant dense<0.000000e+00> : vector<16x32xf32>
    %206 = tpu.matmul %203, %205, %cst_97 {dimension_numbers = #tpu.dot_dimension_numbers<[1], [0], [0], [1], [0, 0, 1, 1], [], []>} : vector<16x64xbf16>, vector<64x32xbf16>, vector<16x32xf32> -> vector<16x32xf32>
    %c0_98 = arith.constant 0 : index
    %c0_99 = arith.constant 0 : index
    %c0_100 = arith.constant 0 : index
    %207 = vector.load %arg21[%c0_98, %c0_99, %c0_100] : memref<2x1x32xf32, #tpu.memory_space<vmem>>, vector<1x1x32xf32>
    %208 = vector.shape_cast %207 : vector<1x1x32xf32> to vector<1x32xf32>
    %209 = vector.broadcast %208 : vector<1x32xf32> to vector<16x32xf32>
    %210 = arith.addf %206, %209 : vector<16x32xf32>
    %211 = arith.addf %210, %153 : vector<16x32xf32>
    %c0_101 = arith.constant 0 : index
    %c0_102 = arith.constant 0 : index
    %c0_103 = arith.constant 0 : index
    %212 = vector.load %arg22[%c0_101, %c0_102, %c0_103] : memref<2x1x32xf32, #tpu.memory_space<vmem>>, vector<1x1x32xf32>
    %213 = vector.shape_cast %212 : vector<1x1x32xf32> to vector<1x32xf32>
    %c0_104 = arith.constant 0 : index
    %c0_105 = arith.constant 0 : index
    %c0_106 = arith.constant 0 : index
    %214 = vector.load %arg23[%c0_104, %c0_105, %c0_106] : memref<2x1x32xf32, #tpu.memory_space<vmem>>, vector<1x1x32xf32>
    %215 = vector.shape_cast %214 : vector<1x1x32xf32> to vector<1x32xf32>
    %cst_107 = arith.constant dense<0.000000e+00> : vector<16xf32>
    %216 = vector.multi_reduction <add>, %211, %cst_107 [1] : vector<16x32xf32> to vector<16xf32>
    %217 = vector.shape_cast %216 : vector<16xf32> to vector<16x1xf32>
    %cst_108 = arith.constant 3.200000e+01 : f32
    %218 = vector.broadcast %cst_108 : f32 to vector<16x1xf32>
    %219 = arith.divf %217, %218 : vector<16x1xf32>
    %220 = vector.broadcast %219 : vector<16x1xf32> to vector<16x32xf32>
    %221 = arith.subf %211, %220 : vector<16x32xf32>
    %222 = arith.mulf %221, %221 : vector<16x32xf32>
    %cst_109 = arith.constant dense<0.000000e+00> : vector<16xf32>
    %223 = vector.multi_reduction <add>, %222, %cst_109 [1] : vector<16x32xf32> to vector<16xf32>
    %224 = vector.shape_cast %223 : vector<16xf32> to vector<16x1xf32>
    %cst_110 = arith.constant 0.0322580636 : f32
    %225 = vector.broadcast %cst_110 : f32 to vector<16x1xf32>
    %226 = arith.mulf %224, %225 : vector<16x1xf32>
    %227 = math.sqrt %226 : vector<16x1xf32>
    %cst_111 = arith.constant 9.99999997E-7 : f32
    %228 = vector.broadcast %cst_111 : f32 to vector<16x1xf32>
    %229 = arith.addf %227, %228 : vector<16x1xf32>
    %230 = tpu.reciprocal %229 : vector<16x1xf32> -> vector<16x1xf32>
    %231 = vector.broadcast %230 : vector<16x1xf32> to vector<16x32xf32>
    %232 = arith.mulf %221, %231 : vector<16x32xf32>
    %233 = vector.broadcast %213 : vector<1x32xf32> to vector<16x32xf32>
    %234 = arith.mulf %233, %232 : vector<16x32xf32>
    %235 = vector.broadcast %215 : vector<1x32xf32> to vector<16x32xf32>
    %236 = arith.addf %234, %235 : vector<16x32xf32>
    %237 = arith.truncf %236 : vector<16x32xf32> to vector<16x32xbf16>
    %c1 = arith.constant 1 : index
    %c0_112 = arith.constant 0 : index
    %c0_113 = arith.constant 0 : index
    %238 = vector.load %arg4[%c1, %c0_112, %c0_113] : memref<2x32x96xbf16, #tpu.memory_space<vmem>>, vector<1x32x96xbf16>
    %239 = vector.shape_cast %238 : vector<1x32x96xbf16> to vector<32x96xbf16>
    %cst_114 = arith.constant dense<0.000000e+00> : vector<16x96xf32>
    %240 = tpu.matmul %237, %239, %cst_114 {dimension_numbers = #tpu.dot_dimension_numbers<[1], [0], [0], [1], [0, 0, 1, 1], [], []>} : vector<16x32xbf16>, vector<32x96xbf16>, vector<16x96xf32> -> vector<16x96xf32>
    %c1_115 = arith.constant 1 : index
    %c0_116 = arith.constant 0 : index
    %c0_117 = arith.constant 0 : index
    %241 = vector.load %arg5[%c1_115, %c0_116, %c0_117] : memref<2x1x96xf32, #tpu.memory_space<vmem>>, vector<1x1x96xf32>
    %242 = vector.shape_cast %241 : vector<1x1x96xf32> to vector<1x96xf32>
    %243 = vector.broadcast %242 : vector<1x96xf32> to vector<16x96xf32>
    %244 = arith.addf %240, %243 : vector<16x96xf32>
    %245 = vector.extract_strided_slice %244 {offsets = [0, 0], sizes = [16, 16], strides = [1, 1]} : vector<16x96xf32> to vector<16x16xf32>
    %246 = vector.extract_strided_slice %244 {offsets = [0, 16], sizes = [16, 16], strides = [1, 1]} : vector<16x96xf32> to vector<16x16xf32>
    %247 = tpu.concatenate %245, %246 in 0 : vector<16x16xf32>, vector<16x16xf32> -> vector<32x16xf32>
    %248 = vector.extract_strided_slice %244 {offsets = [0, 32], sizes = [16, 16], strides = [1, 1]} : vector<16x96xf32> to vector<16x16xf32>
    %249 = vector.extract_strided_slice %244 {offsets = [0, 48], sizes = [16, 16], strides = [1, 1]} : vector<16x96xf32> to vector<16x16xf32>
    %250 = tpu.concatenate %248, %249 in 0 : vector<16x16xf32>, vector<16x16xf32> -> vector<32x16xf32>
    %251 = vector.extract_strided_slice %244 {offsets = [0, 64], sizes = [16, 16], strides = [1, 1]} : vector<16x96xf32> to vector<16x16xf32>
    %252 = vector.extract_strided_slice %244 {offsets = [0, 80], sizes = [16, 16], strides = [1, 1]} : vector<16x96xf32> to vector<16x16xf32>
    %253 = tpu.concatenate %251, %252 in 0 : vector<16x16xf32>, vector<16x16xf32> -> vector<32x16xf32>
    %254 = arith.truncf %247 : vector<32x16xf32> to vector<32x16xbf16>
    %255 = arith.truncf %250 : vector<32x16xf32> to vector<32x16xbf16>
    %cst_118 = arith.constant dense<0.000000e+00> : vector<32x32xf32>
    %256 = tpu.matmul %254, %255, %cst_118 {dimension_numbers = #tpu.dot_dimension_numbers<[1], [1], [0], [0], [0, 0, 1, 0], [], []>} : vector<32x16xbf16>, vector<32x16xbf16>, vector<32x32xf32> -> vector<32x32xf32>
    %257 = arith.addf %256, %2 : vector<32x32xf32>
    %cst_119 = arith.constant dense<0xFF800000> : vector<32xf32>
    %258 = vector.multi_reduction <maximumf>, %257, %cst_119 [1] : vector<32x32xf32> to vector<32xf32>
    %259 = vector.shape_cast %258 : vector<32xf32> to vector<32x1xf32>
    %260 = vector.broadcast %259 : vector<32x1xf32> to vector<32x32xf32>
    %261 = arith.subf %257, %260 : vector<32x32xf32>
    %262 = math.exp %261 : vector<32x32xf32>
    %cst_120 = arith.constant dense<0.000000e+00> : vector<32xf32>
    %263 = vector.multi_reduction <add>, %262, %cst_120 [1] : vector<32x32xf32> to vector<32xf32>
    %264 = vector.shape_cast %263 : vector<32xf32> to vector<32x1xf32>
    %265 = tpu.reciprocal %264 : vector<32x1xf32> -> vector<32x1xf32>
    %266 = vector.broadcast %265 : vector<32x1xf32> to vector<32x32xf32>
    %267 = arith.mulf %262, %266 : vector<32x32xf32>
    %268 = arith.truncf %267 : vector<32x32xf32> to vector<32x32xbf16>
    %269 = arith.truncf %253 : vector<32x16xf32> to vector<32x16xbf16>
    %cst_121 = arith.constant dense<0.000000e+00> : vector<32x16xf32>
    %270 = tpu.matmul %268, %269, %cst_121 {dimension_numbers = #tpu.dot_dimension_numbers<[1], [0], [0], [1], [0, 0, 1, 1], [], []>} : vector<32x32xbf16>, vector<32x16xbf16>, vector<32x16xf32> -> vector<32x16xf32>
    %271 = vector.extract_strided_slice %270 {offsets = [0, 0], sizes = [16, 16], strides = [1, 1]} : vector<32x16xf32> to vector<16x16xf32>
    %272 = vector.extract_strided_slice %270 {offsets = [16, 0], sizes = [16, 16], strides = [1, 1]} : vector<32x16xf32> to vector<16x16xf32>
    %273 = tpu.concatenate %271, %272 in 1 : vector<16x16xf32>, vector<16x16xf32> -> vector<16x32xf32>
    %274 = arith.truncf %273 : vector<16x32xf32> to vector<16x32xbf16>
    %c1_122 = arith.constant 1 : index
    %c0_123 = arith.constant 0 : index
    %c0_124 = arith.constant 0 : index
    %275 = vector.load %arg6[%c1_122, %c0_123, %c0_124] : memref<2x32x32xbf16, #tpu.memory_space<vmem>>, vector<1x32x32xbf16>
    %276 = vector.shape_cast %275 : vector<1x32x32xbf16> to vector<32x32xbf16>
    %cst_125 = arith.constant dense<0.000000e+00> : vector<16x32xf32>
    %277 = tpu.matmul %274, %276, %cst_125 {dimension_numbers = #tpu.dot_dimension_numbers<[1], [0], [0], [1], [0, 0, 1, 1], [], []>} : vector<16x32xbf16>, vector<32x32xbf16>, vector<16x32xf32> -> vector<16x32xf32>
    %c1_126 = arith.constant 1 : index
    %c0_127 = arith.constant 0 : index
    %c0_128 = arith.constant 0 : index
    %278 = vector.load %arg7[%c1_126, %c0_127, %c0_128] : memref<2x1x32xf32, #tpu.memory_space<vmem>>, vector<1x1x32xf32>
    %279 = vector.shape_cast %278 : vector<1x1x32xf32> to vector<1x32xf32>
    %280 = vector.broadcast %279 : vector<1x32xf32> to vector<16x32xf32>
    %281 = arith.addf %277, %280 : vector<16x32xf32>
    %282 = arith.addf %281, %236 : vector<16x32xf32>
    %c1_129 = arith.constant 1 : index
    %c0_130 = arith.constant 0 : index
    %c0_131 = arith.constant 0 : index
    %283 = vector.load %arg8[%c1_129, %c0_130, %c0_131] : memref<2x1x32xf32, #tpu.memory_space<vmem>>, vector<1x1x32xf32>
    %284 = vector.shape_cast %283 : vector<1x1x32xf32> to vector<1x32xf32>
    %c1_132 = arith.constant 1 : index
    %c0_133 = arith.constant 0 : index
    %c0_134 = arith.constant 0 : index
    %285 = vector.load %arg9[%c1_132, %c0_133, %c0_134] : memref<2x1x32xf32, #tpu.memory_space<vmem>>, vector<1x1x32xf32>
    %286 = vector.shape_cast %285 : vector<1x1x32xf32> to vector<1x32xf32>
    %cst_135 = arith.constant dense<0.000000e+00> : vector<16xf32>
    %287 = vector.multi_reduction <add>, %282, %cst_135 [1] : vector<16x32xf32> to vector<16xf32>
    %288 = vector.shape_cast %287 : vector<16xf32> to vector<16x1xf32>
    %cst_136 = arith.constant 3.200000e+01 : f32
    %289 = vector.broadcast %cst_136 : f32 to vector<16x1xf32>
    %290 = arith.divf %288, %289 : vector<16x1xf32>
    %291 = vector.broadcast %290 : vector<16x1xf32> to vector<16x32xf32>
    %292 = arith.subf %282, %291 : vector<16x32xf32>
    %293 = arith.mulf %292, %292 : vector<16x32xf32>
    %cst_137 = arith.constant dense<0.000000e+00> : vector<16xf32>
    %294 = vector.multi_reduction <add>, %293, %cst_137 [1] : vector<16x32xf32> to vector<16xf32>
    %295 = vector.shape_cast %294 : vector<16xf32> to vector<16x1xf32>
    %cst_138 = arith.constant 0.0322580636 : f32
    %296 = vector.broadcast %cst_138 : f32 to vector<16x1xf32>
    %297 = arith.mulf %295, %296 : vector<16x1xf32>
    %298 = math.sqrt %297 : vector<16x1xf32>
    %cst_139 = arith.constant 9.99999997E-7 : f32
    %299 = vector.broadcast %cst_139 : f32 to vector<16x1xf32>
    %300 = arith.addf %298, %299 : vector<16x1xf32>
    %301 = tpu.reciprocal %300 : vector<16x1xf32> -> vector<16x1xf32>
    %302 = vector.broadcast %301 : vector<16x1xf32> to vector<16x32xf32>
    %303 = arith.mulf %292, %302 : vector<16x32xf32>
    %304 = vector.broadcast %284 : vector<1x32xf32> to vector<16x32xf32>
    %305 = arith.mulf %304, %303 : vector<16x32xf32>
    %306 = vector.broadcast %286 : vector<1x32xf32> to vector<16x32xf32>
    %307 = arith.addf %305, %306 : vector<16x32xf32>
    %308 = arith.truncf %307 : vector<16x32xf32> to vector<16x32xbf16>
    %c1_140 = arith.constant 1 : index
    %c0_141 = arith.constant 0 : index
    %c0_142 = arith.constant 0 : index
    %309 = vector.load %arg10[%c1_140, %c0_141, %c0_142] : memref<2x32x32xbf16, #tpu.memory_space<vmem>>, vector<1x32x32xbf16>
    %310 = vector.shape_cast %309 : vector<1x32x32xbf16> to vector<32x32xbf16>
    %cst_143 = arith.constant dense<0.000000e+00> : vector<16x32xf32>
    %311 = tpu.matmul %308, %310, %cst_143 {dimension_numbers = #tpu.dot_dimension_numbers<[1], [0], [0], [1], [0, 0, 1, 1], [], []>} : vector<16x32xbf16>, vector<32x32xbf16>, vector<16x32xf32> -> vector<16x32xf32>
    %c1_144 = arith.constant 1 : index
    %c0_145 = arith.constant 0 : index
    %c0_146 = arith.constant 0 : index
    %312 = vector.load %arg11[%c1_144, %c0_145, %c0_146] : memref<2x1x32xf32, #tpu.memory_space<vmem>>, vector<1x1x32xf32>
    %313 = vector.shape_cast %312 : vector<1x1x32xf32> to vector<1x32xf32>
    %314 = vector.broadcast %313 : vector<1x32xf32> to vector<16x32xf32>
    %315 = arith.addf %311, %314 : vector<16x32xf32>
    %c1_147 = arith.constant 1 : index
    %c0_148 = arith.constant 0 : index
    %c0_149 = arith.constant 0 : index
    %316 = vector.load %arg12[%c1_147, %c0_148, %c0_149] : memref<2x32x64xbf16, #tpu.memory_space<vmem>>, vector<1x32x64xbf16>
    %317 = vector.shape_cast %316 : vector<1x32x64xbf16> to vector<32x64xbf16>
    %cst_150 = arith.constant dense<0.000000e+00> : vector<16x64xf32>
    %318 = tpu.matmul %4, %317, %cst_150 {dimension_numbers = #tpu.dot_dimension_numbers<[1], [0], [0], [1], [0, 0, 1, 1], [], []>} : vector<16x32xbf16>, vector<32x64xbf16>, vector<16x64xf32> -> vector<16x64xf32>
    %c1_151 = arith.constant 1 : index
    %c0_152 = arith.constant 0 : index
    %c0_153 = arith.constant 0 : index
    %319 = vector.load %arg13[%c1_151, %c0_152, %c0_153] : memref<2x1x64xf32, #tpu.memory_space<vmem>>, vector<1x1x64xf32>
    %320 = vector.shape_cast %319 : vector<1x1x64xf32> to vector<1x64xf32>
    %321 = vector.broadcast %320 : vector<1x64xf32> to vector<16x64xf32>
    %322 = arith.addf %318, %321 : vector<16x64xf32>
    %323 = vector.extract_strided_slice %315 {offsets = [0, 0], sizes = [16, 16], strides = [1, 1]} : vector<16x32xf32> to vector<16x16xf32>
    %324 = vector.extract_strided_slice %315 {offsets = [0, 16], sizes = [16, 16], strides = [1, 1]} : vector<16x32xf32> to vector<16x16xf32>
    %325 = tpu.concatenate %323, %324 in 0 : vector<16x16xf32>, vector<16x16xf32> -> vector<32x16xf32>
    %326 = vector.extract_strided_slice %322 {offsets = [0, 0], sizes = [16, 16], strides = [1, 1]} : vector<16x64xf32> to vector<16x16xf32>
    %327 = vector.extract_strided_slice %322 {offsets = [0, 16], sizes = [16, 16], strides = [1, 1]} : vector<16x64xf32> to vector<16x16xf32>
    %328 = tpu.concatenate %326, %327 in 0 : vector<16x16xf32>, vector<16x16xf32> -> vector<32x16xf32>
    %329 = vector.extract_strided_slice %322 {offsets = [0, 32], sizes = [16, 16], strides = [1, 1]} : vector<16x64xf32> to vector<16x16xf32>
    %330 = vector.extract_strided_slice %322 {offsets = [0, 48], sizes = [16, 16], strides = [1, 1]} : vector<16x64xf32> to vector<16x16xf32>
    %331 = tpu.concatenate %329, %330 in 0 : vector<16x16xf32>, vector<16x16xf32> -> vector<32x16xf32>
    %332 = arith.truncf %325 : vector<32x16xf32> to vector<32x16xbf16>
    %333 = arith.truncf %328 : vector<32x16xf32> to vector<32x16xbf16>
    %cst_154 = arith.constant dense<0.000000e+00> : vector<32x32xf32>
    %334 = tpu.matmul %332, %333, %cst_154 {dimension_numbers = #tpu.dot_dimension_numbers<[1], [1], [0], [0], [0, 0, 1, 0], [], []>} : vector<32x16xbf16>, vector<32x16xbf16>, vector<32x32xf32> -> vector<32x32xf32>
    %335 = arith.addf %334, %3 : vector<32x32xf32>
    %cst_155 = arith.constant dense<0xFF800000> : vector<32xf32>
    %336 = vector.multi_reduction <maximumf>, %335, %cst_155 [1] : vector<32x32xf32> to vector<32xf32>
    %337 = vector.shape_cast %336 : vector<32xf32> to vector<32x1xf32>
    %338 = vector.broadcast %337 : vector<32x1xf32> to vector<32x32xf32>
    %339 = arith.subf %335, %338 : vector<32x32xf32>
    %340 = math.exp %339 : vector<32x32xf32>
    %cst_156 = arith.constant dense<0.000000e+00> : vector<32xf32>
    %341 = vector.multi_reduction <add>, %340, %cst_156 [1] : vector<32x32xf32> to vector<32xf32>
    %342 = vector.shape_cast %341 : vector<32xf32> to vector<32x1xf32>
    %343 = tpu.reciprocal %342 : vector<32x1xf32> -> vector<32x1xf32>
    %344 = vector.broadcast %343 : vector<32x1xf32> to vector<32x32xf32>
    %345 = arith.mulf %340, %344 : vector<32x32xf32>
    %346 = arith.truncf %345 : vector<32x32xf32> to vector<32x32xbf16>
    %347 = arith.truncf %331 : vector<32x16xf32> to vector<32x16xbf16>
    %cst_157 = arith.constant dense<0.000000e+00> : vector<32x16xf32>
    %348 = tpu.matmul %346, %347, %cst_157 {dimension_numbers = #tpu.dot_dimension_numbers<[1], [0], [0], [1], [0, 0, 1, 1], [], []>} : vector<32x32xbf16>, vector<32x16xbf16>, vector<32x16xf32> -> vector<32x16xf32>
    %349 = vector.extract_strided_slice %348 {offsets = [0, 0], sizes = [16, 16], strides = [1, 1]} : vector<32x16xf32> to vector<16x16xf32>
    %350 = vector.extract_strided_slice %348 {offsets = [16, 0], sizes = [16, 16], strides = [1, 1]} : vector<32x16xf32> to vector<16x16xf32>
    %351 = tpu.concatenate %349, %350 in 1 : vector<16x16xf32>, vector<16x16xf32> -> vector<16x32xf32>
    %352 = arith.truncf %351 : vector<16x32xf32> to vector<16x32xbf16>
    %c1_158 = arith.constant 1 : index
    %c0_159 = arith.constant 0 : index
    %c0_160 = arith.constant 0 : index
    %353 = vector.load %arg14[%c1_158, %c0_159, %c0_160] : memref<2x32x32xbf16, #tpu.memory_space<vmem>>, vector<1x32x32xbf16>
    %354 = vector.shape_cast %353 : vector<1x32x32xbf16> to vector<32x32xbf16>
    %cst_161 = arith.constant dense<0.000000e+00> : vector<16x32xf32>
    %355 = tpu.matmul %352, %354, %cst_161 {dimension_numbers = #tpu.dot_dimension_numbers<[1], [0], [0], [1], [0, 0, 1, 1], [], []>} : vector<16x32xbf16>, vector<32x32xbf16>, vector<16x32xf32> -> vector<16x32xf32>
    %c1_162 = arith.constant 1 : index
    %c0_163 = arith.constant 0 : index
    %c0_164 = arith.constant 0 : index
    %356 = vector.load %arg15[%c1_162, %c0_163, %c0_164] : memref<2x1x32xf32, #tpu.memory_space<vmem>>, vector<1x1x32xf32>
    %357 = vector.shape_cast %356 : vector<1x1x32xf32> to vector<1x32xf32>
    %358 = vector.broadcast %357 : vector<1x32xf32> to vector<16x32xf32>
    %359 = arith.addf %355, %358 : vector<16x32xf32>
    %360 = arith.addf %359, %307 : vector<16x32xf32>
    %c1_165 = arith.constant 1 : index
    %c0_166 = arith.constant 0 : index
    %c0_167 = arith.constant 0 : index
    %361 = vector.load %arg16[%c1_165, %c0_166, %c0_167] : memref<2x1x32xf32, #tpu.memory_space<vmem>>, vector<1x1x32xf32>
    %362 = vector.shape_cast %361 : vector<1x1x32xf32> to vector<1x32xf32>
    %c1_168 = arith.constant 1 : index
    %c0_169 = arith.constant 0 : index
    %c0_170 = arith.constant 0 : index
    %363 = vector.load %arg17[%c1_168, %c0_169, %c0_170] : memref<2x1x32xf32, #tpu.memory_space<vmem>>, vector<1x1x32xf32>
    %364 = vector.shape_cast %363 : vector<1x1x32xf32> to vector<1x32xf32>
    %cst_171 = arith.constant dense<0.000000e+00> : vector<16xf32>
    %365 = vector.multi_reduction <add>, %360, %cst_171 [1] : vector<16x32xf32> to vector<16xf32>
    %366 = vector.shape_cast %365 : vector<16xf32> to vector<16x1xf32>
    %cst_172 = arith.constant 3.200000e+01 : f32
    %367 = vector.broadcast %cst_172 : f32 to vector<16x1xf32>
    %368 = arith.divf %366, %367 : vector<16x1xf32>
    %369 = vector.broadcast %368 : vector<16x1xf32> to vector<16x32xf32>
    %370 = arith.subf %360, %369 : vector<16x32xf32>
    %371 = arith.mulf %370, %370 : vector<16x32xf32>
    %cst_173 = arith.constant dense<0.000000e+00> : vector<16xf32>
    %372 = vector.multi_reduction <add>, %371, %cst_173 [1] : vector<16x32xf32> to vector<16xf32>
    %373 = vector.shape_cast %372 : vector<16xf32> to vector<16x1xf32>
    %cst_174 = arith.constant 0.0322580636 : f32
    %374 = vector.broadcast %cst_174 : f32 to vector<16x1xf32>
    %375 = arith.mulf %373, %374 : vector<16x1xf32>
    %376 = math.sqrt %375 : vector<16x1xf32>
    %cst_175 = arith.constant 9.99999997E-7 : f32
    %377 = vector.broadcast %cst_175 : f32 to vector<16x1xf32>
    %378 = arith.addf %376, %377 : vector<16x1xf32>
    %379 = tpu.reciprocal %378 : vector<16x1xf32> -> vector<16x1xf32>
    %380 = vector.broadcast %379 : vector<16x1xf32> to vector<16x32xf32>
    %381 = arith.mulf %370, %380 : vector<16x32xf32>
    %382 = vector.broadcast %362 : vector<1x32xf32> to vector<16x32xf32>
    %383 = arith.mulf %382, %381 : vector<16x32xf32>
    %384 = vector.broadcast %364 : vector<1x32xf32> to vector<16x32xf32>
    %385 = arith.addf %383, %384 : vector<16x32xf32>
    %386 = arith.truncf %385 : vector<16x32xf32> to vector<16x32xbf16>
    %c1_176 = arith.constant 1 : index
    %c0_177 = arith.constant 0 : index
    %c0_178 = arith.constant 0 : index
    %387 = vector.load %arg18[%c1_176, %c0_177, %c0_178] : memref<2x32x64xbf16, #tpu.memory_space<vmem>>, vector<1x32x64xbf16>
    %388 = vector.shape_cast %387 : vector<1x32x64xbf16> to vector<32x64xbf16>
    %cst_179 = arith.constant dense<0.000000e+00> : vector<16x64xf32>
    %389 = tpu.matmul %386, %388, %cst_179 {dimension_numbers = #tpu.dot_dimension_numbers<[1], [0], [0], [1], [0, 0, 1, 1], [], []>} : vector<16x32xbf16>, vector<32x64xbf16>, vector<16x64xf32> -> vector<16x64xf32>
    %c1_180 = arith.constant 1 : index
    %c0_181 = arith.constant 0 : index
    %c0_182 = arith.constant 0 : index
    %390 = vector.load %arg19[%c1_180, %c0_181, %c0_182] : memref<2x1x64xf32, #tpu.memory_space<vmem>>, vector<1x1x64xf32>
    %391 = vector.shape_cast %390 : vector<1x1x64xf32> to vector<1x64xf32>
    %392 = vector.broadcast %391 : vector<1x64xf32> to vector<16x64xf32>
    %393 = arith.addf %389, %392 : vector<16x64xf32>
    %cst_183 = arith.constant 5.000000e-01 : f32
    %394 = vector.broadcast %cst_183 : f32 to vector<16x64xf32>
    %395 = arith.mulf %394, %393 : vector<16x64xf32>
    %cst_184 = arith.constant 0.707106769 : f32
    %396 = vector.broadcast %cst_184 : f32 to vector<16x64xf32>
    %397 = arith.mulf %393, %396 : vector<16x64xf32>
    %cst_185 = arith.constant 0.000000e+00 : f32
    %398 = vector.broadcast %cst_185 : f32 to vector<16x64xf32>
    %399 = arith.cmpf oge, %397, %398 : vector<16x64xf32>
    %cst_186 = arith.constant 1.000000e+00 : f32
    %cst_187 = arith.constant -1.000000e+00 : f32
    %400 = vector.broadcast %cst_186 : f32 to vector<16x64xf32>
    %401 = vector.broadcast %cst_187 : f32 to vector<16x64xf32>
    %402 = arith.select %399, %400, %401 : vector<16x64xi1>, vector<16x64xf32>
    %403 = math.absf %397 : vector<16x64xf32>
    %cst_188 = arith.constant 0.327591091 : f32
    %404 = vector.broadcast %cst_188 : f32 to vector<16x64xf32>
    %405 = arith.mulf %404, %403 : vector<16x64xf32>
    %cst_189 = arith.constant 1.000000e+00 : f32
    %406 = vector.broadcast %cst_189 : f32 to vector<16x64xf32>
    %407 = arith.addf %406, %405 : vector<16x64xf32>
    %cst_190 = arith.constant 1.000000e+00 : f32
    %408 = vector.broadcast %cst_190 : f32 to vector<16x64xf32>
    %409 = arith.divf %408, %407 : vector<16x64xf32>
    %cst_191 = arith.constant 1.06140542 : f32
    %410 = vector.broadcast %cst_191 : f32 to vector<16x64xf32>
    %411 = arith.mulf %410, %409 : vector<16x64xf32>
    %cst_192 = arith.constant -1.45315206 : f32
    %412 = vector.broadcast %cst_192 : f32 to vector<16x64xf32>
    %413 = arith.addf %411, %412 : vector<16x64xf32>
    %414 = arith.mulf %413, %409 : vector<16x64xf32>
    %cst_193 = arith.constant 1.42141378 : f32
    %415 = vector.broadcast %cst_193 : f32 to vector<16x64xf32>
    %416 = arith.addf %414, %415 : vector<16x64xf32>
    %417 = arith.mulf %416, %409 : vector<16x64xf32>
    %cst_194 = arith.constant -0.284496725 : f32
    %418 = vector.broadcast %cst_194 : f32 to vector<16x64xf32>
    %419 = arith.addf %417, %418 : vector<16x64xf32>
    %420 = arith.mulf %419, %409 : vector<16x64xf32>
    %cst_195 = arith.constant 0.254829586 : f32
    %421 = vector.broadcast %cst_195 : f32 to vector<16x64xf32>
    %422 = arith.addf %420, %421 : vector<16x64xf32>
    %423 = arith.mulf %422, %409 : vector<16x64xf32>
    %cst_196 = arith.constant 0.000000e+00 : f32
    %424 = vector.broadcast %cst_196 : f32 to vector<16x64xf32>
    %425 = arith.subf %424, %403 : vector<16x64xf32>
    %426 = arith.mulf %425, %403 : vector<16x64xf32>
    %427 = math.exp %426 : vector<16x64xf32>
    %428 = arith.mulf %423, %427 : vector<16x64xf32>
    %cst_197 = arith.constant 1.000000e+00 : f32
    %429 = vector.broadcast %cst_197 : f32 to vector<16x64xf32>
    %430 = arith.subf %429, %428 : vector<16x64xf32>
    %431 = arith.mulf %402, %430 : vector<16x64xf32>
    %cst_198 = arith.constant 1.000000e+00 : f32
    %432 = vector.broadcast %cst_198 : f32 to vector<16x64xf32>
    %433 = arith.addf %432, %431 : vector<16x64xf32>
    %434 = arith.mulf %395, %433 : vector<16x64xf32>
    %435 = arith.truncf %434 : vector<16x64xf32> to vector<16x64xbf16>
    %c1_199 = arith.constant 1 : index
    %c0_200 = arith.constant 0 : index
    %c0_201 = arith.constant 0 : index
    %436 = vector.load %arg20[%c1_199, %c0_200, %c0_201] : memref<2x64x32xbf16, #tpu.memory_space<vmem>>, vector<1x64x32xbf16>
    %437 = vector.shape_cast %436 : vector<1x64x32xbf16> to vector<64x32xbf16>
    %cst_202 = arith.constant dense<0.000000e+00> : vector<16x32xf32>
    %438 = tpu.matmul %435, %437, %cst_202 {dimension_numbers = #tpu.dot_dimension_numbers<[1], [0], [0], [1], [0, 0, 1, 1], [], []>} : vector<16x64xbf16>, vector<64x32xbf16>, vector<16x32xf32> -> vector<16x32xf32>
    %c1_203 = arith.constant 1 : index
    %c0_204 = arith.constant 0 : index
    %c0_205 = arith.constant 0 : index
    %439 = vector.load %arg21[%c1_203, %c0_204, %c0_205] : memref<2x1x32xf32, #tpu.memory_space<vmem>>, vector<1x1x32xf32>
    %440 = vector.shape_cast %439 : vector<1x1x32xf32> to vector<1x32xf32>
    %441 = vector.broadcast %440 : vector<1x32xf32> to vector<16x32xf32>
    %442 = arith.addf %438, %441 : vector<16x32xf32>
    %443 = arith.addf %442, %385 : vector<16x32xf32>
    %c1_206 = arith.constant 1 : index
    %c0_207 = arith.constant 0 : index
    %c0_208 = arith.constant 0 : index
    %444 = vector.load %arg22[%c1_206, %c0_207, %c0_208] : memref<2x1x32xf32, #tpu.memory_space<vmem>>, vector<1x1x32xf32>
    %445 = vector.shape_cast %444 : vector<1x1x32xf32> to vector<1x32xf32>
    %c1_209 = arith.constant 1 : index
    %c0_210 = arith.constant 0 : index
    %c0_211 = arith.constant 0 : index
    %446 = vector.load %arg23[%c1_209, %c0_210, %c0_211] : memref<2x1x32xf32, #tpu.memory_space<vmem>>, vector<1x1x32xf32>
    %447 = vector.shape_cast %446 : vector<1x1x32xf32> to vector<1x32xf32>
    %cst_212 = arith.constant dense<0.000000e+00> : vector<16xf32>
    %448 = vector.multi_reduction <add>, %443, %cst_212 [1] : vector<16x32xf32> to vector<16xf32>
    %449 = vector.shape_cast %448 : vector<16xf32> to vector<16x1xf32>
    %cst_213 = arith.constant 3.200000e+01 : f32
    %450 = vector.broadcast %cst_213 : f32 to vector<16x1xf32>
    %451 = arith.divf %449, %450 : vector<16x1xf32>
    %452 = vector.broadcast %451 : vector<16x1xf32> to vector<16x32xf32>
    %453 = arith.subf %443, %452 : vector<16x32xf32>
    %454 = arith.mulf %453, %453 : vector<16x32xf32>
    %cst_214 = arith.constant dense<0.000000e+00> : vector<16xf32>
    %455 = vector.multi_reduction <add>, %454, %cst_214 [1] : vector<16x32xf32> to vector<16xf32>
    %456 = vector.shape_cast %455 : vector<16xf32> to vector<16x1xf32>
    %cst_215 = arith.constant 0.0322580636 : f32
    %457 = vector.broadcast %cst_215 : f32 to vector<16x1xf32>
    %458 = arith.mulf %456, %457 : vector<16x1xf32>
    %459 = math.sqrt %458 : vector<16x1xf32>
    %cst_216 = arith.constant 9.99999997E-7 : f32
    %460 = vector.broadcast %cst_216 : f32 to vector<16x1xf32>
    %461 = arith.addf %459, %460 : vector<16x1xf32>
    %462 = tpu.reciprocal %461 : vector<16x1xf32> -> vector<16x1xf32>
    %463 = vector.broadcast %462 : vector<16x1xf32> to vector<16x32xf32>
    %464 = arith.mulf %453, %463 : vector<16x32xf32>
    %465 = vector.broadcast %445 : vector<1x32xf32> to vector<16x32xf32>
    %466 = arith.mulf %465, %464 : vector<16x32xf32>
    %467 = vector.broadcast %447 : vector<1x32xf32> to vector<16x32xf32>
    %468 = arith.addf %466, %467 : vector<16x32xf32>
    %c0_217 = arith.constant 0 : index
    %c0_218 = arith.constant 0 : index
    %469 = vector.load %arg24[%c0_217, %c0_218] : memref<16x32xf32, #tpu.memory_space<vmem>>, vector<16x32xf32>
    tpu.vector_store %arg24[%c0_217, %c0_218], %468 {strides = array<i32>} : memref<16x32xf32, #tpu.memory_space<vmem>>, vector<16x32xf32>,
    return
  }
}

</mosaic_0001>

<bundles_post_ra>
// kernel: tpu_custom_call.1
= control target key start
LH: loop header
LB: loop body
LE: loop exit
PB: predicated region body
PF: predicated region fallthrough
CT: control target
= control target key end

     0   :  { %6 = vsyncpa [#allocation3], 0  ;;  %s105_s0 = inlined_call_operand.hbm [shape: f32[8,128], index: 0, kind: input, shape index: {}]   ;;  %s106_s1 = inlined_call_operand.hbm [shape: f32[8,128], index: 1, kind: output, shape index: {}]  }
   0x1   :  { %7 = vsyncpa [#allocation4], 0  ;;  %s87_s6 = smov [#allocation2]  }
   0x2   :  { %s14_s7 = sshll.u32 %s87_s6, 4  ;;  %s15_s7 = int_to_ptr.vmem [resolvable:$true] %s14_s7 }
   0x3   :  { %s51_s8 = scalar_lea.vmem %s15_s7, 128  ;;  %p56_p1 = scmp.lt.s32.totalorder %s15_s7, %s15_s7 }
   0x4   :  { %p52_p0 = scmp.ne.s32.totalorder %s15_s7, %s51_s8  ;;  %p57_p2 = scmp.lt.s32.totalorder %s51_s8, %s51_s8 }
   0x6   :  { %p58_p3 = por %p57_p2, %p56_p1 }
   0x8   :  { %p59_p4 = pnand %p58_p3, %p52_p0 }
   0xa   :  { %62 = shalt.err (!%p59_p4)
}
   0xb   :  { %17 = dma.hbm_to_vmem [thread:$0]  %s105_s0, 128, %s15_s7, [#allocation3]  }
   0xc   :  { %83 = dma.done.wait [#allocation3], 128  }
   0xd   :  { %84 = vsyncadd [#allocation3], 4294967168  ;;  %v21_v0 = vld [vmem:[#allocation2] sm:$0xff]  ;;  %s88_s11 = smov [#allocation5]  }
   0xe   :  { %41 = verf.f32 %v21_v0  ;;  %s30_s12 = sshll.u32 %s88_s11, 4  ;;  %s31_s12 = int_to_ptr.vmem [resolvable:$true] %s30_s12 }
   0xf   :  { %s63_s13 = scalar_lea.vmem %s31_s12, 128  ;;  %p68_p6 = scmp.lt.s32.totalorder %s31_s12, %s31_s12 }
  0x10   :  { %p64_p5 = scmp.ne.s32.totalorder %s31_s12, %s63_s13  ;;  %p69_p7 = scmp.lt.s32.totalorder %s63_s13, %s63_s13 }
  0x12   :  { %p70_p8 = por %p69_p7, %p68_p6 }
  0x14   :  { %p71_p9 = pnand %p70_p8, %p64_p5 }
  0x1b   :  { %v42_v1 = vpop.eup %41 }
  0x1c   :  { %23 = vst [vmem:[#allocation5] sm:$0xff] %v42_v1 }
  0x1d   :  { %74 = shalt.err (!%p71_p9)
}
  0x1e   :  { %33 = dma.vmem_to_hbm [thread:$0]  %s31_s12, 128, %s106_s1, [#allocation4]  }
  0x1f   :  { %85 = dma.done.wait [#allocation4], 128  }
  0x20   :  { %86 = vsyncadd [#allocation4], 4294967168 }
  0x21   :  { %37 = vsyncpa [#allocation3], 1 }
  0x22   :  { %38 = vsyncpa [#allocation4], 1 }

// kernel: transformer_decoder.1
= control target key start
LH: loop header
LB: loop body
LE: loop exit
PB: predicated region body
PF: predicated region fallthrough
CT: control target
= control target key end

     0   :  { %s4176_s0 = inlined_call_operand.vmem [shape: f32[16,32], index: 0, kind: input, shape index: {}]   ;;  %s4177_s1 = inlined_call_operand.vmem [shape: f32[16,32], index: 1, kind: input, shape index: {}]   ;;  %s4178_s2 = inlined_call_operand.vmem [shape: f32[32,32], index: 2, kind: input, shape index: {}]   ;;  %s4179_s3 = inlined_call_operand.vmem [shape: f32[32,32], index: 3, kind: input, shape index: {}]   ;;  %s4180_s4 = inlined_call_operand.vmem [shape: bf16[2,32,96], index: 4, kind: input, shape index: {}]   ;;  %s4181_s5 = inlined_call_operand.hbm [shape: f32[2,1,96], index: 5, kind: input, shape index: {}]   ;;  %s4182_s6 = inlined_call_operand.vmem [shape: bf16[2,32,32], index: 6, kind: input, shape index: {}]   ;;  %s4183_s7 = inlined_call_operand.hbm [shape: f32[2,1,32], index: 7, kind: input, shape index: {}]   ;;  %s4184_s8 = inlined_call_operand.hbm [shape: f32[2,1,32], index: 8, kind: input, shape index: {}]   ;;  %s4185_s9 = inlined_call_operand.hbm [shape: f32[2,1,32], index: 9, kind: input, shape index: {}]   ;;  %s4186_s10 = inlined_call_operand.vmem [shape: bf16[2,32,32], index: 10, kind: input, shape index: {}]   ;;  %s4187_s11 = inlined_call_operand.hbm [shape: f32[2,1,32], index: 11, kind: input, shape index: {}]   ;;  %s4188_s12 = inlined_call_operand.vmem [shape: bf16[2,32,64], index: 12, kind: input, shape index: {}]   ;;  %s4189_s13 = inlined_call_operand.hbm [shape: f32[2,1,64], index: 13, kind: input, shape index: {}]   ;;  %s4190_s14 = inlined_call_operand.vmem [shape: bf16[2,32,32], index: 14, kind: input, shape index: {}]   ;;  %s4191_s15 = inlined_call_operand.hbm [shape: f32[2,1,32], index: 15, kind: input, shape index: {}]   ;;  %s4192_s16 = inlined_call_operand.hbm [shape: f32[2,1,32], index: 16, kind: input, shape index: {}]   ;;  %s4193_s17 = inlined_call_operand.hbm [shape: f32[2,1,32], index: 17, kind: input, shape index: {}]   ;;  %s4194_s18 = inlined_call_operand.hbm [shape: bf16[2,32,64], index: 18, kind: input, shape index: {}]   ;;  %s4195_s19 = inlined_call_operand.hbm [shape: f32[2,1,64], index: 19, kind: input, shape index: {}]   ;;  %s4196_s20 = inlined_call_operand.vmem [shape: bf16[2,64,32], index: 20, kind: input, shape index: {}]   ;;  %s4197_s21 = inlined_call_operand.hbm [shape: f32[2,1,32], index: 21, kind: input, shape index: {}]   ;;  %s4198_s22 = inlined_call_operand.hbm [shape: f32[2,1,32], index: 22, kind: input, shape index: {}]   ;;  %s4199_s23 = inlined_call_operand.hbm [shape: f32[2,1,32], index: 23, kind: input, shape index: {}]   ;;  %s4200_s24 = inlined_call_operand.hbm [shape: f32[16,32], index: 24, kind: output, shape index: {}]  }
   0x1   :  { %4207 = sst [smem:[#allocation35_spill]] %s4176_s0 }
   0x2   :  { %4208 = sst [smem:[#allocation36_spill]] %s4177_s1 }
   0x3   :  { %4209 = sst [smem:[#allocation37_spill]] %s4178_s2 }
   0x4   :  { %4210 = sst [smem:[#allocation38_spill]] %s4179_s3 }
   0x5   :  { %4211 = sst [smem:[#allocation39_spill]] %s4180_s4 }
   0x6   :  { %4212 = sst [smem:[#allocation40_spill]] %s4181_s5 }
   0x7   :  { %4213 = sst [smem:[#allocation41_spill]] %s4182_s6 }
   0x8   :  { %4214 = sst [smem:[#allocation42_spill]] %s4183_s7 }
   0x9   :  { %4215 = sst [smem:[#allocation43_spill]] %s4184_s8 }
   0xa   :  { %29 = vsyncpa [#allocation3], 0 }
   0xb   :  { %30 = vsyncpa [#allocation6], 0 }
   0xc   :  { %31 = vsyncpa [#allocation9], 0 }
   0xd   :  { %32 = vsyncpa [#allocation12], 0 }
   0xe   :  { %33 = vsyncpa [#allocation15], 0 }
   0xf   :  { %34 = vsyncpa [#allocation18], 0 }
  0x10   :  { %35 = vsyncpa [#allocation21], 0 }
  0x11   :  { %36 = vsyncpa [#allocation24], 0 }
  0x12   :  { %37 = vsyncpa [#allocation4], 0  ;;  %s3515_s5 = smov [#allocation5]   ;;  %s3516_s27 = smov [#allocation8]  }
  0x13   :  { %s67_s26 = sshll.u32 %s3515_s5, 4  ;;  %s91_s28 = sshll.u32 %s3516_s27, 4  ;;  %s68_s26 = int_to_ptr.vmem [resolvable:$true] %s67_s26  ;;  %s92_s28 = int_to_ptr.vmem [resolvable:$true] %s91_s28 }
  0x14   :  { %s3205_s6 = scalar_lea.vmem %s68_s26, 32  ;;  %p3210_p1 = scmp.lt.s32.totalorder %s68_s26, %s68_s26 }
  0x15   :  { %p3206_p0 = scmp.ne.s32.totalorder %s68_s26, %s3205_s6  ;;  %p3211_p2 = scmp.lt.s32.totalorder %s3205_s6, %s3205_s6 }
  0x17   :  { %p3212_p3 = por %p3211_p2, %p3210_p1 }
  0x19   :  { %p3213_p4 = pnand %p3212_p3, %p3206_p0 }
  0x1b   :  { %3216 = shalt.err (!%p3213_p4)
}
  0x1c   :  { %s3517_s2 = smov 16   ;;  %s3518_s29 = smov 1  }
  0x1d   :  { %s4216_s30 = sld [smem:[#allocation42_spill]]  ;;  %s3225_s3 = scalar_lea.vmem %s92_s28, 32 }
  0x1e   :  { %p3226_p5 = scmp.ne.s32.totalorder %s92_s28, %s3225_s3  ;;  %p3230_p6 = scmp.lt.s32.totalorder %s92_s28, %s92_s28 }
  0x1f   :  { %p3231_p7 = scmp.lt.s32.totalorder %s3225_s3, %s3225_s3 }
  0x21   :  { %p3232_p8 = por %p3231_p7, %p3230_p6 }
  0x23   :  { %73 = dma.hbm_to_vmem [thread:$0]  %s4216_s30, 32, %s68_s26, [#allocation6], %s3517_s2, %s3517_s2, %s3518_s29  }
  0x24   :  { %p3233_p9 = pnand %p3232_p8, %p3226_p5 }
  0x26   :  { %3236 = shalt.err (!%p3233_p9)
}
  0x27   :  { %97 = dma.hbm_to_vmem [thread:$0]  %s4185_s9, 32, %s92_s28, [#allocation9], %s3517_s2, %s3517_s2, %s3518_s29  }
  0x28   :  { %s3519_s4 = smov [#allocation11]   ;;  %s3520_s5 = smov [#allocation14]  }
  0x29   :  { %s119_s1 = sshll.u32 %s3519_s4, 4  ;;  %s145_s27 = sshll.u32 %s3520_s5, 4  ;;  %s120_s1 = int_to_ptr.vmem [resolvable:$true] %s119_s1  ;;  %s146_s27 = int_to_ptr.vmem [resolvable:$true] %s145_s27 }
  0x2a   :  { %s3245_s26 = scalar_lea.vmem %s120_s1, 32  ;;  %p3250_p11 = scmp.lt.s32.totalorder %s120_s1, %s120_s1 }
  0x2b   :  { %p3246_p10 = scmp.ne.s32.totalorder %s120_s1, %s3245_s26  ;;  %p3251_p12 = scmp.lt.s32.totalorder %s3245_s26, %s3245_s26 }
  0x2d   :  { %p3252_p13 = por %p3251_p12, %p3250_p11 }
  0x2f   :  { %p3253_p0 = pnand %p3252_p13, %p3246_p10 }
  0x31   :  { %3256 = shalt.err (!%p3253_p0)
}
  0x32   :  { %125 = dma.hbm_to_vmem [thread:$0]  %s4189_s13, 32, %s120_s1, [#allocation12], %s3517_s2, %s3517_s2, %s3518_s29  }
  0x33   :  { %s3265_s9 = scalar_lea.vmem %s146_s27, 32  ;;  %p3270_p2 = scmp.lt.s32.totalorder %s146_s27, %s146_s27 }
  0x34   :  { %p3266_p1 = scmp.ne.s32.totalorder %s146_s27, %s3265_s9  ;;  %p3271_p3 = scmp.lt.s32.totalorder %s3265_s9, %s3265_s9 }
  0x36   :  { %p3272_p4 = por %p3271_p3, %p3270_p2 }
  0x38   :  { %p3273_p5 = pnand %p3272_p4, %p3266_p1 }
  0x3a   :  { %3276 = shalt.err (!%p3273_p5)
}
  0x3b   :  { %151 = dma.hbm_to_vmem [thread:$0]  %s4192_s16, 32, %s146_s27, [#allocation15], %s3517_s2, %s3517_s2, %s3518_s29  }
  0x3c   :  { %s3521_s30 = smov [#allocation17]  }
  0x3d   :  { %s169_s3 = sshll.u32 %s3521_s30, 4  ;;  %s170_s3 = int_to_ptr.vmem [resolvable:$true] %s169_s3 }
  0x3e   :  { %s3285_s25 = scalar_lea.vmem %s170_s3, 512  ;;  %p3290_p7 = scmp.lt.s32.totalorder %s170_s3, %s170_s3 }
  0x3f   :  { %p3286_p6 = scmp.ne.s32.totalorder %s170_s3, %s3285_s25  ;;  %p3291_p8 = scmp.lt.s32.totalorder %s3285_s25, %s3285_s25 }
  0x41   :  { %p3292_p9 = por %p3291_p8, %p3290_p7 }
  0x43   :  { %p3293_p10 = pnand %p3292_p9, %p3286_p6 }
  0x45   :  { %3296 = shalt.err (!%p3293_p10)
}
  0x46   :  { %s3522_s13 = smov 64   ;;  %s3523_s8 = smov 4  }
  0x47   :  { %175 = dma.hbm_to_vmem [thread:$0]  %s4194_s18, 512, %s170_s3, [#allocation18], %s3522_s13, %s3522_s13, %s3523_s8  }
  0x48   :  { %s3524_s5 = smov [#allocation20]   ;;  %s3525_s27 = smov [#allocation2]  }
  0x49   :  { %s195_s16 = sshll.u32 %s3524_s5, 4  ;;  %s53_s26 = sshll.u32 %s3525_s27, 4  ;;  %s196_s16 = int_to_ptr.vmem [resolvable:$true] %s195_s16  ;;  %s54_s26 = int_to_ptr.vmem [resolvable:$true] %s53_s26 }
  0x4a   :  { %s3305_s6 = scalar_lea.vmem %s196_s16, 32  ;;  %p3310_p12 = scmp.lt.s32.totalorder %s196_s16, %s196_s16 }
  0x4b   :  { %p3306_p11 = scmp.ne.s32.totalorder %s196_s16, %s3305_s6  ;;  %p3311_p13 = scmp.lt.s32.totalorder %s3305_s6, %s3305_s6 }
  0x4d   :  { %p3312_p0 = por %p3311_p13, %p3310_p12 }
  0x4f   :  { %p3313_p1 = pnand %p3312_p0, %p3306_p11 }
  0x51   :  { %3316 = shalt.err (!%p3313_p1)
}
  0x52   :  { %201 = dma.hbm_to_vmem [thread:$0]  %s4197_s21, 32, %s196_s16, [#allocation21], %s3517_s2, %s3517_s2, %s3518_s29  }
  0x53   :  { %s3325_s18 = scalar_lea.vmem %s54_s26, 32  ;;  %p3330_p3 = scmp.lt.s32.totalorder %s54_s26, %s54_s26 }
  0x54   :  { %p3326_p2 = scmp.ne.s32.totalorder %s54_s26, %s3325_s18  ;;  %p3331_p4 = scmp.lt.s32.totalorder %s3325_s18, %s3325_s18 }
  0x56   :  { %p3332_p5 = por %p3331_p4, %p3330_p3 }
  0x58   :  { %p3333_p6 = pnand %p3332_p5, %p3326_p2 }
  0x5a   :  { %3336 = shalt.err (!%p3333_p6)
}
  0x5b   :  { %s4217_s30 = sld [smem:[#allocation40_spill]]  ;;  %s3526_s3 = smov [#allocation7]  }
  0x5c   :  { %s79_s25 = sshll.u32 %s3526_s3, 4  ;;  %s3527_s8 = smov [#allocation10]   ;;  %s80_s25 = int_to_ptr.vmem [resolvable:$true] %s79_s25 }
  0x5d   :  { %s105_s21 = sshll.u32 %s3527_s8, 4  ;;  %s3345_s4 = scalar_lea.vmem %s80_s25, 32  ;;  %s106_s21 = int_to_ptr.vmem [resolvable:$true] %s105_s21 }
  0x5e   :  { %p3346_p7 = scmp.ne.s32.totalorder %s80_s25, %s3345_s4  ;;  %p3350_p8 = scmp.lt.s32.totalorder %s80_s25, %s80_s25 }
  0x5f   :  { %p3351_p9 = scmp.lt.s32.totalorder %s3345_s4, %s3345_s4 }
  0x61   :  { %59 = dma.hbm_to_vmem [thread:$0]  %s4217_s30, 32, %s54_s26, [#allocation3], %s3517_s2, %s3517_s2, %s3518_s29  }
  0x62   :  { %p3352_p10 = por %p3351_p9, %p3350_p8 }
  0x64   :  { %p3353_p11 = pnand %p3352_p10, %p3346_p7 }
  0x66   :  { %3356 = shalt.err (!%p3353_p11)
}
  0x67   :  { %s4218_s16 = sld [smem:[#allocation43_spill]]  ;;  %s3365_s27 = scalar_lea.vmem %s106_s21, 32 }
  0x68   :  { %p3366_p12 = scmp.ne.s32.totalorder %s106_s21, %s3365_s27  ;;  %p3370_p13 = scmp.lt.s32.totalorder %s106_s21, %s106_s21 }
  0x69   :  { %p3371_p0 = scmp.lt.s32.totalorder %s3365_s27, %s3365_s27 }
  0x6b   :  { %p3372_p1 = por %p3371_p0, %p3370_p13 }
  0x6d   :  { %85 = dma.hbm_to_vmem [thread:$0]  %s4218_s16, 32, %s80_s25, [#allocation6], %s3517_s2, %s3517_s2, %s3518_s29  }
  0x6e   :  { %p3373_p2 = pnand %p3372_p1, %p3366_p12 }
  0x70   :  { %3376 = shalt.err (!%p3373_p2)
}
  0x71   :  { %111 = dma.hbm_to_vmem [thread:$0]  %s4187_s11, 32, %s106_s21, [#allocation9], %s3517_s2, %s3517_s2, %s3518_s29  }
  0x72   :  { %s3528_s0 = smov [#allocation13]   ;;  %s3529_s18 = smov [#allocation16]  }
  0x73   :  { %s133_s9 = sshll.u32 %s3528_s0, 4  ;;  %s157_s28 = sshll.u32 %s3529_s18, 4  ;;  %s134_s9 = int_to_ptr.vmem [resolvable:$true] %s133_s9  ;;  %s158_s28 = int_to_ptr.vmem [resolvable:$true] %s157_s28 }
  0x74   :  { %s3385_s7 = scalar_lea.vmem %s134_s9, 32  ;;  %p3390_p4 = scmp.lt.s32.totalorder %s134_s9, %s134_s9 }
  0x75   :  { %p3386_p3 = scmp.ne.s32.totalorder %s134_s9, %s3385_s7  ;;  %p3391_p5 = scmp.lt.s32.totalorder %s3385_s7, %s3385_s7 }
  0x77   :  { %p3392_p6 = por %p3391_p5, %p3390_p4 }
  0x79   :  { %p3393_p7 = pnand %p3392_p6, %p3386_p3 }
  0x7b   :  { %3396 = shalt.err (!%p3393_p7)
}
  0x7c   :  { %139 = dma.hbm_to_vmem [thread:$0]  %s4191_s15, 32, %s134_s9, [#allocation12], %s3517_s2, %s3517_s2, %s3518_s29  }
  0x7d   :  { %s3405_s11 = scalar_lea.vmem %s158_s28, 32  ;;  %p3410_p9 = scmp.lt.s32.totalorder %s158_s28, %s158_s28 }
  0x7e   :  { %p3406_p8 = scmp.ne.s32.totalorder %s158_s28, %s3405_s11  ;;  %p3411_p10 = scmp.lt.s32.totalorder %s3405_s11, %s3405_s11 }
  0x80   :  { %p3412_p11 = por %p3411_p10, %p3410_p9 }
  0x82   :  { %p3413_p12 = pnand %p3412_p11, %p3406_p8 }
  0x84   :  { %3416 = shalt.err (!%p3413_p12)
}
  0x85   :  { %163 = dma.hbm_to_vmem [thread:$0]  %s4193_s17, 32, %s158_s28, [#allocation15], %s3517_s2, %s3517_s2, %s3518_s29  }
  0x86   :  { %s3530_s21 = smov [#allocation19]   ;;  %s3531_s1 = smov [#allocation22]  }
  0x87   :  { %s181_s4 = sshll.u32 %s3530_s21, 4  ;;  %s207_s15 = sshll.u32 %s3531_s1, 4  ;;  %s182_s4 = int_to_ptr.vmem [resolvable:$true] %s181_s4  ;;  %s208_s15 = int_to_ptr.vmem [resolvable:$true] %s207_s15 }
  0x88   :  { %s3425_s5 = scalar_lea.vmem %s182_s4, 32  ;;  %p3430_p0 = scmp.lt.s32.totalorder %s182_s4, %s182_s4 }
  0x89   :  { %p3426_p13 = scmp.ne.s32.totalorder %s182_s4, %s3425_s5  ;;  %p3431_p1 = scmp.lt.s32.totalorder %s3425_s5, %s3425_s5 }
  0x8b   :  { %p3432_p2 = por %p3431_p1, %p3430_p0 }
  0x8d   :  { %p3433_p3 = pnand %p3432_p2, %p3426_p13 }
  0x8f   :  { %3436 = shalt.err (!%p3433_p3)
}
  0x90   :  { %187 = dma.hbm_to_vmem [thread:$0]  %s4195_s19, 32, %s182_s4, [#allocation18], %s3517_s2, %s3517_s2, %s3518_s29  }
  0x91   :  { %s3445_s17 = scalar_lea.vmem %s208_s15, 32  ;;  %p3450_p5 = scmp.lt.s32.totalorder %s208_s15, %s208_s15 }
  0x92   :  { %p3446_p4 = scmp.ne.s32.totalorder %s208_s15, %s3445_s17  ;;  %p3451_p6 = scmp.lt.s32.totalorder %s3445_s17, %s3445_s17 }
  0x94   :  { %p3452_p7 = por %p3451_p6, %p3450_p5 }
  0x96   :  { %p3453_p8 = pnand %p3452_p7, %p3446_p4 }
  0x98   :  { %3456 = shalt.err (!%p3453_p8)
}
  0x99   :  { %213 = dma.hbm_to_vmem [thread:$0]  %s4198_s22, 32, %s208_s15, [#allocation21], %s3517_s2, %s3517_s2, %s3518_s29  }
  0x9a   :  { %s3532_s0 = smov [#allocation23]  }
  0x9b   :  { %s219_s9 = sshll.u32 %s3532_s0, 4  ;;  %s220_s9 = int_to_ptr.vmem [resolvable:$true] %s219_s9 }
  0x9c   :  { %s3465_s18 = scalar_lea.vmem %s220_s9, 32  ;;  %p3470_p10 = scmp.lt.s32.totalorder %s220_s9, %s220_s9 }
  0x9d   :  { %p3466_p9 = scmp.ne.s32.totalorder %s220_s9, %s3465_s18  ;;  %p3471_p11 = scmp.lt.s32.totalorder %s3465_s18, %s3465_s18 }
  0x9f   :  { %p3472_p12 = por %p3471_p11, %p3470_p10 }
  0xa1   :  { %p3473_p13 = pnand %p3472_p12, %p3466_p9 }
  0xa3   :  { %3476 = shalt.err (!%p3473_p13)
}
  0xa4   :  { %225 = dma.hbm_to_vmem [thread:$0]  %s4199_s23, 32, %s220_s9, [#allocation24], %s3517_s2, %s3517_s2, %s3518_s29  }
  0xa5   :  { %3497 = dma.done.wait [#allocation3], 32  }
  0xa6   :  { %3498 = vsyncadd [#allocation3], 4294967264 }
  0xa7   :  { %3499 = dma.done.wait [#allocation6], 64  }
  0xa8   :  { %3500 = vsyncadd [#allocation6], 4294967232 }
  0xa9   :  { %3501 = dma.done.wait [#allocation9], 64  }
  0xaa   :  { %3502 = vsyncadd [#allocation9], 4294967232 }
  0xab   :  { %3503 = dma.done.wait [#allocation12], 64  }
  0xac   :  { %3504 = vsyncadd [#allocation12], 4294967232 }
  0xad   :  { %3505 = dma.done.wait [#allocation15], 64  }
  0xae   :  { %3506 = vsyncadd [#allocation15], 4294967232 }
  0xaf   :  { %3507 = dma.done.wait [#allocation18], 544  }
  0xb0   :  { %3508 = vsyncadd [#allocation18], 4294966752 }
  0xb1   :  { %3509 = dma.done.wait [#allocation21], 64  }
  0xb2   :  { %3510 = vsyncadd [#allocation21], 4294967232 }
  0xb3   :  { %3511 = dma.done.wait [#allocation24], 32  }
  0xb4   :  { %3512 = vsyncadd [#allocation24], 4294967264  ;;  %v3533_v0 = vmov 0.0   ;;  %vm3534_vm0 = vmmov 0   ;;  %s4219_s29 = sld [smem:[#allocation39_spill]]  ;;  %vm306_vm1 = vcmask 261120  }
  0xb5   :  { %2761 = vmatprep.subr.bf16.mxu1 %v3533_v0  ;;  %2765 = vmatprep.mubr.msk.bf16.mxu1 %vm3534_vm0, %v3533_v0  ;;  %s4220_s25 = sld [smem:[#allocation35_spill]]  ;;  %v2567_v7 = vld [vmem:[#allocation2] ss:$0 sm:$0xff]  ;;  %vm367_vm2 = vcmask 130048   ;;  %s3535_s4 = smov 112   ;;  %vm1300_vm13 = vcmask 523264  }
  0xb6   :  { %s3536_s1 = smov 96   ;;  %s4221_s16 = sld [smem:[#allocation37_spill]] }
  0xb7   :  { %s4222_s28 = sld [smem:[#allocation41_spill]] }
  0xb8   :  { %s4223_s21 = sld [smem:[#allocation36_spill]] }
  0xb9   :  { %s4224_s18 = sld [smem:[#allocation38_spill]] }
  0xba   :  { %v3029_v1 = vld [vmem:[%s4219_s29 + $0x8] sm:$0xff]   ;;  %v3030_v2 = vld [vmem:[%s4219_s29] sm:$0xff]  }
  0xbb   :  { %2762 = vmatpush3.bf16.msra.mxu1 %v3029_v1  ;;  %v3761_v3 = vld [vmem:[%s4220_s25] sm:$0xff]  ;;  %v3766_v4 = vld [vmem:[%s4220_s25 + $0x8] sm:$0xff] }
  0xbc   :  { %2763 = vmatprep.subr.bf16.mxu1 %v3533_v0  ;;  %v282_v5 = vpack.c.bf16 %v3766_v4, %v3761_v3  ;;  %v273_v24 = vld [vmem:[%s4221_s16] sm:$0xff]  ;;  %v276_v26 = vld [vmem:[%s4221_s16 + $0x18] sm:$0xff]  ;;  %v274_v29 = vld [vmem:[%s4221_s16 + $0x8] sm:$0xff] }
  0xbd   :  { %v275_v32 = vld [vmem:[%s4221_s16 + $0x10] sm:$0xff] }
  0xbf   :  { %2764 = vmatpush3.bf16.msra.mxu1 %v3030_v2 }
  0xc2   :  { %2766 = vmatmul.mubr.msk.bf16.vlgmr.msra.gmra.mxu1 %vm306_vm1, %v282_v5 }
 0x182   :  { %v344_v6 = vpop.f32.mrf.mxu1 }
 0x183   :  { %v345_v10 = vadd.f32 %v2567_v7, %v344_v6 }
 0x184   :  { %v2767_v8 = vpop.f32.mrf.mxu1 }
 0x186   :  { %v347_v9 = vpop.f32.mrf.mxu1 }
 0x187   :  { %v348_v11 = vadd.f32 %v2567_v7, %v347_v9 }
 0x188   :  { %v2768_v12 = vpop.f32.mrf.mxu1 }
 0x189   :  { %v3772_v13 = vpack.c.bf16 %v348_v11, %v345_v10  ;;  %v2979_v14 = vpack.i.bf16 %v348_v11, %v345_v10 }
 0x18b   :  { %2980 = vrot.lane.b32.xlu0 %v2979_v14, %s3535_s4  ;;  %363 = vrot.lane.b32.xlu1 %v3772_v13, %s3536_s1  ;;  %v3031_v14 = vld [vmem:[%s4222_s28 + $0x8] sm:$0xff]  }
 0x18c   :  { %2773 = vmatprep.mubr.msk.bf16.mxu1 %vm367_vm2, %v3772_v13 }
 0x1fd   :  { %v2981_v15 = vpop.permute.xlu0 %2980  ;;  %v364_v21 = vpop.permute.xlu1 %363 }
 0x1fe   :  { %v2983_v16 = vunpack.i.h.bf16 %v2981_v15  ;;  %v2982_v17 = vunpack.i.l.bf16 %v2981_v15  ;;  %v375_v22 = vsel %vm367_vm2, %v364_v21, 0  ;;  %v3032_v15 = vld [vmem:[%s4222_s28] sm:$0xff]  }
 0x200   :  { %v360_v18 = vpack.c.bf16 %v2983_v16, %v2982_v17 }
 0x202   :  { %365 = vrot.lane.b32.xlu0 %v360_v18, %s3536_s1 }
 0x274   :  { %v366_v19 = vpop.permute.xlu0 %365 }
 0x275   :  { %v378_v20 = vsel %vm367_vm2, %v366_v19, 0  ;;  %2945 = vmatprep.subr.msk.bf16.mxu1 %vm367_vm2, %v366_v19 }
 0x276   :  { %2770 = vmatpush3.bf16.xpose.msra.mxu1 %v378_v20 }
 0x277   :  { %2946 = vmatprep.subr.msk.bf16.mxu1 %vm367_vm2, %v364_v21 }
 0x27e   :  { %2772 = vmatpush3.bf16.xpose.msra.mxu1 %v375_v22 }
 0x27f   :  { %2793 = vmatprep.subr.bf16.mxu1 %v3533_v0 }
 0x285   :  { %2774 = vmatmul.mubr.msk.bf16.vlgmr.msra.gmra.mxu1 %vm367_vm2, %v360_v18 }
 0x286   :  { %2797 = vmatprep.mubr.msk.bf16.mxu1 %vm3534_vm0, %v3533_v0 }
 0x345   :  { %v2775_v23 = vpop.f32.mrf.mxu1 }
 0x346   :  { %v423_v35 = vadd.f32 %v2775_v23, %v275_v32 }
 0x347   :  { %v414_v25 = vpop.f32.mrf.mxu1 }
 0x348   :  { %v415_v27 = vadd.f32 %v414_v25, %v273_v24  ;;  %v435_v38 = vsel %vm306_vm1, %v423_v35, -inf }
 0x349   :  { %v2776_v28 = vpop.f32.mrf.mxu1 }
 0x34a   :  { %v426_v30 = vadd.f32 %v2776_v28, %v276_v26  ;;  %v429_v31 = vsel %vm306_vm1, %v415_v27, -inf }
 0x34b   :  { %v417_v33 = vpop.f32.mrf.mxu1  ;;  %430 = vmax.xlane.f32.xlu1 %v429_v31 }
 0x34c   :  { %v418_v34 = vadd.f32 %v417_v33, %v274_v29  ;;  %v438_v37 = vsel %vm306_vm1, %v426_v30, -inf }
 0x34e   :  { %v432_v36 = vsel %vm306_vm1, %v418_v34, -inf }
 0x34f   :  { %433 = vmax.xlane.f32.xlu0 %v432_v36  ;;  %439 = vmax.xlane.f32.xlu1 %v438_v37 }
 0x353   :  { %436 = vmax.xlane.f32.xlu0 %v435_v38  ;;  %v3033_v38 = vld [vmem:[%s4188_s12 + $0x8] sm:$0xff]  }
 0x3d4   :  { %v431_v39 = vpop.xlane.xlu1 %430 }
 0x3d5   :  { %v441_v44 = vsub.f32 %v415_v27, %v431_v39  ;;  %v2575_v27 = vld [vmem:[#allocation5] ss:$0 sm:$0xff] }
 0x3d6   :  { %v271_v39 = vld [vmem:[%s4223_s21] sm:$0xff] }
 0x3d7   :  { %v445_v49 = vmul.f32 1.442695, %v441_v44 }
 0x3d8   :  { %v434_v40 = vpop.xlane.xlu0 %433  ;;  %v440_v41 = vpop.xlane.xlu1 %439 }
 0x3d9   :  { %v442_v42 = vsub.f32 %v418_v34, %v434_v40  ;;  %v444_v43 = vsub.f32 %v426_v30, %v440_v41 }
 0x3db   :  { %v451_v45 = vmul.f32 1.442695, %v444_v43  ;;  %v447_v46 = vmul.f32 1.442695, %v442_v42 }
 0x3dc   :  { %v437_v47 = vpop.xlane.xlu0 %436 }
 0x3dd   :  { %v443_v48 = vsub.f32 %v423_v35, %v437_v47  ;;  %3061 = vpow2.f32 %v451_v45 }
 0x3de   :  { %3063 = vpow2.f32 %v447_v46 }
 0x3df   :  { %v449_v50 = vmul.f32 1.442695, %v443_v48 }
 0x3e1   :  { %3065 = vpow2.f32 %v449_v50 }
 0x3e2   :  { %3067 = vpow2.f32 %v445_v49 }
 0x3ea   :  { %v3062_v51 = vpop.eup %3061 }
 0x3eb   :  { %v462_v52 = vsel %vm306_vm1, %v3062_v51, 0.0  ;;  %v3064_v53 = vpop.eup %3063 }
 0x3ec   :  { %463 = vadd.xlane.f32.xlu1 %v462_v52  ;;  %v456_v57 = vsel %vm306_vm1, %v3064_v53, 0.0  ;;  %v3036_v52 = vld [vmem:[%s4186_s10] sm:$0xff]  }
 0x3ee   :  { %v3066_v54 = vpop.eup %3065 }
 0x3ef   :  { %v459_v55 = vsel %vm306_vm1, %v3066_v54, 0.0  ;;  %v3068_v56 = vpop.eup %3067 }
 0x3f0   :  { %460 = vadd.xlane.f32.xlu0 %v459_v55  ;;  %457 = vadd.xlane.f32.xlu1 %v456_v57  ;;  %v453_v58 = vsel %vm306_vm1, %v3068_v56, 0.0 }
 0x3f4   :  { %454 = vadd.xlane.f32.xlu0 %v453_v58 }
 0x401   :  { %475 = vrot.lane.b32.xlu1 %v3772_v13, %s3522_s13 }
 0x40a   :  { %477 = vrot.lane.b32.xlu0 %v360_v18, %s3522_s13 }
 0x475   :  { %v464_v59 = vpop.xlane.xlu1 %463 }
 0x479   :  { %v461_v60 = vpop.xlane.xlu0 %460  ;;  %v458_v61 = vpop.xlane.xlu1 %457 }
 0x47a   :  { %3069 = vrcp.f32 %v461_v60 }
 0x47b   :  { %3071 = vrcp.f32 %v458_v61 }
 0x47c   :  { %3073 = vrcp.f32 %v464_v59 }
 0x47d   :  { %v455_v62 = vpop.xlane.xlu0 %454  ;;  %v476_v1 = vpop.permute.xlu1 %475 }
 0x47e   :  { %3075 = vrcp.f32 %v455_v62 }
 0x481   :  { %v478_v63 = vpop.permute.xlu0 %477 }
 0x482   :  { %2777 = vmatprep.subr.bf16.mxu0 %v478_v63 }
 0x483   :  { %2778 = vmatpush3.bf16.msra.mxu0 %v478_v63 }
 0x484   :  { %2779 = vmatprep.subr.bf16.mxu0 %v476_v1 }
 0x487   :  { %2780 = vmatpush3.bf16.msra.mxu0 %v476_v1  ;;  %v3070_v2 = vpop.eup %3069 }
 0x488   :  { %2785 = vmatprep.subr.bf16.mxu0 %v3533_v0  ;;  %v3072_v5 = vpop.eup %3071  ;;  %v471_v8 = vmul.f32 %v3070_v2, %v3066_v54 }
 0x489   :  { %v3074_v6 = vpop.eup %3073  ;;  %v470_v10 = vmul.f32 %v3072_v5, %v3064_v53  ;;  %v2585_v53 = vld [vmem:[#allocation11] ss:$0 sm:$0xff] }
 0x48a   :  { %v472_v11 = vmul.f32 %v3074_v6, %v3062_v51  ;;  %v3035_v51 = vld [vmem:[%s4186_s10 + $0x8] sm:$0xff]  }
 0x48b   :  { %v3076_v7 = vpop.eup %3075  ;;  %2794 = vmatpush3.bf16.msra.mxu1 %v3035_v51 }
 0x48c   :  { %v469_v9 = vmul.f32 %v3076_v7, %v3068_v56  ;;  %v474_v13 = vpack.c.bf16 %v472_v11, %v471_v8  ;;  %2795 = vmatprep.subr.bf16.mxu1 %v3533_v0 }
 0x48e   :  { %v473_v12 = vpack.c.bf16 %v470_v10, %v469_v9 }
 0x48f   :  { %2796 = vmatpush3.bf16.msra.mxu1 %v3036_v52  ;;  %v278_v52 = vld [vmem:[%s4224_s18 + $0x8] sm:$0xff] }
 0x490   :  { %2781 = vmatprep.mubr.msk.bf16.mxu0 %vm306_vm1, %v473_v12 }
 0x491   :  { %2782 = vmatmul.mubr.msk.bf16.vlgmr.msra.gmra.mxu0 %vm306_vm1, %v474_v13 }
 0x492   :  { %2789 = vmatprep.mubr.msk.bf16.mxu0 %vm3534_vm0, %v3533_v0  ;;  %2786 = vmatpush3.bf16.msra.mxu0 %v3031_v14 }
 0x493   :  { %2787 = vmatprep.subr.bf16.mxu0 %v3533_v0 }
 0x496   :  { %2788 = vmatpush3.bf16.msra.mxu0 %v3032_v15 }
 0x497   :  { %2801 = vmatprep.subr.bf16.mxu0 %v3533_v0 }
 0x551   :  { %v2783_v16 = vpop.f32.mrf.mxu0 }
 0x553   :  { %v521_v17 = vpop.f32.mrf.mxu0 }
 0x555   :  { %v2784_v18 = vpop.f32.mrf.mxu0 }
 0x556   :  { %v2984_v19 = vpack.i.bf16 %v2784_v18, %v2783_v16 }
 0x557   :  { %v524_v23 = vpop.f32.mrf.mxu0 }
 0x558   :  { %2985 = vrot.lane.b32.xlu1 %v2984_v19, %s3517_s2  ;;  %v2579_v19 = vld [vmem:[#allocation7] ss:$0 sm:$0xff] }
 0x5ca   :  { %v2986_v20 = vpop.permute.xlu1 %2985 }
 0x5cb   :  { %v2988_v21 = vunpack.i.h.bf16 %v2986_v20  ;;  %v2987_v22 = vunpack.i.l.bf16 %v2986_v20 }
 0x5cd   :  { %v544_v24 = vsel %vm367_vm2, %v521_v17, %v2987_v22  ;;  %v545_v25 = vsel %vm367_vm2, %v524_v23, %v2988_v21  ;;  %v2580_v23 = vld [vmem:[#allocation8] ss:$0 sm:$0xff] }
 0x5ce   :  { %v546_v26 = vpack.c.bf16 %v545_v25, %v544_v24 }
 0x5d0   :  { %2790 = vmatmul.mubr.msk.bf16.vlgmr.msra.gmra.mxu0 %vm306_vm1, %v546_v26 }
 0x5d1   :  { %2805 = vmatprep.mubr.msk.bf16.mxu0 %vm3534_vm0, %v3533_v0  ;;  %2802 = vmatpush3.bf16.msra.mxu0 %v3033_v38 }
 0x5d2   :  { %2803 = vmatprep.subr.bf16.mxu0 %v3533_v0 }
 0x690   :  { %v607_v28 = vpop.f32.mrf.mxu0 }
 0x691   :  { %v608_v29 = vadd.f32 %v2575_v27, %v607_v28 }
 0x692   :  { %v2791_v30 = vpop.f32.mrf.mxu0 }
 0x693   :  { %v614_v31 = vadd.f32 %v608_v29, %v3761_v3  ;;  %v3034_v3 = vld [vmem:[%s4188_s12] sm:$0xff]  }
 0x694   :  { %v610_v32 = vpop.f32.mrf.mxu0  ;;  %2804 = vmatpush3.bf16.msra.mxu0 %v3034_v3 }
 0x695   :  { %v611_v33 = vadd.f32 %v2575_v27, %v610_v32  ;;  %v618_v34 = vsel %vm306_vm1, %v614_v31, 0.0 }
 0x696   :  { %619 = vadd.xlane.f32.xlu0 %v618_v34  ;;  %v2792_v35 = vpop.f32.mrf.mxu0 }
 0x697   :  { %v615_v36 = vadd.f32 %v611_v33, %v3766_v4  ;;  %v272_v4 = vld [vmem:[%s4223_s21 + $0x8] sm:$0xff] }
 0x698   :  { %v3847_v40 = vpack.c.bf16 %v272_v4, %v271_v39  ;;  %v2581_v35 = vld [vmem:[#allocation10] ss:$0 sm:$0xff] }
 0x699   :  { %v621_v37 = vsel %vm306_vm1, %v615_v36, 0.0 }
 0x69a   :  { %622 = vadd.xlane.f32.xlu1 %v621_v37  ;;  %2806 = vmatmul.mubr.msk.bf16.vlgmr.msra.gmra.mxu0 %vm306_vm1, %v3847_v40 }
 0x71f   :  { %v620_v41 = vpop.xlane.xlu0 %619 }
 0x720   :  { %v625_v42 = vmul.f32 0.03125, %v620_v41 }
 0x722   :  { %v627_v43 = vsub.f32 %v614_v31, %v625_v42 }
 0x723   :  { %v623_v44 = vpop.xlane.xlu1 %622 }
 0x724   :  { %v626_v45 = vmul.f32 0.03125, %v623_v44  ;;  %v629_v46 = vmul.f32 %v627_v43, %v627_v43 }
 0x726   :  { %v628_v47 = vsub.f32 %v615_v36, %v626_v45  ;;  %v631_v48 = vsel %vm306_vm1, %v629_v46, 0.0 }
 0x727   :  { %632 = vadd.xlane.f32.xlu0 %v631_v48  ;;  %v279_v48 = vld [vmem:[%s4224_s18 + $0x10] sm:$0xff] }
 0x728   :  { %v630_v49 = vmul.f32 %v628_v47, %v628_v47 }
 0x72a   :  { %v634_v50 = vsel %vm306_vm1, %v630_v49, 0.0 }
 0x72b   :  { %635 = vadd.xlane.f32.xlu0 %v634_v50 }
 0x75a   :  { %v803_v54 = vpop.f32.mrf.mxu0 }
 0x75b   :  { %v804_v56 = vadd.f32 %v2585_v53, %v803_v54 }
 0x75c   :  { %v2807_v55 = vpop.f32.mrf.mxu0 }
 0x75d   :  { %v280_v55 = vld [vmem:[%s4224_s18 + $0x18] sm:$0xff] }
 0x75e   :  { %v806_v57 = vpop.f32.mrf.mxu0 }
 0x75f   :  { %v807_v58 = vadd.f32 %v2585_v53, %v806_v57 }
 0x760   :  { %v2808_v59 = vpop.f32.mrf.mxu0 }
 0x761   :  { %v2989_v60 = vpack.i.bf16 %v807_v58, %v804_v56  ;;  %v3860_v61 = vpack.c.bf16 %v807_v58, %v804_v56 }
 0x763   :  { %2990 = vrot.lane.b32.xlu1 %v2989_v60, %s3535_s4  ;;  %v837_v33 = vsel %vm367_vm2, %v3860_v61, 0 }
 0x7b0   :  { %v633_v62 = vpop.xlane.xlu0 %632 }
 0x7b1   :  { %v637_v63 = vmul.f32 0.032258064, %v633_v62 }
 0x7b3   :  { %3077 = vrsqrt.f32 %v637_v63  ;;  %vm641_vm3 = vcmp.eq.f32.partialorder %v637_v63, inf  ;;  %v644_v7 = vand.u32 2147483648, %v637_v63  ;;  %vm643_vm4 = vcmp.eq.f32.partialorder %v637_v63, 0.0 }
 0x7b4   :  { %v636_v1 = vpop.xlane.xlu0 %635 }
 0x7b5   :  { %v638_v2 = vmul.f32 0.032258064, %v636_v1 }
 0x7b7   :  { %3079 = vrsqrt.f32 %v638_v2  ;;  %vm648_vm5 = vcmp.eq.f32.partialorder %v638_v2, inf  ;;  %v651_v13 = vand.u32 2147483648, %v638_v2  ;;  %vm650_vm6 = vcmp.eq.f32.partialorder %v638_v2, 0.0 }
 0x7c0   :  { %v3078_v5 = vpop.eup %3077 }
 0x7c1   :  { %v640_v6 = vmul.f32 %v3078_v5, %v637_v63 }
 0x7c3   :  { %v642_v8 = vsel %vm641_vm3, %v637_v63, %v640_v6 }
 0x7c4   :  { %v3080_v9 = vpop.eup %3079  ;;  %v645_v10 = vsel %vm643_vm4, %v644_v7, %v642_v8 }
 0x7c5   :  { %v653_v11 = vadd.f32 1e-06, %v645_v10  ;;  %v647_v12 = vmul.f32 %v3080_v9, %v638_v2 }
 0x7c7   :  { %3081 = vrcp.f32 %v653_v11  ;;  %v649_v14 = vsel %vm648_vm5, %v638_v2, %v647_v12 }
 0x7c8   :  { %v652_v15 = vsel %vm650_vm6, %v651_v13, %v649_v14 }
 0x7c9   :  { %v654_v16 = vadd.f32 1e-06, %v652_v15 }
 0x7cb   :  { %3083 = vrcp.f32 %v654_v16 }
 0x7d4   :  { %v3082_v17 = vpop.eup %3081 }
 0x7d5   :  { %v657_v18 = vmul.f32 %v3082_v17, %v627_v43  ;;  %v2991_v28 = vpop.permute.xlu1 %2990 }
 0x7d6   :  { %v2993_v29 = vunpack.i.h.bf16 %v2991_v28  ;;  %v2992_v30 = vunpack.i.l.bf16 %v2991_v28 }
 0x7d7   :  { %v665_v22 = vmul.f32 %v2579_v19, %v657_v18 }
 0x7d8   :  { %v3084_v20 = vpop.eup %3083  ;;  %v3870_v31 = vpack.c.bf16 %v2993_v29, %v2992_v30 }
 0x7d9   :  { %v658_v21 = vmul.f32 %v3084_v20, %v628_v47  ;;  %v3863_v25 = vadd.f32 %v2580_v23, %v665_v22  ;;  %v277_v47 = vld [vmem:[%s4224_s18] sm:$0xff] }
 0x7da   :  { %2947 = vmatprep.subr.msk.bf16.mxu1 %vm367_vm2, %v3870_v31  ;;  %v840_v32 = vsel %vm367_vm2, %v3870_v31, 0 }
 0x7db   :  { %v666_v24 = vmul.f32 %v2579_v19, %v658_v21 }
 0x7dd   :  { %v3865_v26 = vadd.f32 %v2580_v23, %v666_v24 }
 0x7df   :  { %v675_v27 = vpack.c.bf16 %v3865_v26, %v3863_v25 }
 0x7e1   :  { %2798 = vmatmul.mubr.msk.bf16.vlgmr.msra.gmra.mxu1 %vm306_vm1, %v675_v27 }
 0x7e2   :  { %2810 = vmatpush3.bf16.xpose.msra.mxu1 %v840_v32 }
 0x7e3   :  { %2948 = vmatprep.subr.msk.bf16.mxu1 %vm367_vm2, %v3860_v61 }
 0x7ea   :  { %2812 = vmatpush3.bf16.xpose.msra.mxu1 %v837_v33 }
 0x7eb   :  { %2833 = vmatprep.subr.bf16.mxu1 %v3533_v0 }
 0x8a1   :  { %v736_v34 = vpop.f32.mrf.mxu1 }
 0x8a2   :  { %v737_v38 = vadd.f32 %v2581_v35, %v736_v34 }
 0x8a3   :  { %v2799_v36 = vpop.f32.mrf.mxu1 }
 0x8a5   :  { %v739_v37 = vpop.f32.mrf.mxu1 }
 0x8a6   :  { %v740_v3 = vadd.f32 %v2581_v35, %v739_v37 }
 0x8a7   :  { %v2800_v39 = vpop.f32.mrf.mxu1 }
 0x8a8   :  { %v2994_v4 = vpack.i.bf16 %v740_v3, %v737_v38  ;;  %v826_v41 = vpack.c.bf16 %v740_v3, %v737_v38  ;;  %v3037_v3 = vld [vmem:[%s4190_s14 + $0x8] sm:$0xff]   ;;  %v3038_v39 = vld [vmem:[%s4190_s14] sm:$0xff]  }
 0x8aa   :  { %2995 = vrot.lane.b32.xlu0 %v2994_v4, %s3535_s4  ;;  %2813 = vmatprep.mubr.msk.bf16.mxu1 %vm367_vm2, %v826_v41 }
 0x91c   :  { %v2996_v42 = vpop.permute.xlu0 %2995 }
 0x91d   :  { %v2998_v43 = vunpack.i.h.bf16 %v2996_v42  ;;  %v2997_v44 = vunpack.i.l.bf16 %v2996_v42 }
 0x91f   :  { %v827_v45 = vpack.c.bf16 %v2998_v43, %v2997_v44 }
 0x921   :  { %2814 = vmatmul.mubr.msk.bf16.vlgmr.msra.gmra.mxu1 %vm367_vm2, %v827_v45 }
 0x922   :  { %2837 = vmatprep.mubr.msk.bf16.mxu1 %vm3534_vm0, %v3533_v0 }
 0x9e1   :  { %v2815_v46 = vpop.f32.mrf.mxu1 }
 0x9e2   :  { %v885_v53 = vadd.f32 %v2815_v46, %v279_v48 }
 0x9e3   :  { %v876_v49 = vpop.f32.mrf.mxu1 }
 0x9e4   :  { %v877_v50 = vadd.f32 %v876_v49, %v277_v47  ;;  %v897_v60 = vsel %vm306_vm1, %v885_v53, -inf }
 0x9e5   :  { %v2816_v51 = vpop.f32.mrf.mxu1 }
 0x9e6   :  { %v891_v54 = vsel %vm306_vm1, %v877_v50, -inf  ;;  %v888_v58 = vadd.f32 %v2816_v51, %v280_v55  ;;  %v2593_v51 = vld [vmem:[#allocation13] ss:$0 sm:$0xff] }
 0x9e7   :  { %v879_v56 = vpop.f32.mrf.mxu1  ;;  %892 = vmax.xlane.f32.xlu1 %v891_v54 }
 0x9e8   :  { %v880_v57 = vadd.f32 %v879_v56, %v278_v52  ;;  %v900_v62 = vsel %vm306_vm1, %v888_v58, -inf }
 0x9ea   :  { %v894_v59 = vsel %vm306_vm1, %v880_v57, -inf }
 0x9eb   :  { %895 = vmax.xlane.f32.xlu0 %v894_v59  ;;  %898 = vmax.xlane.f32.xlu1 %v897_v60 }
 0x9ef   :  { %901 = vmax.xlane.f32.xlu0 %v900_v62 }
 0xa70   :  { %v893_v63 = vpop.xlane.xlu1 %892 }
 0xa71   :  { %v903_v1 = vsub.f32 %v877_v50, %v893_v63 }
 0xa73   :  { %v907_v9 = vmul.f32 1.442695, %v903_v1 }
 0xa74   :  { %v896_v2 = vpop.xlane.xlu0 %895  ;;  %v899_v5 = vpop.xlane.xlu1 %898 }
 0xa75   :  { %v905_v6 = vsub.f32 %v885_v53, %v899_v5  ;;  %v904_v7 = vsub.f32 %v880_v57, %v896_v2 }
 0xa77   :  { %v911_v8 = vmul.f32 1.442695, %v905_v6  ;;  %v909_v12 = vmul.f32 1.442695, %v904_v7 }
 0xa78   :  { %v902_v10 = vpop.xlane.xlu0 %901 }
 0xa79   :  { %v906_v11 = vsub.f32 %v888_v58, %v902_v10  ;;  %3085 = vpow2.f32 %v911_v8 }
 0xa7a   :  { %3087 = vpow2.f32 %v907_v9 }
 0xa7b   :  { %v913_v13 = vmul.f32 1.442695, %v906_v11  ;;  %v3039_v11 = vld [vmem:[#allocation17 + $0x8] sm:$0xff]  }
 0xa7c   :  { %2834 = vmatpush3.bf16.msra.mxu1 %v3039_v11 }
 0xa7d   :  { %3089 = vpow2.f32 %v913_v13  ;;  %2835 = vmatprep.subr.bf16.mxu1 %v3533_v0 }
 0xa7e   :  { %3091 = vpow2.f32 %v909_v12 }
 0xa86   :  { %v3086_v14 = vpop.eup %3085 }
 0xa87   :  { %v921_v15 = vsel %vm306_vm1, %v3086_v14, 0.0  ;;  %v3088_v16 = vpop.eup %3087 }
 0xa88   :  { %922 = vadd.xlane.f32.xlu1 %v921_v15  ;;  %v915_v20 = vsel %vm306_vm1, %v3088_v16, 0.0 }
 0xa8a   :  { %v3090_v17 = vpop.eup %3089 }
 0xa8b   :  { %v924_v18 = vsel %vm306_vm1, %v3090_v17, 0.0  ;;  %v3092_v19 = vpop.eup %3091 }
 0xa8c   :  { %925 = vadd.xlane.f32.xlu0 %v924_v18  ;;  %916 = vadd.xlane.f32.xlu1 %v915_v20  ;;  %v918_v21 = vsel %vm306_vm1, %v3092_v19, 0.0 }
 0xa90   :  { %919 = vadd.xlane.f32.xlu0 %v918_v21 }
 0xa9d   :  { %941 = vrot.lane.b32.xlu1 %v3870_v31, %s3536_s1 }
 0xaa6   :  { %939 = vrot.lane.b32.xlu0 %v3860_v61, %s3536_s1 }
 0xb11   :  { %v923_v22 = vpop.xlane.xlu1 %922 }
 0xb15   :  { %v926_v23 = vpop.xlane.xlu0 %925  ;;  %v917_v24 = vpop.xlane.xlu1 %916 }
 0xb16   :  { %3093 = vrcp.f32 %v926_v23 }
 0xb17   :  { %3095 = vrcp.f32 %v917_v24 }
 0xb18   :  { %3097 = vrcp.f32 %v923_v22 }
 0xb19   :  { %v920_v27 = vpop.xlane.xlu0 %919  ;;  %v942_v28 = vpop.permute.xlu1 %941 }
 0xb1a   :  { %3099 = vrcp.f32 %v920_v27  ;;  %2817 = vmatprep.subr.bf16.mxu0 %v942_v28 }
 0xb1b   :  { %2818 = vmatpush3.bf16.msra.mxu0 %v942_v28 }
 0xb1d   :  { %v940_v29 = vpop.permute.xlu0 %939 }
 0xb1e   :  { %2819 = vmatprep.subr.bf16.mxu0 %v940_v29 }
 0xb1f   :  { %2820 = vmatpush3.bf16.msra.mxu0 %v940_v29 }
 0xb20   :  { %2825 = vmatprep.subr.bf16.mxu0 %v3533_v0 }
 0xb23   :  { %v3094_v30 = vpop.eup %3093 }
 0xb24   :  { %v3096_v31 = vpop.eup %3095  ;;  %v934_v33 = vmul.f32 %v3094_v30, %v3090_v17 }
 0xb25   :  { %v3098_v32 = vpop.eup %3097  ;;  %v931_v34 = vmul.f32 %v3096_v31, %v3088_v16 }
 0xb26   :  { %v933_v36 = vmul.f32 %v3098_v32, %v3086_v14  ;;  %v2597_v32 = vld [vmem:[#allocation14] ss:$0 sm:$0xff] }
 0xb27   :  { %v3100_v61 = vpop.eup %3099 }
 0xb28   :  { %v932_v35 = vmul.f32 %v3100_v61, %v3092_v19  ;;  %v936_v38 = vpack.c.bf16 %v934_v33, %v933_v36 }
 0xb2a   :  { %v935_v37 = vpack.c.bf16 %v932_v35, %v931_v34  ;;  %v2598_v35 = vld [vmem:[#allocation16] ss:$0 sm:$0xff] }
 0xb2c   :  { %2821 = vmatprep.mubr.msk.bf16.mxu0 %vm306_vm1, %v935_v37 }
 0xb2d   :  { %2822 = vmatmul.mubr.msk.bf16.vlgmr.msra.gmra.mxu0 %vm306_vm1, %v936_v38 }
 0xb2e   :  { %2829 = vmatprep.mubr.msk.bf16.mxu0 %vm3534_vm0, %v3533_v0  ;;  %2826 = vmatpush3.bf16.msra.mxu0 %v3037_v3 }
 0xb2f   :  { %2827 = vmatprep.subr.bf16.mxu0 %v3533_v0 }
 0xb32   :  { %2828 = vmatpush3.bf16.msra.mxu0 %v3038_v39  ;;  %v3041_v39 = vld [vmem:[%s4196_s20 + $0x18] sm:$0xff]  }
 0xb33   :  { %2841 = vmatprep.subr.bf16.mxu0 %v3533_v0 }
 0xbed   :  { %v2823_v4 = vpop.f32.mrf.mxu0 }
 0xbef   :  { %v985_v41 = vpop.f32.mrf.mxu0 }
 0xbf1   :  { %v2824_v42 = vpop.f32.mrf.mxu0 }
 0xbf2   :  { %v2999_v43 = vpack.i.bf16 %v2824_v42, %v2823_v4  ;;  %v3042_v4 = vld [vmem:[%s4196_s20 + $0x10] sm:$0xff]   ;;  %v3044_v42 = vld [vmem:[%s4196_s20] sm:$0xff]  }
 0xbf3   :  { %v988_v47 = vpop.f32.mrf.mxu0 }
 0xbf4   :  { %3000 = vrot.lane.b32.xlu1 %v2999_v43, %s3517_s2  ;;  %v2599_v43 = vld [vmem:[#allocation19] ss:$0 sm:$0xff] }
 0xc66   :  { %v3001_v44 = vpop.permute.xlu1 %3000 }
 0xc67   :  { %v3003_v45 = vunpack.i.h.bf16 %v3001_v44  ;;  %v3002_v46 = vunpack.i.l.bf16 %v3001_v44 }
 0xc69   :  { %v1008_v48 = vsel %vm367_vm2, %v985_v41, %v3002_v46  ;;  %v1009_v49 = vsel %vm367_vm2, %v988_v47, %v3003_v45  ;;  %v3043_v41 = vld [vmem:[%s4196_s20 + $0x8] sm:$0xff]  }
 0xc6a   :  { %v1010_v50 = vpack.c.bf16 %v1009_v49, %v1008_v48 }
 0xc6c   :  { %2830 = vmatmul.mubr.msk.bf16.vlgmr.msra.gmra.mxu0 %vm306_vm1, %v1010_v50 }
 0xc6d   :  { %2849 = vmatprep.mubr.msk.bf16.mxu0 %vm3534_vm0, %v3533_v0  ;;  %2842 = vmatpush3.bf16.msra.mxu0 %v3041_v39 }
 0xc6e   :  { %2843 = vmatprep.subr.bf16.mxu0 %v3533_v0 }
 0xc71   :  { %2844 = vmatpush3.bf16.msra.mxu0 %v3042_v4 }
 0xc72   :  { %2845 = vmatprep.subr.bf16.mxu0 %v3533_v0 }
 0xc75   :  { %2846 = vmatpush3.bf16.msra.mxu0 %v3043_v41 }
 0xc76   :  { %2847 = vmatprep.subr.bf16.mxu0 %v3533_v0 }
 0xc79   :  { %2848 = vmatpush3.bf16.msra.mxu0 %v3044_v42  ;;  %v2603_v42 = vld [vmem:[#allocation20] ss:$0 sm:$0xff] }
 0xd2c   :  { %v1071_v52 = vpop.f32.mrf.mxu0 }
 0xd2d   :  { %v1072_v53 = vadd.f32 %v2593_v51, %v1071_v52 }
 0xd2e   :  { %v2831_v54 = vpop.f32.mrf.mxu0 }
 0xd2f   :  { %v1078_v55 = vadd.f32 %v1072_v53, %v3863_v25 }
 0xd30   :  { %v1074_v56 = vpop.f32.mrf.mxu0 }
 0xd31   :  { %v1075_v57 = vadd.f32 %v2593_v51, %v1074_v56  ;;  %v1082_v58 = vsel %vm306_vm1, %v1078_v55, 0.0 }
 0xd32   :  { %1083 = vadd.xlane.f32.xlu1 %v1082_v58  ;;  %v2832_v59 = vpop.f32.mrf.mxu0 }
 0xd33   :  { %v1079_v60 = vadd.f32 %v1075_v57, %v3865_v26  ;;  %v3040_v26 = vld [vmem:[#allocation17] sm:$0xff]  }
 0xd34   :  { %2836 = vmatpush3.bf16.msra.mxu1 %v3040_v26 }
 0xd35   :  { %v1085_v62 = vsel %vm306_vm1, %v1079_v60, 0.0  ;;  %2853 = vmatprep.subr.bf16.mxu1 %v3533_v0 }
 0xd36   :  { %1086 = vadd.xlane.f32.xlu0 %v1085_v62 }
 0xdbb   :  { %v1084_v63 = vpop.xlane.xlu1 %1083 }
 0xdbc   :  { %v1088_v1 = vmul.f32 0.03125, %v1084_v63 }
 0xdbe   :  { %v1090_v2 = vsub.f32 %v1078_v55, %v1088_v1 }
 0xdbf   :  { %v1087_v5 = vpop.xlane.xlu0 %1086 }
 0xdc0   :  { %v1089_v6 = vmul.f32 0.03125, %v1087_v5  ;;  %v1092_v7 = vmul.f32 %v1090_v2, %v1090_v2 }
 0xdc2   :  { %v1091_v8 = vsub.f32 %v1079_v60, %v1089_v6  ;;  %v1094_v25 = vsel %vm306_vm1, %v1092_v7, 0.0 }
 0xdc3   :  { %1095 = vadd.xlane.f32.xlu0 %v1094_v25 }
 0xdc4   :  { %v1093_v9 = vmul.f32 %v1091_v8, %v1091_v8 }
 0xdc6   :  { %v1097_v10 = vsel %vm306_vm1, %v1093_v9, 0.0 }
 0xdc7   :  { %1098 = vadd.xlane.f32.xlu1 %v1097_v10 }
 0xe4c   :  { %v1096_v12 = vpop.xlane.xlu0 %1095 }
 0xe4d   :  { %v1100_v13 = vmul.f32 0.032258064, %v1096_v12 }
 0xe4f   :  { %3101 = vrsqrt.f32 %v1100_v13  ;;  %vm1104_vm7 = vcmp.eq.f32.partialorder %v1100_v13, inf  ;;  %v1107_v18 = vand.u32 2147483648, %v1100_v13  ;;  %vm1106_vm8 = vcmp.eq.f32.partialorder %v1100_v13, 0.0 }
 0xe50   :  { %v1099_v14 = vpop.xlane.xlu1 %1098 }
 0xe51   :  { %v1101_v15 = vmul.f32 0.032258064, %v1099_v14 }
 0xe53   :  { %3103 = vrsqrt.f32 %v1101_v15  ;;  %vm1111_vm9 = vcmp.eq.f32.partialorder %v1101_v15, inf  ;;  %v1114_v24 = vand.u32 2147483648, %v1101_v15  ;;  %vm1113_vm10 = vcmp.eq.f32.partialorder %v1101_v15, 0.0 }
 0xe5c   :  { %v3102_v16 = vpop.eup %3101 }
 0xe5d   :  { %v1103_v17 = vmul.f32 %v3102_v16, %v1100_v13 }
 0xe5f   :  { %v1105_v19 = vsel %vm1104_vm7, %v1100_v13, %v1103_v17 }
 0xe60   :  { %v3104_v20 = vpop.eup %3103  ;;  %v1108_v21 = vsel %vm1106_vm8, %v1107_v18, %v1105_v19 }
 0xe61   :  { %v1116_v22 = vadd.f32 1e-06, %v1108_v21  ;;  %v1110_v23 = vmul.f32 %v3104_v20, %v1101_v15 }
 0xe63   :  { %3105 = vrcp.f32 %v1116_v22  ;;  %v1112_v27 = vsel %vm1111_vm9, %v1101_v15, %v1110_v23 }
 0xe64   :  { %v1115_v28 = vsel %vm1113_vm10, %v1114_v24, %v1112_v27 }
 0xe65   :  { %v1117_v29 = vadd.f32 1e-06, %v1115_v28  ;;  %v3537_v28 = vmov -1.0  }
 0xe67   :  { %3107 = vrcp.f32 %v1117_v29 }
 0xe70   :  { %v3106_v30 = vpop.eup %3105 }
 0xe71   :  { %v1120_v31 = vmul.f32 %v3106_v30, %v1090_v2 }
 0xe73   :  { %v1128_v34 = vmul.f32 %v2597_v32, %v1120_v31 }
 0xe74   :  { %v3108_v61 = vpop.eup %3107 }
 0xe75   :  { %v1121_v33 = vmul.f32 %v3108_v61, %v1091_v8  ;;  %v3937_v37 = vadd.f32 %v2598_v35, %v1128_v34 }
 0xe77   :  { %v1129_v36 = vmul.f32 %v2597_v32, %v1121_v33 }
 0xe79   :  { %v3939_v38 = vadd.f32 %v2598_v35, %v1129_v36 }
 0xe7b   :  { %v1138_v3 = vpack.c.bf16 %v3939_v38, %v3937_v37 }
 0xe7d   :  { %2838 = vmatmul.mubr.msk.bf16.vlgmr.msra.gmra.mxu1 %vm306_vm1, %v1138_v3 }
 0xe7e   :  { %2857 = vmatprep.mubr.msk.bf16.mxu1 %vm3534_vm0, %v3533_v0 }
 0xf3d   :  { %v1199_v44 = vpop.f32.mrf.mxu1 }
 0xf3e   :  { %v1200_v45 = vadd.f32 %v2599_v43, %v1199_v44 }
 0xf3f   :  { %v2839_v46 = vpop.f32.mrf.mxu1 }
 0xf40   :  { %v1208_v47 = vmul.f32 0.70710677, %v1200_v45  ;;  %v1206_v35 = vmul.f32 0.5, %v1200_v45 }
 0xf41   :  { %v1202_v48 = vpop.f32.mrf.mxu1 }
 0xf42   :  { %v1214_v49 = vand.u32 2147483647, %v1208_v47  ;;  %v1203_v50 = vadd.f32 %v2599_v43, %v1202_v48  ;;  %vm1210_vm11 = vcmp.ge.f32.partialorder %v1208_v47, 0.0 }
 0xf43   :  { %v2840_v51 = vpop.f32.mrf.mxu1  ;;  %v1212_v29 = vsel %vm1210_vm11, 1.0, %v3537_v28 }
 0xf44   :  { %v1216_v52 = vmul.f32 0.3275911, %v1214_v49  ;;  %v1209_v53 = vmul.f32 0.70710677, %v1203_v50  ;;  %v1242_v58 = vsub.f32 0.0, %v1214_v49  ;;  %v1207_v36 = vmul.f32 0.5, %v1203_v50 }
 0xf46   :  { %v1218_v54 = vadd.f32 1.0, %v1216_v52  ;;  %v1215_v55 = vand.u32 2147483647, %v1209_v53  ;;  %v1244_v59 = vmul.f32 %v1242_v58, %v1214_v49  ;;  %vm1211_vm12 = vcmp.ge.f32.partialorder %v1209_v53, 0.0 }
 0xf47   :  { %v1213_v61 = vsel %vm1211_vm12, 1.0, %v3537_v28 }
 0xf48   :  { %3109 = vrcp.f32 %v1218_v54  ;;  %v1217_v56 = vmul.f32 0.3275911, %v1215_v55  ;;  %v1243_v60 = vsub.f32 0.0, %v1215_v55  ;;  %v1246_v1 = vmul.f32 1.442695, %v1244_v59 }
 0xf4a   :  { %v1219_v57 = vadd.f32 1.0, %v1217_v56  ;;  %v1245_v2 = vmul.f32 %v1243_v60, %v1215_v55 }
 0xf4c   :  { %3111 = vrcp.f32 %v1219_v57  ;;  %v1248_v25 = vmul.f32 1.442695, %v1245_v2 }
 0xf4d   :  { %3113 = vpow2.f32 %v1246_v1 }
 0xf4e   :  { %3115 = vpow2.f32 %v1248_v25 }
 0xf55   :  { %v3110_v62 = vpop.eup %3109 }
 0xf56   :  { %v1224_v63 = vmul.f32 1.0614054, %v3110_v62 }
 0xf58   :  { %v1226_v5 = vadd.f32 -1.4531521, %v1224_v63  ;;  %v3046_v63 = vld [vmem:[%s4219_s29 + $0x10] sm:$0xff]  }
 0xf59   :  { %v3112_v6 = vpop.eup %3111 }
 0xf5a   :  { %v1228_v7 = vmul.f32 %v3110_v62, %v1226_v5  ;;  %v1225_v8 = vmul.f32 1.0614054, %v3112_v6  ;;  %v3114_v20 = vpop.eup %3113 }
 0xf5b   :  { %v3116_v27 = vpop.eup %3115 }
 0xf5c   :  { %v1230_v9 = vadd.f32 1.4214138, %v1228_v7  ;;  %v1227_v10 = vadd.f32 -1.4531521, %v1225_v8 }
 0xf5e   :  { %v1232_v11 = vmul.f32 %v3110_v62, %v1230_v9  ;;  %v1229_v26 = vmul.f32 %v3112_v6, %v1227_v10 }
 0xf60   :  { %v1234_v12 = vadd.f32 -0.28449672, %v1232_v11  ;;  %v1231_v13 = vadd.f32 1.4214138, %v1229_v26 }
 0xf62   :  { %v1236_v14 = vmul.f32 %v3110_v62, %v1234_v12  ;;  %v1233_v15 = vmul.f32 %v3112_v6, %v1231_v13 }
 0xf64   :  { %v1238_v16 = vadd.f32 0.2548296, %v1236_v14  ;;  %v1235_v17 = vadd.f32 -0.28449672, %v1233_v15 }
 0xf66   :  { %v1240_v18 = vmul.f32 %v3110_v62, %v1238_v16  ;;  %v1237_v19 = vmul.f32 %v3112_v6, %v1235_v17 }
 0xf68   :  { %v1250_v21 = vmul.f32 %v3114_v20, %v1240_v18  ;;  %v1239_v22 = vadd.f32 0.2548296, %v1237_v19  ;;  %v2609_v19 = vld [vmem:[#allocation22] ss:$0 sm:$0xff] }
 0xf6a   :  { %v1252_v23 = vsub.f32 1.0, %v1250_v21  ;;  %v1241_v24 = vmul.f32 %v3112_v6, %v1239_v22 }
 0xf6c   :  { %v1254_v30 = vmul.f32 %v1252_v23, %v1212_v29  ;;  %v1251_v31 = vmul.f32 %v3116_v27, %v1241_v24  ;;  %v2610_v23 = vld [vmem:[#allocation23] ss:$0 sm:$0xff] }
 0xf6e   :  { %v1253_v32 = vsub.f32 1.0, %v1251_v31  ;;  %v1256_v33 = vadd.f32 1.0, %v1254_v30 }
 0xf70   :  { %v1255_v34 = vmul.f32 %v1253_v32, %v1213_v61  ;;  %v1258_v39 = vmul.f32 %v1256_v33, %v1206_v35  ;;  %v2615_v32 = vld [vmem:[#allocation2 + $0x1] ss:$0 sm:$0xff] }
 0xf72   :  { %v1257_v3 = vadd.f32 1.0, %v1255_v34 }
 0xf74   :  { %v1259_v4 = vmul.f32 %v1257_v3, %v1207_v36 }
 0xf76   :  { %v1260_v41 = vpack.c.bf16 %v1259_v4, %v1258_v39 }
 0xf78   :  { %2850 = vmatmul.mubr.msk.bf16.vlgmr.msra.gmra.mxu0 %vm1300_vm13, %v1260_v41 }
0x1038   :  { %v1338_v43 = vpop.f32.mrf.mxu0 }
0x1039   :  { %v1339_v44 = vadd.f32 %v2603_v42, %v1338_v43 }
0x103a   :  { %v2851_v46 = vpop.f32.mrf.mxu0 }
0x103b   :  { %v1345_v47 = vadd.f32 %v1339_v44, %v3937_v37 }
0x103c   :  { %v1341_v48 = vpop.f32.mrf.mxu0 }
0x103d   :  { %v1342_v49 = vadd.f32 %v2603_v42, %v1341_v48  ;;  %v1349_v51 = vsel %vm306_vm1, %v1345_v47, 0.0 }
0x103e   :  { %1350 = vadd.xlane.f32.xlu0 %v1349_v51  ;;  %v2852_v45 = vpop.f32.mrf.mxu0 }
0x103f   :  { %v1346_v50 = vadd.f32 %v1342_v49, %v3939_v38  ;;  %v3045_v38 = vld [vmem:[%s4219_s29 + $0x18] sm:$0xff]   ;;  %v3189_v45 = vld [vmem:[%s4221_s16] sm:$0xff] }
0x1040   :  { %2854 = vmatpush3.bf16.msra.mxu1 %v3045_v38 }
0x1041   :  { %v1352_v52 = vsel %vm306_vm1, %v1346_v50, 0.0  ;;  %2855 = vmatprep.subr.bf16.mxu1 %v3533_v0 }
0x1042   :  { %1353 = vadd.xlane.f32.xlu1 %v1352_v52 }
0x1044   :  { %2856 = vmatpush3.bf16.msra.mxu1 %v3046_v63 }
0x10c7   :  { %v1351_v53 = vpop.xlane.xlu0 %1350 }
0x10c8   :  { %v1355_v54 = vmul.f32 0.03125, %v1351_v53  ;;  %v3190_v53 = vld [vmem:[%s4221_s16 + $0x10] sm:$0xff] }
0x10ca   :  { %v1357_v55 = vsub.f32 %v1345_v47, %v1355_v54 }
0x10cb   :  { %v1354_v56 = vpop.xlane.xlu1 %1353 }
0x10cc   :  { %v1356_v57 = vmul.f32 0.03125, %v1354_v56  ;;  %v1359_v58 = vmul.f32 %v1357_v55, %v1357_v55 }
0x10ce   :  { %v1358_v59 = vsub.f32 %v1346_v50, %v1356_v57  ;;  %v1361_v37 = vsel %vm306_vm1, %v1359_v58, 0.0  ;;  %v3191_v57 = vld [vmem:[%s4221_s16 + $0x8] sm:$0xff] }
0x10cf   :  { %1362 = vadd.xlane.f32.xlu0 %v1361_v37 }
0x10d0   :  { %v1360_v60 = vmul.f32 %v1358_v59, %v1358_v59 }
0x10d2   :  { %v1364_v62 = vsel %vm306_vm1, %v1360_v60, 0.0 }
0x10d3   :  { %1365 = vadd.xlane.f32.xlu1 %v1364_v62 }
0x1158   :  { %v1363_v1 = vpop.xlane.xlu0 %1362 }
0x1159   :  { %v1367_v2 = vmul.f32 0.032258064, %v1363_v1 }
0x115b   :  { %3117 = vrsqrt.f32 %v1367_v2  ;;  %vm1371_vm14 = vcmp.eq.f32.partialorder %v1367_v2, inf  ;;  %v1374_v25 = vand.u32 2147483648, %v1367_v2  ;;  %vm1373_vm15 = vcmp.eq.f32.partialorder %v1367_v2, 0.0 }
0x115c   :  { %v1366_v5 = vpop.xlane.xlu1 %1365 }
0x115d   :  { %v1368_v6 = vmul.f32 0.032258064, %v1366_v5 }
0x115f   :  { %3119 = vrsqrt.f32 %v1368_v6  ;;  %vm1378_vm3 = vcmp.eq.f32.partialorder %v1368_v6, inf  ;;  %v1381_v13 = vand.u32 2147483648, %v1368_v6  ;;  %vm1380_vm4 = vcmp.eq.f32.partialorder %v1368_v6, 0.0 }
0x1168   :  { %v3118_v7 = vpop.eup %3117 }
0x1169   :  { %v1370_v8 = vmul.f32 %v3118_v7, %v1367_v2 }
0x116b   :  { %v1372_v9 = vsel %vm1371_vm14, %v1367_v2, %v1370_v8 }
0x116c   :  { %v3120_v10 = vpop.eup %3119  ;;  %v1375_v11 = vsel %vm1373_vm15, %v1374_v25, %v1372_v9 }
0x116d   :  { %v1383_v26 = vadd.f32 1e-06, %v1375_v11  ;;  %v1377_v12 = vmul.f32 %v3120_v10, %v1368_v6 }
0x116f   :  { %3121 = vrcp.f32 %v1383_v26  ;;  %v1379_v14 = vsel %vm1378_vm3, %v1368_v6, %v1377_v12 }
0x1170   :  { %v1382_v15 = vsel %vm1380_vm4, %v1381_v13, %v1379_v14 }
0x1171   :  { %v1384_v16 = vadd.f32 1e-06, %v1382_v15 }
0x1173   :  { %3123 = vrcp.f32 %v1384_v16 }
0x117c   :  { %v3122_v17 = vpop.eup %3121 }
0x117d   :  { %v1387_v18 = vmul.f32 %v3122_v17, %v1357_v55 }
0x117f   :  { %v1395_v22 = vmul.f32 %v2609_v19, %v1387_v18 }
0x1180   :  { %v3124_v20 = vpop.eup %3123 }
0x1181   :  { %v1388_v21 = vmul.f32 %v3124_v20, %v1358_v59  ;;  %v3977_v27 = vadd.f32 %v2610_v23, %v1395_v22  ;;  %v3192_v59 = vld [vmem:[%s4221_s16 + $0x18] sm:$0xff] }
0x1183   :  { %v1396_v24 = vmul.f32 %v2609_v19, %v1388_v21 }
0x1185   :  { %v3979_v29 = vadd.f32 %v2610_v23, %v1396_v24 }
0x1187   :  { %v1405_v30 = vpack.c.bf16 %v3979_v29, %v3977_v27 }
0x1189   :  { %2858 = vmatmul.mubr.msk.bf16.vlgmr.msra.gmra.mxu1 %vm306_vm1, %v1405_v30 }
0x1249   :  { %v1468_v31 = vpop.f32.mrf.mxu1 }
0x124a   :  { %v1469_v34 = vadd.f32 %v2615_v32, %v1468_v31 }
0x124b   :  { %v2859_v61 = vpop.f32.mrf.mxu1 }
0x124d   :  { %v1471_v33 = vpop.f32.mrf.mxu1 }
0x124e   :  { %v1472_v35 = vadd.f32 %v2615_v32, %v1471_v33 }
0x124f   :  { %v2860_v36 = vpop.f32.mrf.mxu1 }
0x1250   :  { %v3004_v3 = vpack.i.bf16 %v1472_v35, %v1469_v34  ;;  %v3984_v39 = vpack.c.bf16 %v1472_v35, %v1469_v34 }
0x1252   :  { %3005 = vrot.lane.b32.xlu0 %v3004_v3, %s3535_s4  ;;  %2865 = vmatprep.mubr.msk.bf16.mxu1 %vm367_vm2, %v3984_v39 }
0x12c4   :  { %v3006_v4 = vpop.permute.xlu0 %3005 }
0x12c5   :  { %v3008_v41 = vunpack.i.h.bf16 %v3006_v4  ;;  %v3007_v42 = vunpack.i.l.bf16 %v3006_v4 }
0x12c7   :  { %v1484_v43 = vpack.c.bf16 %v3008_v41, %v3007_v42  ;;  %v3047_v41 = vld [vmem:[%s4222_s28 + $0x18] sm:$0xff]   ;;  %v3048_v42 = vld [vmem:[%s4222_s28 + $0x10] sm:$0xff]  }
0x12c9   :  { %1489 = vrot.lane.b32.xlu1 %v1484_v43, %s3536_s1 }
0x12cd   :  { %1487 = vrot.lane.b32.xlu1 %v3984_v39, %s3536_s1 }
0x133b   :  { %v1490_v44 = vpop.permute.xlu1 %1489 }
0x133c   :  { %v1501_v46 = vsel %vm367_vm2, %v1490_v44, 0  ;;  %2949 = vmatprep.subr.msk.bf16.mxu1 %vm367_vm2, %v1490_v44 }
0x133d   :  { %2862 = vmatpush3.bf16.xpose.msra.mxu1 %v1501_v46 }
0x133f   :  { %v1488_v47 = vpop.permute.xlu1 %1487 }
0x1340   :  { %2950 = vmatprep.subr.msk.bf16.mxu1 %vm367_vm2, %v1488_v47  ;;  %v1498_v48 = vsel %vm367_vm2, %v1488_v47, 0 }
0x1345   :  { %2864 = vmatpush3.bf16.xpose.msra.mxu1 %v1498_v48 }
0x1346   :  { %2885 = vmatprep.subr.bf16.mxu1 %v3533_v0 }
0x134c   :  { %2866 = vmatmul.mubr.msk.bf16.vlgmr.msra.gmra.mxu1 %vm367_vm2, %v1484_v43 }
0x134d   :  { %2889 = vmatprep.mubr.msk.bf16.mxu1 %vm3534_vm0, %v3533_v0 }
0x140c   :  { %v2867_v49 = vpop.f32.mrf.mxu1 }
0x140d   :  { %v1546_v54 = vadd.f32 %v3190_v53, %v2867_v49 }
0x140e   :  { %v1537_v51 = vpop.f32.mrf.mxu1 }
0x140f   :  { %v1538_v50 = vadd.f32 %v3189_v45, %v1537_v51  ;;  %v1558_v62 = vsel %vm306_vm1, %v1546_v54, -inf }
0x1410   :  { %v2868_v52 = vpop.f32.mrf.mxu1 }
0x1411   :  { %v1552_v55 = vsel %vm306_vm1, %v1538_v50, -inf  ;;  %v1549_v37 = vadd.f32 %v3192_v59, %v2868_v52 }
0x1412   :  { %v1540_v56 = vpop.f32.mrf.mxu1  ;;  %1553 = vmax.xlane.f32.xlu0 %v1552_v55 }
0x1413   :  { %v1541_v58 = vadd.f32 %v3191_v57, %v1540_v56  ;;  %v1561_v38 = vsel %vm306_vm1, %v1549_v37, -inf }
0x1415   :  { %v1555_v60 = vsel %vm306_vm1, %v1541_v58, -inf }
0x1416   :  { %1556 = vmax.xlane.f32.xlu1 %v1555_v60  ;;  %1559 = vmax.xlane.f32.xlu0 %v1558_v62 }
0x141a   :  { %1562 = vmax.xlane.f32.xlu0 %v1561_v38 }
0x149b   :  { %v1554_v63 = vpop.xlane.xlu0 %1553 }
0x149c   :  { %v1564_v1 = vsub.f32 %v1538_v50, %v1554_v63 }
0x149e   :  { %v1568_v25 = vmul.f32 1.442695, %v1564_v1  ;;  %v3049_v1 = vld [vmem:[%s4188_s12 + $0x18] sm:$0xff]  }
0x149f   :  { %v1557_v2 = vpop.xlane.xlu1 %1556  ;;  %v1560_v5 = vpop.xlane.xlu0 %1559 }
0x14a0   :  { %v1566_v6 = vsub.f32 %v1546_v54, %v1560_v5  ;;  %v1565_v7 = vsub.f32 %v1541_v58, %v1557_v2  ;;  %v2627_v54 = vld [vmem:[#allocation5 + $0x1] ss:$0 sm:$0xff] }
0x14a2   :  { %v1572_v8 = vmul.f32 1.442695, %v1566_v6  ;;  %v1570_v11 = vmul.f32 1.442695, %v1565_v7 }
0x14a3   :  { %v1563_v9 = vpop.xlane.xlu0 %1562 }
0x14a4   :  { %v1567_v10 = vsub.f32 %v1549_v37, %v1563_v9  ;;  %3125 = vpow2.f32 %v1572_v8 }
0x14a5   :  { %3127 = vpow2.f32 %v1568_v25 }
0x14a6   :  { %v1574_v26 = vmul.f32 1.442695, %v1567_v10 }
0x14a8   :  { %3129 = vpow2.f32 %v1574_v26  ;;  %v3051_v26 = vld [vmem:[%s4186_s10 + $0x18] sm:$0xff]  }
0x14a9   :  { %3131 = vpow2.f32 %v1570_v11  ;;  %2886 = vmatpush3.bf16.msra.mxu1 %v3051_v26  ;;  %v3194_v26 = vld [vmem:[%s4224_s18 + $0x18] sm:$0xff] }
0x14aa   :  { %2887 = vmatprep.subr.bf16.mxu1 %v3533_v0 }
0x14b1   :  { %v3126_v12 = vpop.eup %3125 }
0x14b2   :  { %v1582_v13 = vsel %vm306_vm1, %v3126_v12, 0.0  ;;  %v3128_v14 = vpop.eup %3127 }
0x14b3   :  { %1583 = vadd.xlane.f32.xlu1 %v1582_v13  ;;  %v1576_v18 = vsel %vm306_vm1, %v3128_v14, 0.0 }
0x14b5   :  { %v3130_v15 = vpop.eup %3129 }
0x14b6   :  { %v1585_v16 = vsel %vm306_vm1, %v3130_v15, 0.0  ;;  %v3132_v17 = vpop.eup %3131 }
0x14b7   :  { %1586 = vadd.xlane.f32.xlu0 %v1585_v16  ;;  %1577 = vadd.xlane.f32.xlu1 %v1576_v18  ;;  %v1579_v19 = vsel %vm306_vm1, %v3132_v17, 0.0 }
0x14bb   :  { %1580 = vadd.xlane.f32.xlu0 %v1579_v19 }
0x14c8   :  { %1600 = vrot.lane.b32.xlu1 %v1484_v43, %s3522_s13 }
0x14d1   :  { %1598 = vrot.lane.b32.xlu0 %v3984_v39, %s3522_s13 }
0x153c   :  { %v1584_v20 = vpop.xlane.xlu1 %1583 }
0x1540   :  { %v1587_v21 = vpop.xlane.xlu0 %1586  ;;  %v1578_v22 = vpop.xlane.xlu1 %1577 }
0x1541   :  { %3133 = vrcp.f32 %v1587_v21 }
0x1542   :  { %3135 = vrcp.f32 %v1578_v22 }
0x1543   :  { %3137 = vrcp.f32 %v1584_v20 }
0x1544   :  { %v1581_v23 = vpop.xlane.xlu0 %1580  ;;  %v1601_v24 = vpop.permute.xlu1 %1600 }
0x1545   :  { %3139 = vrcp.f32 %v1581_v23  ;;  %2869 = vmatprep.subr.bf16.mxu0 %v1601_v24 }
0x1546   :  { %2870 = vmatpush3.bf16.msra.mxu0 %v1601_v24 }
0x1548   :  { %v1599_v30 = vpop.permute.xlu0 %1598 }
0x1549   :  { %2871 = vmatprep.subr.bf16.mxu0 %v1599_v30 }
0x154a   :  { %2872 = vmatpush3.bf16.msra.mxu0 %v1599_v30 }
0x154b   :  { %2877 = vmatprep.subr.bf16.mxu0 %v3533_v0 }
0x154e   :  { %v3134_v31 = vpop.eup %3133 }
0x154f   :  { %v3136_v32 = vpop.eup %3135  ;;  %v1595_v34 = vmul.f32 %v3134_v31, %v3130_v15 }
0x1550   :  { %v3138_v61 = vpop.eup %3137  ;;  %v1592_v35 = vmul.f32 %v3136_v32, %v3128_v14 }
0x1551   :  { %v1594_v3 = vmul.f32 %v3138_v61, %v3126_v12  ;;  %v2645_v12 = vld [vmem:[#allocation11 + $0x1] ss:$0 sm:$0xff] }
0x1552   :  { %v3140_v33 = vpop.eup %3139 }
0x1553   :  { %v1593_v36 = vmul.f32 %v3140_v33, %v3132_v17  ;;  %v1597_v4 = vpack.c.bf16 %v1595_v34, %v1594_v3 }
0x1555   :  { %v1596_v39 = vpack.c.bf16 %v1593_v36, %v1592_v35 }
0x1557   :  { %2873 = vmatprep.mubr.msk.bf16.mxu0 %vm306_vm1, %v1596_v39 }
0x1558   :  { %2874 = vmatmul.mubr.msk.bf16.vlgmr.msra.gmra.mxu0 %vm306_vm1, %v1597_v4 }
0x1559   :  { %2881 = vmatprep.mubr.msk.bf16.mxu0 %vm3534_vm0, %v3533_v0  ;;  %2878 = vmatpush3.bf16.msra.mxu0 %v3047_v41 }
0x155a   :  { %2879 = vmatprep.subr.bf16.mxu0 %v3533_v0 }
0x155d   :  { %2880 = vmatpush3.bf16.msra.mxu0 %v3048_v42 }
0x155e   :  { %2893 = vmatprep.subr.bf16.mxu0 %v3533_v0 }
0x1618   :  { %v2875_v43 = vpop.f32.mrf.mxu0 }
0x161a   :  { %v1644_v44 = vpop.f32.mrf.mxu0 }
0x161c   :  { %v2876_v46 = vpop.f32.mrf.mxu0 }
0x161d   :  { %v3009_v47 = vpack.i.bf16 %v2876_v46, %v2875_v43 }
0x161e   :  { %v1647_v45 = vpop.f32.mrf.mxu0 }
0x161f   :  { %3010 = vrot.lane.b32.xlu1 %v3009_v47, %s3517_s2 }
0x1691   :  { %v3011_v48 = vpop.permute.xlu1 %3010 }
0x1692   :  { %v3013_v49 = vunpack.i.h.bf16 %v3011_v48  ;;  %v3012_v51 = vunpack.i.l.bf16 %v3011_v48 }
0x1694   :  { %v1667_v50 = vsel %vm367_vm2, %v1644_v44, %v3012_v51  ;;  %v1668_v52 = vsel %vm367_vm2, %v1647_v45, %v3013_v49  ;;  %v2631_v44 = vld [vmem:[#allocation7 + $0x1] ss:$0 sm:$0xff]  ;;  %v2632_v49 = vld [vmem:[#allocation8 + $0x1] ss:$0 sm:$0xff] }
0x1695   :  { %v1669_v53 = vpack.c.bf16 %v1668_v52, %v1667_v50 }
0x1697   :  { %2882 = vmatmul.mubr.msk.bf16.vlgmr.msra.gmra.mxu0 %vm306_vm1, %v1669_v53 }
0x1698   :  { %2897 = vmatprep.mubr.msk.bf16.mxu0 %vm3534_vm0, %v3533_v0  ;;  %2894 = vmatpush3.bf16.msra.mxu0 %v3049_v1 }
0x1699   :  { %2895 = vmatprep.subr.bf16.mxu0 %v3533_v0 }
0x1757   :  { %v1732_v55 = vpop.f32.mrf.mxu0 }
0x1758   :  { %v1733_v56 = vadd.f32 %v2627_v54, %v1732_v55 }
0x1759   :  { %v2883_v57 = vpop.f32.mrf.mxu0 }
0x175a   :  { %v1739_v58 = vadd.f32 %v1733_v56, %v3977_v27  ;;  %v3050_v27 = vld [vmem:[%s4188_s12 + $0x10] sm:$0xff]  }
0x175b   :  { %v1735_v59 = vpop.f32.mrf.mxu0  ;;  %2896 = vmatpush3.bf16.msra.mxu0 %v3050_v27 }
0x175c   :  { %v1736_v37 = vadd.f32 %v2627_v54, %v1735_v59  ;;  %v1745_v60 = vsel %vm306_vm1, %v1739_v58, 0.0 }
0x175d   :  { %1746 = vadd.xlane.f32.xlu1 %v1745_v60  ;;  %v2884_v62 = vpop.f32.mrf.mxu0 }
0x175e   :  { %v1740_v38 = vadd.f32 %v1736_v37, %v3979_v29  ;;  %2898 = vmatmul.mubr.msk.bf16.vlgmr.msra.gmra.mxu0 %vm306_vm1, %v3847_v40  ;;  %v3052_v40 = vld [vmem:[%s4186_s10 + $0x10] sm:$0xff]   ;;  %v2637_v37 = vld [vmem:[#allocation10 + $0x1] ss:$0 sm:$0xff] }
0x175f   :  { %2888 = vmatpush3.bf16.msra.mxu1 %v3052_v40 }
0x1760   :  { %v1748_v63 = vsel %vm306_vm1, %v1740_v38, 0.0 }
0x1761   :  { %1749 = vadd.xlane.f32.xlu0 %v1748_v63 }
0x17e6   :  { %v1747_v2 = vpop.xlane.xlu1 %1746 }
0x17e7   :  { %v1751_v29 = vmul.f32 0.03125, %v1747_v2 }
0x17e9   :  { %v1753_v5 = vsub.f32 %v1739_v58, %v1751_v29 }
0x17ea   :  { %v1750_v6 = vpop.xlane.xlu0 %1749 }
0x17eb   :  { %v1752_v7 = vmul.f32 0.03125, %v1750_v6  ;;  %v1755_v8 = vmul.f32 %v1753_v5, %v1753_v5 }
0x17ed   :  { %v1754_v25 = vsub.f32 %v1740_v38, %v1752_v7  ;;  %v1757_v9 = vsel %vm306_vm1, %v1755_v8, 0.0 }
0x17ee   :  { %1758 = vadd.xlane.f32.xlu0 %v1757_v9  ;;  %v3193_v9 = vld [vmem:[%s4224_s18] sm:$0xff] }
0x17ef   :  { %v1756_v10 = vmul.f32 %v1754_v25, %v1754_v25 }
0x17f1   :  { %v1760_v11 = vsel %vm306_vm1, %v1756_v10, 0.0 }
0x17f2   :  { %1761 = vadd.xlane.f32.xlu1 %v1760_v11 }
0x181e   :  { %v1930_v13 = vpop.f32.mrf.mxu0 }
0x181f   :  { %v1931_v15 = vadd.f32 %v2645_v12, %v1930_v13 }
0x1820   :  { %v2899_v14 = vpop.f32.mrf.mxu0 }
0x1821   :  { %v3195_v14 = vld [vmem:[%s4224_s18 + $0x8] sm:$0xff] }
0x1822   :  { %v1933_v16 = vpop.f32.mrf.mxu0 }
0x1823   :  { %v1934_v17 = vadd.f32 %v2645_v12, %v1933_v16  ;;  %v3196_v16 = vld [vmem:[%s4224_s18 + $0x10] sm:$0xff] }
0x1824   :  { %v2900_v18 = vpop.f32.mrf.mxu0 }
0x1825   :  { %v3014_v19 = vpack.i.bf16 %v1934_v17, %v1931_v15  ;;  %v4064_v20 = vpack.c.bf16 %v1934_v17, %v1931_v15 }
0x1827   :  { %3015 = vrot.lane.b32.xlu0 %v3014_v19, %s3535_s4  ;;  %v1964_v58 = vsel %vm367_vm2, %v4064_v20, 0 }
0x1877   :  { %v1759_v21 = vpop.xlane.xlu0 %1758 }
0x1878   :  { %v1763_v22 = vmul.f32 0.032258064, %v1759_v21 }
0x187a   :  { %3141 = vrsqrt.f32 %v1763_v22  ;;  %vm1767_vm5 = vcmp.eq.f32.partialorder %v1763_v22, inf  ;;  %v1770_v32 = vand.u32 2147483648, %v1763_v22  ;;  %vm1769_vm6 = vcmp.eq.f32.partialorder %v1763_v22, 0.0 }
0x187b   :  { %v1762_v23 = vpop.xlane.xlu1 %1761 }
0x187c   :  { %v1764_v24 = vmul.f32 0.032258064, %v1762_v23 }
0x187e   :  { %3143 = vrsqrt.f32 %v1764_v24  ;;  %vm1774_vm7 = vcmp.eq.f32.partialorder %v1764_v24, inf  ;;  %v1777_v3 = vand.u32 2147483648, %v1764_v24  ;;  %vm1776_vm8 = vcmp.eq.f32.partialorder %v1764_v24, 0.0 }
0x1887   :  { %v3142_v30 = vpop.eup %3141 }
0x1888   :  { %v1766_v31 = vmul.f32 %v3142_v30, %v1763_v22 }
0x188a   :  { %v1768_v61 = vsel %vm1767_vm5, %v1763_v22, %v1766_v31 }
0x188b   :  { %v3144_v33 = vpop.eup %3143  ;;  %v1771_v34 = vsel %vm1769_vm6, %v1770_v32, %v1768_v61 }
0x188c   :  { %v1779_v35 = vadd.f32 1e-06, %v1771_v34  ;;  %v1773_v36 = vmul.f32 %v3144_v33, %v1764_v24 }
0x188e   :  { %3145 = vrcp.f32 %v1779_v35  ;;  %v1775_v39 = vsel %vm1774_vm7, %v1764_v24, %v1773_v36 }
0x188f   :  { %v1778_v4 = vsel %vm1776_vm8, %v1777_v3, %v1775_v39 }
0x1890   :  { %v1780_v41 = vadd.f32 1e-06, %v1778_v4 }
0x1892   :  { %3147 = vrcp.f32 %v1780_v41 }
0x1899   :  { %v3016_v53 = vpop.permute.xlu0 %3015 }
0x189a   :  { %v3018_v54 = vunpack.i.h.bf16 %v3016_v53  ;;  %v3017_v55 = vunpack.i.l.bf16 %v3016_v53 }
0x189b   :  { %v3146_v42 = vpop.eup %3145 }
0x189c   :  { %v1783_v43 = vmul.f32 %v3146_v42, %v1753_v5  ;;  %v4074_v56 = vpack.c.bf16 %v3018_v54, %v3017_v55 }
0x189e   :  { %v1791_v48 = vmul.f32 %v2631_v44, %v1783_v43  ;;  %2951 = vmatprep.subr.msk.bf16.mxu1 %vm367_vm2, %v4074_v56  ;;  %v1967_v57 = vsel %vm367_vm2, %v4074_v56, 0 }
0x189f   :  { %v3148_v46 = vpop.eup %3147 }
0x18a0   :  { %v1784_v47 = vmul.f32 %v3148_v46, %v1754_v25  ;;  %v4067_v45 = vadd.f32 %v2632_v49, %v1791_v48 }
0x18a2   :  { %v1792_v51 = vmul.f32 %v2631_v44, %v1784_v47 }
0x18a4   :  { %v4069_v50 = vadd.f32 %v2632_v49, %v1792_v51 }
0x18a6   :  { %v1801_v52 = vpack.c.bf16 %v4069_v50, %v4067_v45 }
0x18a8   :  { %2890 = vmatmul.mubr.msk.bf16.vlgmr.msra.gmra.mxu1 %vm306_vm1, %v1801_v52 }
0x18a9   :  { %2902 = vmatpush3.bf16.xpose.msra.mxu1 %v1967_v57 }
0x18aa   :  { %2952 = vmatprep.subr.msk.bf16.mxu1 %vm367_vm2, %v4064_v20 }
0x18b1   :  { %2904 = vmatpush3.bf16.xpose.msra.mxu1 %v1964_v58 }
0x18b2   :  { %2925 = vmatprep.subr.bf16.mxu1 %v3533_v0 }
0x1968   :  { %v1864_v59 = vpop.f32.mrf.mxu1 }
0x1969   :  { %v1865_v38 = vadd.f32 %v2637_v37, %v1864_v59 }
0x196a   :  { %v2891_v60 = vpop.f32.mrf.mxu1 }
0x196c   :  { %v1867_v62 = vpop.f32.mrf.mxu1 }
0x196d   :  { %v1868_v63 = vadd.f32 %v2637_v37, %v1867_v62 }
0x196e   :  { %v2892_v1 = vpop.f32.mrf.mxu1 }
0x196f   :  { %v3019_v27 = vpack.i.bf16 %v1868_v63, %v1865_v38  ;;  %v1953_v2 = vpack.c.bf16 %v1868_v63, %v1865_v38  ;;  %v3053_v63 = vld [vmem:[%s4190_s14 + $0x18] sm:$0xff]   ;;  %v3054_v1 = vld [vmem:[%s4190_s14 + $0x10] sm:$0xff]  }
0x1971   :  { %3020 = vrot.lane.b32.xlu1 %v3019_v27, %s3535_s4  ;;  %2905 = vmatprep.mubr.msk.bf16.mxu1 %vm367_vm2, %v1953_v2 }
0x19e3   :  { %v3021_v29 = vpop.permute.xlu1 %3020 }
0x19e4   :  { %v3023_v5 = vunpack.i.h.bf16 %v3021_v29  ;;  %v3022_v6 = vunpack.i.l.bf16 %v3021_v29 }
0x19e6   :  { %v1954_v7 = vpack.c.bf16 %v3023_v5, %v3022_v6 }
0x19e8   :  { %2906 = vmatmul.mubr.msk.bf16.vlgmr.msra.gmra.mxu1 %vm367_vm2, %v1954_v7 }
0x19e9   :  { %2929 = vmatprep.mubr.msk.bf16.mxu1 %vm3534_vm0, %v3533_v0 }
0x1aa8   :  { %v2907_v8 = vpop.f32.mrf.mxu1 }
0x1aa9   :  { %v2012_v17 = vadd.f32 %v3196_v16, %v2907_v8 }
0x1aaa   :  { %v2003_v25 = vpop.f32.mrf.mxu1 }
0x1aab   :  { %v2004_v10 = vadd.f32 %v3193_v9, %v2003_v25  ;;  %v2024_v21 = vsel %vm306_vm1, %v2012_v17, -inf }
0x1aac   :  { %v2908_v11 = vpop.f32.mrf.mxu1 }
0x1aad   :  { %v2015_v40 = vadd.f32 %v3194_v26, %v2908_v11  ;;  %v2018_v12 = vsel %vm306_vm1, %v2004_v10, -inf  ;;  %v2657_v26 = vld [vmem:[#allocation13 + $0x1] ss:$0 sm:$0xff] }
0x1aae   :  { %v2006_v13 = vpop.f32.mrf.mxu1  ;;  %2019 = vmax.xlane.f32.xlu1 %v2018_v12 }
0x1aaf   :  { %v2007_v15 = vadd.f32 %v3195_v14, %v2006_v13  ;;  %v2027_v19 = vsel %vm306_vm1, %v2015_v40, -inf }
0x1ab1   :  { %v2021_v18 = vsel %vm306_vm1, %v2007_v15, -inf }
0x1ab2   :  { %2022 = vmax.xlane.f32.xlu0 %v2021_v18  ;;  %2028 = vmax.xlane.f32.xlu1 %v2027_v19 }
0x1ab6   :  { %2025 = vmax.xlane.f32.xlu0 %v2024_v21 }
0x1b37   :  { %v2020_v22 = vpop.xlane.xlu1 %2019 }
0x1b38   :  { %v2030_v32 = vsub.f32 %v2004_v10, %v2020_v22 }
0x1b3a   :  { %v2034_v36 = vmul.f32 1.442695, %v2030_v32 }
0x1b3b   :  { %v2023_v23 = vpop.xlane.xlu0 %2022  ;;  %v2029_v24 = vpop.xlane.xlu1 %2028 }
0x1b3c   :  { %v2031_v30 = vsub.f32 %v2007_v15, %v2023_v23  ;;  %v2033_v31 = vsub.f32 %v2015_v40, %v2029_v24 }
0x1b3e   :  { %v2040_v61 = vmul.f32 1.442695, %v2033_v31  ;;  %v2036_v33 = vmul.f32 1.442695, %v2031_v30 }
0x1b3f   :  { %v2026_v34 = vpop.xlane.xlu0 %2025 }
0x1b40   :  { %v2032_v35 = vsub.f32 %v2012_v17, %v2026_v34  ;;  %3149 = vpow2.f32 %v2040_v61 }
0x1b41   :  { %3151 = vpow2.f32 %v2036_v33 }
0x1b42   :  { %v2038_v3 = vmul.f32 1.442695, %v2032_v35  ;;  %v3055_v35 = vld [vmem:[#allocation17 + $0x18] sm:$0xff]  }
0x1b43   :  { %2926 = vmatpush3.bf16.msra.mxu1 %v3055_v35 }
0x1b44   :  { %3153 = vpow2.f32 %v2038_v3  ;;  %2927 = vmatprep.subr.bf16.mxu1 %v3533_v0 }
0x1b45   :  { %3155 = vpow2.f32 %v2034_v36 }
0x1b4d   :  { %v3150_v39 = vpop.eup %3149 }
0x1b4e   :  { %v2051_v4 = vsel %vm306_vm1, %v3150_v39, 0.0  ;;  %v3152_v41 = vpop.eup %3151 }
0x1b4f   :  { %2052 = vadd.xlane.f32.xlu1 %v2051_v4  ;;  %v2045_v46 = vsel %vm306_vm1, %v3152_v41, 0.0 }
0x1b51   :  { %v3154_v42 = vpop.eup %3153 }
0x1b52   :  { %v2048_v43 = vsel %vm306_vm1, %v3154_v42, 0.0  ;;  %v3156_v44 = vpop.eup %3155 }
0x1b53   :  { %2049 = vadd.xlane.f32.xlu0 %v2048_v43  ;;  %2046 = vadd.xlane.f32.xlu1 %v2045_v46  ;;  %v2042_v47 = vsel %vm306_vm1, %v3156_v44, 0.0 }
0x1b57   :  { %2043 = vadd.xlane.f32.xlu0 %v2042_v47 }
0x1b64   :  { %2066 = vrot.lane.b32.xlu1 %v4064_v20, %s3536_s1 }
0x1b6d   :  { %2068 = vrot.lane.b32.xlu0 %v4074_v56, %s3536_s1 }
0x1bd8   :  { %v2053_v48 = vpop.xlane.xlu1 %2052 }
0x1bdc   :  { %v2050_v49 = vpop.xlane.xlu0 %2049  ;;  %v2047_v51 = vpop.xlane.xlu1 %2046 }
0x1bdd   :  { %3157 = vrcp.f32 %v2050_v49 }
0x1bde   :  { %3159 = vrcp.f32 %v2047_v51 }
0x1bdf   :  { %3161 = vrcp.f32 %v2053_v48 }
0x1be0   :  { %v2044_v52 = vpop.xlane.xlu0 %2043  ;;  %v2067_v54 = vpop.permute.xlu1 %2066 }
0x1be1   :  { %3163 = vrcp.f32 %v2044_v52 }
0x1be4   :  { %v2069_v53 = vpop.permute.xlu0 %2068 }
0x1be5   :  { %2909 = vmatprep.subr.bf16.mxu0 %v2069_v53 }
0x1be6   :  { %2910 = vmatpush3.bf16.msra.mxu0 %v2069_v53 }
0x1be7   :  { %2911 = vmatprep.subr.bf16.mxu0 %v2067_v54 }
0x1bea   :  { %2912 = vmatpush3.bf16.msra.mxu0 %v2067_v54  ;;  %v3158_v55 = vpop.eup %3157 }
0x1beb   :  { %2917 = vmatprep.subr.bf16.mxu0 %v3533_v0  ;;  %v3160_v20 = vpop.eup %3159  ;;  %v2060_v58 = vmul.f32 %v3158_v55, %v3154_v42 }
0x1bec   :  { %v3162_v57 = vpop.eup %3161  ;;  %v2059_v37 = vmul.f32 %v3160_v20, %v3152_v41 }
0x1bed   :  { %v2061_v60 = vmul.f32 %v3162_v57, %v3150_v39  ;;  %v2661_v57 = vld [vmem:[#allocation14 + $0x1] ss:$0 sm:$0xff] }
0x1bee   :  { %v3164_v56 = vpop.eup %3163 }
0x1bef   :  { %v2058_v59 = vmul.f32 %v3164_v56, %v3156_v44  ;;  %v2063_v38 = vpack.c.bf16 %v2061_v60, %v2060_v58 }
0x1bf1   :  { %v2062_v62 = vpack.c.bf16 %v2059_v37, %v2058_v59  ;;  %v2662_v37 = vld [vmem:[#allocation16 + $0x1] ss:$0 sm:$0xff] }
0x1bf3   :  { %2913 = vmatprep.mubr.msk.bf16.mxu0 %vm306_vm1, %v2062_v62 }
0x1bf4   :  { %2914 = vmatmul.mubr.msk.bf16.vlgmr.msra.gmra.mxu0 %vm306_vm1, %v2063_v38 }
0x1bf5   :  { %2921 = vmatprep.mubr.msk.bf16.mxu0 %vm3534_vm0, %v3533_v0  ;;  %2918 = vmatpush3.bf16.msra.mxu0 %v3053_v63 }
0x1bf6   :  { %2919 = vmatprep.subr.bf16.mxu0 %v3533_v0 }
0x1bf9   :  { %2920 = vmatpush3.bf16.msra.mxu0 %v3054_v1  ;;  %v3057_v1 = vld [vmem:[%s4196_s20 + $0x38] sm:$0xff]  }
0x1bfa   :  { %2933 = vmatprep.subr.bf16.mxu0 %v3533_v0 }
0x1cb4   :  { %v2915_v27 = vpop.f32.mrf.mxu0 }
0x1cb6   :  { %v2112_v2 = vpop.f32.mrf.mxu0 }
0x1cb8   :  { %v2916_v29 = vpop.f32.mrf.mxu0 }
0x1cb9   :  { %v3024_v5 = vpack.i.bf16 %v2916_v29, %v2915_v27  ;;  %v3058_v27 = vld [vmem:[%s4196_s20 + $0x30] sm:$0xff]   ;;  %v3060_v29 = vld [vmem:[%s4196_s20 + $0x20] sm:$0xff]  }
0x1cba   :  { %v2115_v25 = vpop.f32.mrf.mxu0 }
0x1cbb   :  { %3025 = vrot.lane.b32.xlu1 %v3024_v5, %s3517_s2  ;;  %v2663_v5 = vld [vmem:[#allocation19 + $0x1] ss:$0 sm:$0xff] }
0x1d2d   :  { %v3026_v6 = vpop.permute.xlu1 %3025 }
0x1d2e   :  { %v3028_v7 = vunpack.i.h.bf16 %v3026_v6  ;;  %v3027_v8 = vunpack.i.l.bf16 %v3026_v6 }
0x1d30   :  { %v2135_v9 = vsel %vm367_vm2, %v2112_v2, %v3027_v8  ;;  %v2136_v10 = vsel %vm367_vm2, %v2115_v25, %v3028_v7  ;;  %v3059_v2 = vld [vmem:[%s4196_s20 + $0x28] sm:$0xff]   ;;  %s3538_s20 = smov [#allocation25]  }
0x1d31   :  { %v2137_v11 = vpack.c.bf16 %v2136_v10, %v2135_v9  ;;  %s2548_s27 = sshll.u32 %s3538_s20, 4  ;;  %s2549_s27 = int_to_ptr.vmem [resolvable:$true] %s2548_s27 }
0x1d32   :  { %s3477_s28 = scalar_lea.vmem %s2549_s27, 256  ;;  %p3482_p1 = scmp.lt.s32.totalorder %s2549_s27, %s2549_s27 }
0x1d33   :  { %2922 = vmatmul.mubr.msk.bf16.vlgmr.msra.gmra.mxu0 %vm306_vm1, %v2137_v11  ;;  %p3478_p0 = scmp.ne.s32.totalorder %s2549_s27, %s3477_s28  ;;  %p3483_p2 = scmp.lt.s32.totalorder %s3477_s28, %s3477_s28 }
0x1d34   :  { %2941 = vmatprep.mubr.msk.bf16.mxu0 %vm3534_vm0, %v3533_v0  ;;  %2934 = vmatpush3.bf16.msra.mxu0 %v3057_v1 }
0x1d35   :  { %2935 = vmatprep.subr.bf16.mxu0 %v3533_v0  ;;  %p3484_p3 = por %p3483_p2, %p3482_p1 }
0x1d37   :  { %p3485_p4 = pnand %p3484_p3, %p3478_p0 }
0x1d38   :  { %2936 = vmatpush3.bf16.msra.mxu0 %v3058_v27  ;;  %v2675_v27 = vld [vmem:[#allocation20 + $0x1] ss:$0 sm:$0xff] }
0x1d39   :  { %2937 = vmatprep.subr.bf16.mxu0 %v3533_v0 }
0x1d3c   :  { %2938 = vmatpush3.bf16.msra.mxu0 %v3059_v2 }
0x1d3d   :  { %2939 = vmatprep.subr.bf16.mxu0 %v3533_v0 }
0x1d40   :  { %2940 = vmatpush3.bf16.msra.mxu0 %v3060_v29 }
0x1df3   :  { %v2200_v40 = vpop.f32.mrf.mxu0 }
0x1df4   :  { %v2201_v12 = vadd.f32 %v2657_v26, %v2200_v40 }
0x1df5   :  { %v2923_v13 = vpop.f32.mrf.mxu0 }
0x1df6   :  { %v2207_v14 = vadd.f32 %v2201_v12, %v4067_v45 }
0x1df7   :  { %v2203_v15 = vpop.f32.mrf.mxu0 }
0x1df8   :  { %v2204_v16 = vadd.f32 %v2657_v26, %v2203_v15  ;;  %v2213_v17 = vsel %vm306_vm1, %v2207_v14, 0.0 }
0x1df9   :  { %2214 = vadd.xlane.f32.xlu0 %v2213_v17  ;;  %v2924_v18 = vpop.f32.mrf.mxu0 }
0x1dfa   :  { %v2208_v19 = vadd.f32 %v2204_v16, %v4069_v50  ;;  %v3056_v50 = vld [vmem:[#allocation17 + $0x10] sm:$0xff]  }
0x1dfb   :  { %2928 = vmatpush3.bf16.msra.mxu1 %v3056_v50 }
0x1dfc   :  { %v2216_v21 = vsel %vm306_vm1, %v2208_v19, 0.0 }
0x1dfd   :  { %2217 = vadd.xlane.f32.xlu1 %v2216_v21 }
0x1e82   :  { %v2215_v22 = vpop.xlane.xlu0 %2214 }
0x1e83   :  { %v2219_v23 = vmul.f32 0.03125, %v2215_v22 }
0x1e85   :  { %v2221_v24 = vsub.f32 %v2207_v14, %v2219_v23 }
0x1e86   :  { %v2218_v30 = vpop.xlane.xlu1 %2217 }
0x1e87   :  { %v2220_v31 = vmul.f32 0.03125, %v2218_v30  ;;  %v2223_v32 = vmul.f32 %v2221_v24, %v2221_v24 }
0x1e89   :  { %v2222_v61 = vsub.f32 %v2208_v19, %v2220_v31  ;;  %v2225_v45 = vsel %vm306_vm1, %v2223_v32, 0.0 }
0x1e8a   :  { %2226 = vadd.xlane.f32.xlu0 %v2225_v45 }
0x1e8b   :  { %v2224_v33 = vmul.f32 %v2222_v61, %v2222_v61 }
0x1e8d   :  { %v2228_v34 = vsel %vm306_vm1, %v2224_v33, 0.0 }
0x1e8e   :  { %2229 = vadd.xlane.f32.xlu0 %v2228_v34 }
0x1f13   :  { %v2227_v36 = vpop.xlane.xlu0 %2226 }
0x1f14   :  { %v2231_v3 = vmul.f32 0.032258064, %v2227_v36 }
0x1f16   :  { %3165 = vrsqrt.f32 %v2231_v3  ;;  %vm2235_vm0 = vcmp.eq.f32.partialorder %v2231_v3, inf  ;;  %v2238_v43 = vand.u32 2147483648, %v2231_v3  ;;  %vm2237_vm2 = vcmp.eq.f32.partialorder %v2231_v3, 0.0 }
0x1f17   :  { %v2230_v39 = vpop.xlane.xlu0 %2229 }
0x1f18   :  { %v2232_v4 = vmul.f32 0.032258064, %v2230_v39 }
0x1f1a   :  { %3167 = vrsqrt.f32 %v2232_v4  ;;  %vm2242_vm9 = vcmp.eq.f32.partialorder %v2232_v4, inf  ;;  %v2245_v51 = vand.u32 2147483648, %v2232_v4  ;;  %vm2244_vm10 = vcmp.eq.f32.partialorder %v2232_v4, 0.0 }
0x1f23   :  { %v3166_v41 = vpop.eup %3165 }
0x1f24   :  { %v2234_v42 = vmul.f32 %v3166_v41, %v2231_v3 }
0x1f26   :  { %v2236_v44 = vsel %vm2235_vm0, %v2231_v3, %v2234_v42 }
0x1f27   :  { %v3168_v46 = vpop.eup %3167  ;;  %v2239_v47 = vsel %vm2237_vm2, %v2238_v43, %v2236_v44 }
0x1f28   :  { %v2247_v48 = vadd.f32 1e-06, %v2239_v47  ;;  %v2241_v49 = vmul.f32 %v3168_v46, %v2232_v4 }
0x1f2a   :  { %3169 = vrcp.f32 %v2247_v48  ;;  %v2243_v52 = vsel %vm2242_vm9, %v2232_v4, %v2241_v49 }
0x1f2b   :  { %v2246_v53 = vsel %vm2244_vm10, %v2245_v51, %v2243_v52 }
0x1f2c   :  { %v2248_v54 = vadd.f32 1e-06, %v2246_v53 }
0x1f2e   :  { %3171 = vrcp.f32 %v2248_v54 }
0x1f37   :  { %v3170_v55 = vpop.eup %3169 }
0x1f38   :  { %v2251_v20 = vmul.f32 %v3170_v55, %v2221_v24 }
0x1f3a   :  { %v2259_v59 = vmul.f32 %v2661_v57, %v2251_v20 }
0x1f3b   :  { %v3172_v56 = vpop.eup %3171 }
0x1f3c   :  { %v2252_v58 = vmul.f32 %v3172_v56, %v2222_v61  ;;  %v4140_v62 = vadd.f32 %v2662_v37, %v2259_v59 }
0x1f3e   :  { %v2260_v60 = vmul.f32 %v2661_v57, %v2252_v58 }
0x1f40   :  { %v4142_v38 = vadd.f32 %v2662_v37, %v2260_v60 }
0x1f42   :  { %v2269_v63 = vpack.c.bf16 %v4142_v38, %v4140_v62 }
0x1f44   :  { %2930 = vmatmul.mubr.msk.bf16.vlgmr.msra.gmra.mxu1 %vm306_vm1, %v2269_v63 }
0x2004   :  { %v2332_v6 = vpop.f32.mrf.mxu1 }
0x2005   :  { %v2333_v7 = vadd.f32 %v2663_v5, %v2332_v6 }
0x2006   :  { %v2931_v8 = vpop.f32.mrf.mxu1 }
0x2007   :  { %v2341_v25 = vmul.f32 0.70710677, %v2333_v7  ;;  %v2339_v58 = vmul.f32 0.5, %v2333_v7 }
0x2008   :  { %v2335_v9 = vpop.f32.mrf.mxu1 }
0x2009   :  { %v2347_v10 = vand.u32 2147483647, %v2341_v25  ;;  %v2336_v11 = vadd.f32 %v2663_v5, %v2335_v9  ;;  %vm2343_vm11 = vcmp.ge.f32.partialorder %v2341_v25, 0.0 }
0x200a   :  { %v2932_v26 = vpop.f32.mrf.mxu1  ;;  %v2345_v52 = vsel %vm2343_vm11, 1.0, %v3537_v28 }
0x200b   :  { %v2349_v40 = vmul.f32 0.3275911, %v2347_v10  ;;  %v2342_v12 = vmul.f32 0.70710677, %v2336_v11  ;;  %v2375_v16 = vsub.f32 0.0, %v2347_v10  ;;  %v2340_v59 = vmul.f32 0.5, %v2336_v11 }
0x200d   :  { %v2351_v13 = vadd.f32 1.0, %v2349_v40  ;;  %v2348_v14 = vand.u32 2147483647, %v2342_v12  ;;  %v2377_v17 = vmul.f32 %v2375_v16, %v2347_v10  ;;  %vm2344_vm12 = vcmp.ge.f32.partialorder %v2342_v12, 0.0 }
0x200e   :  { %v2346_v20 = vsel %vm2344_vm12, 1.0, %v3537_v28 }
0x200f   :  { %3173 = vrcp.f32 %v2351_v13  ;;  %v2350_v0 = vmul.f32 0.3275911, %v2348_v14  ;;  %v2376_v18 = vsub.f32 0.0, %v2348_v14  ;;  %v2379_v22 = vmul.f32 1.442695, %v2377_v17 }
0x2011   :  { %v2352_v15 = vadd.f32 1.0, %v2350_v0  ;;  %v2378_v23 = vmul.f32 %v2376_v18, %v2348_v14 }
0x2013   :  { %3175 = vrcp.f32 %v2352_v15  ;;  %v2381_v61 = vmul.f32 1.442695, %v2378_v23 }
0x2014   :  { %3177 = vpow2.f32 %v2379_v22 }
0x2015   :  { %3179 = vpow2.f32 %v2381_v61 }
0x201c   :  { %v3174_v19 = vpop.eup %3173 }
0x201d   :  { %v2357_v21 = vmul.f32 1.0614054, %v3174_v19 }
0x201f   :  { %v2359_v24 = vadd.f32 -1.4531521, %v2357_v21 }
0x2020   :  { %v3176_v30 = vpop.eup %3175 }
0x2021   :  { %v2361_v31 = vmul.f32 %v3174_v19, %v2359_v24  ;;  %v2358_v32 = vmul.f32 1.0614054, %v3176_v30  ;;  %v3178_v44 = vpop.eup %3177 }
0x2022   :  { %v3180_v51 = vpop.eup %3179 }
0x2023   :  { %v2363_v45 = vadd.f32 1.4214138, %v2361_v31  ;;  %v2360_v33 = vadd.f32 -1.4531521, %v2358_v32 }
0x2025   :  { %v2365_v34 = vmul.f32 %v3174_v19, %v2363_v45  ;;  %v2362_v35 = vmul.f32 %v3176_v30, %v2360_v33 }
0x2027   :  { %v2367_v50 = vadd.f32 -0.28449672, %v2365_v34  ;;  %v2364_v36 = vadd.f32 1.4214138, %v2362_v35 }
0x2029   :  { %v2369_v3 = vmul.f32 %v3174_v19, %v2367_v50  ;;  %v2366_v39 = vmul.f32 %v3176_v30, %v2364_v36  ;;  %v2681_v36 = vld [vmem:[#allocation22 + $0x1] ss:$0 sm:$0xff] }
0x202b   :  { %v2371_v4 = vadd.f32 0.2548296, %v2369_v3  ;;  %v2368_v41 = vadd.f32 -0.28449672, %v2366_v39  ;;  %v2682_v39 = vld [vmem:[#allocation23 + $0x1] ss:$0 sm:$0xff] }
0x202d   :  { %v2373_v42 = vmul.f32 %v3174_v19, %v2371_v4  ;;  %v2370_v43 = vmul.f32 %v3176_v30, %v2368_v41 }
0x202f   :  { %v2383_v46 = vmul.f32 %v3178_v44, %v2373_v42  ;;  %v2372_v47 = vadd.f32 0.2548296, %v2370_v43 }
0x2031   :  { %v2385_v48 = vsub.f32 1.0, %v2383_v46  ;;  %v2374_v49 = vmul.f32 %v3176_v30, %v2372_v47 }
0x2033   :  { %v2387_v53 = vmul.f32 %v2385_v48, %v2345_v52  ;;  %v2384_v54 = vmul.f32 %v3180_v51, %v2374_v49 }
0x2035   :  { %v2386_v55 = vsub.f32 1.0, %v2384_v54  ;;  %v2389_v57 = vadd.f32 1.0, %v2387_v53 }
0x2037   :  { %v2388_v56 = vmul.f32 %v2386_v55, %v2346_v20  ;;  %v2391_v60 = vmul.f32 %v2389_v57, %v2339_v58 }
0x2039   :  { %v2390_v37 = vadd.f32 1.0, %v2388_v56 }
0x203b   :  { %v2392_v63 = vmul.f32 %v2390_v37, %v2340_v59 }
0x203d   :  { %v2393_v1 = vpack.c.bf16 %v2392_v63, %v2391_v60 }
0x203f   :  { %2942 = vmatmul.mubr.msk.bf16.vlgmr.msra.gmra.mxu0 %vm1300_vm13, %v2393_v1 }
0x20ff   :  { %v2472_v2 = vpop.f32.mrf.mxu0 }
0x2100   :  { %v2473_v29 = vadd.f32 %v2675_v27, %v2472_v2 }
0x2101   :  { %v2943_v5 = vpop.f32.mrf.mxu0 }
0x2102   :  { %v2479_v6 = vadd.f32 %v2473_v29, %v4140_v62 }
0x2103   :  { %v2475_v8 = vpop.f32.mrf.mxu0 }
0x2104   :  { %v2476_v25 = vadd.f32 %v2675_v27, %v2475_v8  ;;  %v2485_v28 = vsel %vm306_vm1, %v2479_v6, 0.0 }
0x2105   :  { %2486 = vadd.xlane.f32.xlu1 %v2485_v28  ;;  %v2944_v9 = vpop.f32.mrf.mxu0 }
0x2106   :  { %v2480_v7 = vadd.f32 %v2476_v25, %v4142_v38 }
0x2108   :  { %v2488_v10 = vsel %vm306_vm1, %v2480_v7, 0.0 }
0x2109   :  { %2489 = vadd.xlane.f32.xlu0 %v2488_v10 }
0x218e   :  { %v2487_v11 = vpop.xlane.xlu1 %2486 }
0x218f   :  { %v2491_v26 = vmul.f32 0.03125, %v2487_v11 }
0x2191   :  { %v2493_v40 = vsub.f32 %v2479_v6, %v2491_v26 }
0x2192   :  { %v2490_v12 = vpop.xlane.xlu0 %2489 }
0x2193   :  { %v2492_v13 = vmul.f32 0.03125, %v2490_v12  ;;  %v2495_v14 = vmul.f32 %v2493_v40, %v2493_v40 }
0x2195   :  { %v2494_v0 = vsub.f32 %v2480_v7, %v2492_v13  ;;  %v2497_v62 = vsel %vm306_vm1, %v2495_v14, 0.0 }
0x2196   :  { %2498 = vadd.xlane.f32.xlu1 %v2497_v62 }
0x2197   :  { %v2496_v15 = vmul.f32 %v2494_v0, %v2494_v0 }
0x2199   :  { %v2500_v16 = vsel %vm306_vm1, %v2496_v15, 0.0 }
0x219a   :  { %2501 = vadd.xlane.f32.xlu0 %v2500_v16 }
0x221f   :  { %v2499_v17 = vpop.xlane.xlu1 %2498 }
0x2220   :  { %v2503_v18 = vmul.f32 0.032258064, %v2499_v17 }
0x2222   :  { %3181 = vrsqrt.f32 %v2503_v18  ;;  %vm2507_vm13 = vcmp.eq.f32.partialorder %v2503_v18, inf  ;;  %v2510_v23 = vand.u32 2147483648, %v2503_v18  ;;  %vm2509_vm14 = vcmp.eq.f32.partialorder %v2503_v18, 0.0 }
0x2223   :  { %v2502_v38 = vpop.xlane.xlu0 %2501 }
0x2224   :  { %v2504_v19 = vmul.f32 0.032258064, %v2502_v38 }
0x2226   :  { %3183 = vrsqrt.f32 %v2504_v19  ;;  %vm2514_vm15 = vcmp.eq.f32.partialorder %v2504_v19, inf  ;;  %v2517_v45 = vand.u32 2147483648, %v2504_v19  ;;  %vm2516_vm3 = vcmp.eq.f32.partialorder %v2504_v19, 0.0 }
0x222f   :  { %v3182_v21 = vpop.eup %3181 }
0x2230   :  { %v2506_v22 = vmul.f32 %v3182_v21, %v2503_v18 }
0x2232   :  { %v2508_v24 = vsel %vm2507_vm13, %v2503_v18, %v2506_v22 }
0x2233   :  { %v3184_v30 = vpop.eup %3183  ;;  %v2511_v31 = vsel %vm2509_vm14, %v2510_v23, %v2508_v24 }
0x2234   :  { %v2519_v32 = vadd.f32 1e-06, %v2511_v31  ;;  %v2513_v61 = vmul.f32 %v3184_v30, %v2504_v19 }
0x2236   :  { %3185 = vrcp.f32 %v2519_v32  ;;  %v2515_v33 = vsel %vm2514_vm15, %v2504_v19, %v2513_v61 }
0x2237   :  { %v2518_v34 = vsel %vm2516_vm3, %v2517_v45, %v2515_v33 }
0x2238   :  { %v2520_v35 = vadd.f32 1e-06, %v2518_v34 }
0x223a   :  { %3187 = vrcp.f32 %v2520_v35 }
0x2243   :  { %v3186_v50 = vpop.eup %3185 }
0x2244   :  { %v2523_v3 = vmul.f32 %v3186_v50, %v2493_v40 }
0x2246   :  { %v2531_v4 = vmul.f32 %v2681_v36, %v2523_v3 }
0x2247   :  { %v3188_v41 = vpop.eup %3187 }
0x2248   :  { %v2524_v42 = vmul.f32 %v3188_v41, %v2494_v0  ;;  %v2539_v43 = vadd.f32 %v2682_v39, %v2531_v4 }
0x224a   :  { %v2532_v44 = vmul.f32 %v2681_v36, %v2524_v42  ;;  %2541 = vst.msk [vmem:[#allocation25] sm:$0xff] %vm306_vm1, %v2539_v43 }
0x224c   :  { %v2540_v46 = vadd.f32 %v2682_v39, %v2532_v44 }
0x224e   :  { %2542 = vst.msk [vmem:[#allocation25 + $0x8] sm:$0xff] %vm306_vm1, %v2540_v46 }
0x224f   :  { %3488 = shalt.err (!%p3485_p4)
}
0x2250   :  { %s3539_s17 = smov 128   ;;  %s3540_s26 = smov 8  }
0x2251   :  { %2554 = dma.vmem_to_hbm [thread:$0]  %s2549_s27, 256, %s4200_s24, [#allocation4], %s3539_s17, %s3539_s17, %s3540_s26  }
0x2252   :  { %3513 = dma.done.wait [#allocation4], 256  }
0x2253   :  { %3514 = vsyncadd [#allocation4], 4294967040 }
0x2254   :  { %2558 = vsyncpa [#allocation3], 1 }
0x2255   :  { %2559 = vsyncpa [#allocation6], 1 }
0x2256   :  { %2560 = vsyncpa [#allocation9], 1 }
0x2257   :  { %2561 = vsyncpa [#allocation12], 1 }
0x2258   :  { %2562 = vsyncpa [#allocation15], 1 }
0x2259   :  { %2563 = vsyncpa [#allocation18], 1 }
0x225a   :  { %2564 = vsyncpa [#allocation21], 1 }
0x225b   :  { %2565 = vsyncpa [#allocation24], 1 }
0x225c   :  { %2566 = vsyncpa [#allocation4], 1 }

</bundles_post_ra>
